<compile_context>
chip_gen: v6e
topology: v6e:2x2x1
jax: 0.10.0
libtpu: 0.0.40
codegen_flags: <defaults>
</compile_context>

<pallas_src>
import jax
import jax.numpy as jnp
from jax.experimental import pallas as pl
from jax.experimental.pallas import tpu as pltpu

EPS = 1e-5
LANE = 128


def _round_up(x, m):
    return (x + m - 1) // m * m


# -----------------------------------------------------------------------------
# Pallas kernels
# -----------------------------------------------------------------------------
def _conv3x3_stats_kernel(xp_ref, w_ref, y_ref, s_ref, q_ref):
    """Per-image 3x3 conv (9 tap matmuls, bf16 MXU, fp32 accum) + per-image
    per-channel sum / sum-of-squares partials for batch-norm statistics."""
    _, h, w, cout = y_ref.shape
    cin = xp_ref.shape[-1]
    acc = jnp.zeros((h * w, cout), jnp.float32)
    for kh in range(3):
        for kw in range(3):
            xs = xp_ref[0, kh:kh + h, kw:kw + w, :]            # (h, w, cin) f32
            xs = xs.reshape(h * w, cin).astype(jnp.bfloat16)
            acc = acc + jnp.dot(xs, w_ref[kh * 3 + kw],
                                preferred_element_type=jnp.float32)
    y_ref[0] = acc.reshape(h, w, cout)
    s_ref[0] = jnp.sum(acc, axis=0, keepdims=True)
    q_ref[0] = jnp.sum(acc * acc, axis=0, keepdims=True)


def _bn_relu_conv3x3_stats_kernel(y1_ref, bn_ref, w_ref, y2_ref, s_ref, q_ref,
                                  hpad_ref):
    """bn1 (precomputed scale/shift) + ReLU fused with the second 3x3 conv.
    The zero halo for conv2 is built in a VMEM scratch; no HBM round trip of h1."""
    _, h, w, cout = y2_ref.shape
    sc = bn_ref[0:1, :].reshape(1, 1, cout)
    sh = bn_ref[1:2, :].reshape(1, 1, cout)
    h1 = jnp.maximum(y1_ref[0] * sc + sh, 0.0)                 # (h, w, cout) f32

    hpad_ref[...] = jnp.zeros(hpad_ref.shape, hpad_ref.dtype)  # zero halo
    hpad_ref[1:h + 1, 1:w + 1, :] = h1

    acc = jnp.zeros((h * w, cout), jnp.float32)
    for kh in range(3):
        for kw in range(3):
            hs = hpad_ref[kh:kh + h, kw:kw + w, :]
            hs = hs.reshape(h * w, cout).astype(jnp.bfloat16)
            acc = acc + jnp.dot(hs, w_ref[kh * 3 + kw],
                                preferred_element_type=jnp.float32)
    y2_ref[0] = acc.reshape(h, w, cout)
    s_ref[0] = jnp.sum(acc, axis=0, keepdims=True)
    q_ref[0] = jnp.sum(acc * acc, axis=0, keepdims=True)


def _bn_add_proj_relu_kernel(y2_ref, bn_ref, x_ref, wp_ref, o_ref):
    """bn2 (scale/shift, projection bias folded in) + 1x1 projection + add + ReLU."""
    _, h, w, cout = o_ref.shape
    cin = x_ref.shape[-1]
    sc = bn_ref[0:1, :]
    sh = bn_ref[1:2, :]
    y2 = y2_ref[0].reshape(h * w, cout)
    xf = x_ref[0].reshape(h * w, cin).astype(jnp.bfloat16)
    ident = jnp.dot(xf, wp_ref[...], preferred_element_type=jnp.float32)
    o_ref[0] = jnp.maximum(y2 * sc + sh + ident, 0.0).reshape(h, w, cout)


def _bn_add_id_relu_kernel(y2_ref, bn_ref, x_ref, o_ref):
    """bn2 (scale/shift) + identity add + ReLU (in_channels == out_channels:
    the projection matmul is skipped entirely)."""
    _, h, w, cout = o_ref.shape
    sc = bn_ref[0:1, :]
    sh = bn_ref[1:2, :]
    y2 = y2_ref[0].reshape(h * w, cout)
    xf = x_ref[0].reshape(h * w, cout)
    o_ref[0] = jnp.maximum(y2 * sc + sh + xf, 0.0).reshape(h, w, cout)


# -----------------------------------------------------------------------------
# JAX glue
# -----------------------------------------------------------------------------
def _pad_channels_1xc(v, cp):
    v = v.astype(jnp.float32).reshape(1, -1)
    return jnp.pad(v, ((0, 0), (0, cp - v.shape[-1])))


def _bn_scale_shift(s_part, q_part, gamma, beta, count, extra_shift=None):
    """Finalize BN batch stats from per-image partial sums (fp32, biased var)."""
    total = jnp.sum(s_part, axis=0)                      # (1, Cp)
    total_sq = jnp.sum(q_part, axis=0)
    mean = total / count
    var = jnp.maximum(total_sq / count - mean * mean, 0.0)
    inv_std = jax.lax.rsqrt(var + EPS)
    scale = gamma * inv_std
    shift = beta - mean * scale
    if extra_shift is not None:
        shift = shift + extra_shift
    slab = jnp.concatenate([scale, shift], axis=0)       # (2, Cp)
    return jnp.pad(slab, ((0, 6), (0, 0)))               # (8, Cp) sublane-aligned


def init_params(key, in_channels, out_channels):
    ks = jax.random.split(key, 10)
    params = {
        # conv weights stored as (kh, kw, cin, cout)
        "w1": jax.random.normal(ks[0], (3, 3, in_channels, out_channels), jnp.float32) * 0.2,
        "b1": jax.random.normal(ks[1], (out_channels,), jnp.float32) * 0.1,
        "g1": 1.0 + 0.1 * jax.random.normal(ks[2], (out_channels,), jnp.float32),
        "be1": 0.1 * jax.random.normal(ks[3], (out_channels,), jnp.float32),
        "w2": jax.random.normal(ks[4], (3, 3, out_channels, out_channels), jnp.float32) * 0.2,
        "b2": jax.random.normal(ks[5], (out_channels,), jnp.float32) * 0.1,
        "g2": 1.0 + 0.1 * jax.random.normal(ks[6], (out_channels,), jnp.float32),
        "be2": 0.1 * jax.random.normal(ks[7], (out_channels,), jnp.float32),
    }
    if in_channels != out_channels:
        params["wp"] = jax.random.normal(ks[8], (in_channels, out_channels), jnp.float32) * 0.2
        params["bp"] = jax.random.normal(ks[9], (out_channels,), jnp.float32) * 0.1
    return params


def residual_block_forward(x_nchw, params):
    """Forward pass matching ResidualBlock.forward (training-mode BN).  NCHW f32 in/out."""
    x = jnp.transpose(x_nchw, (0, 2, 3, 1)).astype(jnp.float32)      # -> NHWC
    n, h, w, cin = x.shape
    cout = params["w1"].shape[-1]
    cin_p = _round_up(cin, LANE)
    cout_p = _round_up(cout, LANE)
    m = n * h * w
    count = float(m)

    # Lane-dense channel padding + 1-pixel zero halo for the first 3x3 conv.
    xc = jnp.pad(x, ((0, 0), (0, 0), (0, 0), (0, cin_p - cin)))      # (N,H,W,Cin_p)
    x_halo = jnp.pad(xc, ((0, 0), (1, 1), (1, 1), (0, 0)))           # (N,H+2,W+2,Cin_p)

    # Conv biases b1/b2 are dropped on purpose: a per-channel constant added
    # before BatchNorm is exactly cancelled by the mean subtraction.
    w1 = jnp.pad(params["w1"], ((0, 0), (0, 0), (0, cin_p - cin), (0, cout_p - cout)))
    w1 = w1.reshape(9, cin_p, cout_p).astype(jnp.bfloat16)
    w2 = jnp.pad(params["w2"], ((0, 0), (0, 0), (0, cout_p - cout), (0, cout_p - cout)))
    w2 = w2.reshape(9, cout_p, cout_p).astype(jnp.bfloat16)
    g1 = _pad_channels_1xc(params["g1"], cout_p)
    be1 = _pad_channels_1xc(params["be1"], cout_p)
    g2 = _pad_channels_1xc(params["g2"], cout_p)
    be2 = _pad_channels_1xc(params["be2"], cout_p)

    cparams = pltpu.CompilerParams(dimension_semantics=("parallel",),
                                   vmem_limit_bytes=32 * 1024 * 1024)

    # ---- pass 1: y1 = conv1(x) (un-normalized) + bn1 partial statistics ----
    y1, s1, q1 = pl.pallas_call(
        _conv3x3_stats_kernel,
        grid=(n,),
        in_specs=[pl.BlockSpec((1, h + 2, w + 2, cin_p), lambda i: (i, 0, 0, 0)),
                  pl.BlockSpec((9, cin_p, cout_p), lambda i: (0, 0, 0))],
        out_specs=(pl.BlockSpec((1, h, w, cout_p), lambda i: (i, 0, 0, 0)),
                   pl.BlockSpec((1, 1, cout_p), lambda i: (i, 0, 0)),
                   pl.BlockSpec((1, 1, cout_p), lambda i: (i, 0, 0))),
        out_shape=(jax.ShapeDtypeStruct((n, h, w, cout_p), jnp.float32),
                   jax.ShapeDtypeStruct((n, 1, cout_p), jnp.float32),
                   jax.ShapeDtypeStruct((n, 1, cout_p), jnp.float32)),
        compiler_params=cparams,
        cost_estimate=pl.CostEstimate(
            flops=2 * m * 9 * cin_p * cout_p,
            transcendentals=0,
            bytes_accessed=x_halo.size * 4 + w1.size * 2 + (m + 2 * n) * cout_p * 4),
    )(x_halo, w1)

    bn1 = _bn_scale_shift(s1, q1, g1, be1, count)

    # ---- pass 2: h1 = relu(bn1(y1)); y2 = conv2(h1); bn2 partial statistics ----
    y2, s2, q2 = pl.pallas_call(
        _bn_relu_conv3x3_stats_kernel,
        grid=(n,),
        in_specs=[pl.BlockSpec((1, h, w, cout_p), lambda i: (i, 0, 0, 0)),
                  pl.BlockSpec((8, cout_p), lambda i: (0, 0)),
                  pl.BlockSpec((9, cout_p, cout_p), lambda i: (0, 0, 0))],
        out_specs=(pl.BlockSpec((1, h, w, cout_p), lambda i: (i, 0, 0, 0)),
                   pl.BlockSpec((1, 1, cout_p), lambda i: (i, 0, 0)),
                   pl.BlockSpec((1, 1, cout_p), lambda i: (i, 0, 0))),
        out_shape=(jax.ShapeDtypeStruct((n, h, w, cout_p), jnp.float32),
                   jax.ShapeDtypeStruct((n, 1, cout_p), jnp.float32),
                   jax.ShapeDtypeStruct((n, 1, cout_p), jnp.float32)),
        scratch_shapes=[pltpu.VMEM((h + 2, w + 2, cout_p), jnp.float32)],
        compiler_params=cparams,
        cost_estimate=pl.CostEstimate(
            flops=2 * m * 9 * cout_p * cout_p + 3 * m * cout_p,
            transcendentals=0,
            bytes_accessed=2 * m * cout_p * 4 + w2.size * 2 + 2 * n * cout_p * 4),
    )(y1, bn1, w2)

    # ---- pass 3: out = relu(bn2(y2) + identity/projection(x)) ----
    if "wp" in params:
        bp = _pad_channels_1xc(params["bp"], cout_p)
        bn2 = _bn_scale_shift(s2, q2, g2, be2, count, extra_shift=bp)
        wp = jnp.pad(params["wp"],
                     ((0, cin_p - cin), (0, cout_p - cout))).astype(jnp.bfloat16)
        out_p = pl.pallas_call(
            _bn_add_proj_relu_kernel,
            grid=(n,),
            in_specs=[pl.BlockSpec((1, h, w, cout_p), lambda i: (i, 0, 0, 0)),
                      pl.BlockSpec((8, cout_p), lambda i: (0, 0)),
                      pl.BlockSpec((1, h, w, cin_p), lambda i: (i, 0, 0, 0)),
                      pl.BlockSpec((cin_p, cout_p), lambda i: (0, 0))],
            out_specs=pl.BlockSpec((1, h, w, cout_p), lambda i: (i, 0, 0, 0)),
            out_shape=jax.ShapeDtypeStruct((n, h, w, cout_p), jnp.float32),
            compiler_params=cparams,
            cost_estimate=pl.CostEstimate(
                flops=2 * m * cin_p * cout_p + 3 * m * cout_p,
                transcendentals=0,
                bytes_accessed=m * (2 * cout_p + cin_p) * 4 + wp.size * 2),
        )(y2, bn2, xc, wp)
    else:
        bn2 = _bn_scale_shift(s2, q2, g2, be2, count)
        out_p = pl.pallas_call(
            _bn_add_id_relu_kernel,
            grid=(n,),
            in_specs=[pl.BlockSpec((1, h, w, cout_p), lambda i: (i, 0, 0, 0)),
                      pl.BlockSpec((8, cout_p), lambda i: (0, 0)),
                      pl.BlockSpec((1, h, w, cout_p), lambda i: (i, 0, 0, 0))],
            out_specs=pl.BlockSpec((1, h, w, cout_p), lambda i: (i, 0, 0, 0)),
            out_shape=jax.ShapeDtypeStruct((n, h, w, cout_p), jnp.float32),
            compiler_params=cparams,
            cost_estimate=pl.CostEstimate(
                flops=4 * m * cout_p,
                transcendentals=0,
                bytes_accessed=3 * m * cout_p * 4),
        )(y2, bn2, xc)

    out = out_p[:, :, :, :cout]                                       # drop channel pad
    return jnp.transpose(out, (0, 3, 1, 2))                           # -> NCHW


# -----------------------------------------------------------------------------
# Pure-JAX reference (PyTorch semantics: conv bias, training-mode BN)
# -----------------------------------------------------------------------------
def reference_forward(x_nchw, params):
    x = jnp.transpose(x_nchw, (0, 2, 3, 1)).astype(jnp.float32)

    def conv3x3(inp, w, b):
        y = jax.lax.conv_general_dilated(
            inp, w, window_strides=(1, 1), padding="SAME",
            dimension_numbers=("NHWC", "HWIO", "NHWC"))
        return y + b

    def bn(y, g, be):
        mean = jnp.mean(y, axis=(0, 1, 2), keepdims=True)
        var = jnp.mean(jnp.square(y - mean), axis=(0, 1, 2), keepdims=True)
        return (y - mean) * jax.lax.rsqrt(var + EPS) * g + be

    if "wp" in params:
        ident = jnp.einsum("nhwc,co->nhwo", x, params["wp"]) + params["bp"]
    else:
        ident = x
    h1 = jax.nn.relu(bn(conv3x3(x, params["w1"], params["b1"]), params["g1"], params["be1"]))
    h2 = bn(conv3x3(h1, params["w2"], params["b2"]), params["g2"], params["be2"])
    out = jax.nn.relu(h2 + ident)
    return jnp.transpose(out, (0, 3, 1, 2))


# -----------------------------------------------------------------------------
if __name__ == "__main__":
    N, C_IN, C_OUT, H, W = 2, 4, 8, 16, 16

    key = jax.random.PRNGKey(0)
    k_x, k_p = jax.random.split(key)
    x = jax.random.normal(k_x, (N, C_IN, H, W), jnp.float32)          # NCHW like PyTorch
    params = init_params(k_p, C_IN, C_OUT)

    fwd = jax.jit(residual_block_forward)
    out = jax.block_until_ready(fwd(x, params))
    ref = reference_forward(x, params)

    assert out.shape == (N, C_OUT, H, W)
    assert bool(jnp.all(jnp.isfinite(out)))
    max_err = float(jnp.max(jnp.abs(out - ref)))
    assert bool(jnp.allclose(out, ref, atol=5e-2, rtol=5e-2)), max_err

    print("KERNEL_OK")
</pallas_src>

<mosaic_0001>
module attributes {stable_mosaic.version = 11 : i64} {
  func.func @_conv3x3_stats_kernel(%arg0: i32, %arg1: memref<1x18x18x128xf32, #tpu.memory_space<vmem>>, %arg2: memref<9x128x128xbf16, #tpu.memory_space<vmem>>, %arg3: memref<1x16x16x128xf32, #tpu.memory_space<vmem>>, %arg4: memref<1x1x128xf32, #tpu.memory_space<vmem>>, %arg5: memref<1x1x128xf32, #tpu.memory_space<vmem>>) attributes {dimension_semantics = [#tpu.dimension_semantics<parallel>], iteration_bounds = array<i64: 2>, scalar_prefetch = 0 : i64, scratch_operands = 0 : i64, tpu.core_type = #tpu.core_type<tc>, window_params = [{transform_indices = @transform_0, window_bounds = array<i64: 1, 18, 18, 128>}, {pipeline_mode = #tpu.pipeline_mode<synchronous>, transform_indices = @transform_1, window_bounds = array<i64: 9, 128, 128>}, {transform_indices = @transform_2, window_bounds = array<i64: 1, 16, 16, 128>}, {transform_indices = @transform_3, window_bounds = array<i64: 1, 1, 128>}, {transform_indices = @transform_4, window_bounds = array<i64: 1, 1, 128>}]} {
    %cst = arith.constant 0.000000e+00 : f32
    %0 = vector.broadcast %cst : f32 to vector<256x128xf32>
    %c0 = arith.constant 0 : index
    %c0_0 = arith.constant 0 : index
    %c0_1 = arith.constant 0 : index
    %c0_2 = arith.constant 0 : index
    %1 = vector.load %arg1[%c0, %c0_0, %c0_1, %c0_2] : memref<1x18x18x128xf32, #tpu.memory_space<vmem>>, vector<1x16x16x128xf32>
    %2 = vector.shape_cast %1 : vector<1x16x16x128xf32> to vector<16x16x128xf32>
    %3 = vector.shape_cast %2 : vector<16x16x128xf32> to vector<256x128xf32>
    %4 = arith.truncf %3 : vector<256x128xf32> to vector<256x128xbf16>
    %c0_3 = arith.constant 0 : index
    %c0_4 = arith.constant 0 : index
    %c0_5 = arith.constant 0 : index
    %5 = vector.load %arg2[%c0_3, %c0_4, %c0_5] : memref<9x128x128xbf16, #tpu.memory_space<vmem>>, vector<1x128x128xbf16>
    %6 = vector.shape_cast %5 : vector<1x128x128xbf16> to vector<128x128xbf16>
    %cst_6 = arith.constant dense<0.000000e+00> : vector<256x128xf32>
    %7 = tpu.matmul %4, %6, %cst_6 {dimension_numbers = #tpu.dot_dimension_numbers<[1], [0], [0], [1], [0, 0, 1, 1], [], []>} : vector<256x128xbf16>, vector<128x128xbf16>, vector<256x128xf32> -> vector<256x128xf32>
    %8 = arith.addf %0, %7 : vector<256x128xf32>
    %c0_7 = arith.constant 0 : index
    %c0_8 = arith.constant 0 : index
    %c1 = arith.constant 1 : index
    %c0_9 = arith.constant 0 : index
    %9 = vector.load %arg1[%c0_7, %c0_8, %c1, %c0_9] : memref<1x18x18x128xf32, #tpu.memory_space<vmem>>, vector<1x16x16x128xf32>
    %10 = vector.shape_cast %9 : vector<1x16x16x128xf32> to vector<16x16x128xf32>
    %11 = vector.shape_cast %10 : vector<16x16x128xf32> to vector<256x128xf32>
    %12 = arith.truncf %11 : vector<256x128xf32> to vector<256x128xbf16>
    %c1_10 = arith.constant 1 : index
    %c0_11 = arith.constant 0 : index
    %c0_12 = arith.constant 0 : index
    %13 = vector.load %arg2[%c1_10, %c0_11, %c0_12] : memref<9x128x128xbf16, #tpu.memory_space<vmem>>, vector<1x128x128xbf16>
    %14 = vector.shape_cast %13 : vector<1x128x128xbf16> to vector<128x128xbf16>
    %cst_13 = arith.constant dense<0.000000e+00> : vector<256x128xf32>
    %15 = tpu.matmul %12, %14, %cst_13 {dimension_numbers = #tpu.dot_dimension_numbers<[1], [0], [0], [1], [0, 0, 1, 1], [], []>} : vector<256x128xbf16>, vector<128x128xbf16>, vector<256x128xf32> -> vector<256x128xf32>
    %16 = arith.addf %8, %15 : vector<256x128xf32>
    %c0_14 = arith.constant 0 : index
    %c0_15 = arith.constant 0 : index
    %c2 = arith.constant 2 : index
    %c0_16 = arith.constant 0 : index
    %17 = vector.load %arg1[%c0_14, %c0_15, %c2, %c0_16] : memref<1x18x18x128xf32, #tpu.memory_space<vmem>>, vector<1x16x16x128xf32>
    %18 = vector.shape_cast %17 : vector<1x16x16x128xf32> to vector<16x16x128xf32>
    %19 = vector.shape_cast %18 : vector<16x16x128xf32> to vector<256x128xf32>
    %20 = arith.truncf %19 : vector<256x128xf32> to vector<256x128xbf16>
    %c2_17 = arith.constant 2 : index
    %c0_18 = arith.constant 0 : index
    %c0_19 = arith.constant 0 : index
    %21 = vector.load %arg2[%c2_17, %c0_18, %c0_19] : memref<9x128x128xbf16, #tpu.memory_space<vmem>>, vector<1x128x128xbf16>
    %22 = vector.shape_cast %21 : vector<1x128x128xbf16> to vector<128x128xbf16>
    %cst_20 = arith.constant dense<0.000000e+00> : vector<256x128xf32>
    %23 = tpu.matmul %20, %22, %cst_20 {dimension_numbers = #tpu.dot_dimension_numbers<[1], [0], [0], [1], [0, 0, 1, 1], [], []>} : vector<256x128xbf16>, vector<128x128xbf16>, vector<256x128xf32> -> vector<256x128xf32>
    %24 = arith.addf %16, %23 : vector<256x128xf32>
    %c0_21 = arith.constant 0 : index
    %c1_22 = arith.constant 1 : index
    %c0_23 = arith.constant 0 : index
    %c0_24 = arith.constant 0 : index
    %25 = vector.load %arg1[%c0_21, %c1_22, %c0_23, %c0_24] : memref<1x18x18x128xf32, #tpu.memory_space<vmem>>, vector<1x16x16x128xf32>
    %26 = vector.shape_cast %25 : vector<1x16x16x128xf32> to vector<16x16x128xf32>
    %27 = vector.shape_cast %26 : vector<16x16x128xf32> to vector<256x128xf32>
    %28 = arith.truncf %27 : vector<256x128xf32> to vector<256x128xbf16>
    %c3 = arith.constant 3 : index
    %c0_25 = arith.constant 0 : index
    %c0_26 = arith.constant 0 : index
    %29 = vector.load %arg2[%c3, %c0_25, %c0_26] : memref<9x128x128xbf16, #tpu.memory_space<vmem>>, vector<1x128x128xbf16>
    %30 = vector.shape_cast %29 : vector<1x128x128xbf16> to vector<128x128xbf16>
    %cst_27 = arith.constant dense<0.000000e+00> : vector<256x128xf32>
    %31 = tpu.matmul %28, %30, %cst_27 {dimension_numbers = #tpu.dot_dimension_numbers<[1], [0], [0], [1], [0, 0, 1, 1], [], []>} : vector<256x128xbf16>, vector<128x128xbf16>, vector<256x128xf32> -> vector<256x128xf32>
    %32 = arith.addf %24, %31 : vector<256x128xf32>
    %c0_28 = arith.constant 0 : index
    %c1_29 = arith.constant 1 : index
    %c1_30 = arith.constant 1 : index
    %c0_31 = arith.constant 0 : index
    %33 = vector.load %arg1[%c0_28, %c1_29, %c1_30, %c0_31] : memref<1x18x18x128xf32, #tpu.memory_space<vmem>>, vector<1x16x16x128xf32>
    %34 = vector.shape_cast %33 : vector<1x16x16x128xf32> to vector<16x16x128xf32>
    %35 = vector.shape_cast %34 : vector<16x16x128xf32> to vector<256x128xf32>
    %36 = arith.truncf %35 : vector<256x128xf32> to vector<256x128xbf16>
    %c4 = arith.constant 4 : index
    %c0_32 = arith.constant 0 : index
    %c0_33 = arith.constant 0 : index
    %37 = vector.load %arg2[%c4, %c0_32, %c0_33] : memref<9x128x128xbf16, #tpu.memory_space<vmem>>, vector<1x128x128xbf16>
    %38 = vector.shape_cast %37 : vector<1x128x128xbf16> to vector<128x128xbf16>
    %cst_34 = arith.constant dense<0.000000e+00> : vector<256x128xf32>
    %39 = tpu.matmul %36, %38, %cst_34 {dimension_numbers = #tpu.dot_dimension_numbers<[1], [0], [0], [1], [0, 0, 1, 1], [], []>} : vector<256x128xbf16>, vector<128x128xbf16>, vector<256x128xf32> -> vector<256x128xf32>
    %40 = arith.addf %32, %39 : vector<256x128xf32>
    %c0_35 = arith.constant 0 : index
    %c1_36 = arith.constant 1 : index
    %c2_37 = arith.constant 2 : index
    %c0_38 = arith.constant 0 : index
    %41 = vector.load %arg1[%c0_35, %c1_36, %c2_37, %c0_38] : memref<1x18x18x128xf32, #tpu.memory_space<vmem>>, vector<1x16x16x128xf32>
    %42 = vector.shape_cast %41 : vector<1x16x16x128xf32> to vector<16x16x128xf32>
    %43 = vector.shape_cast %42 : vector<16x16x128xf32> to vector<256x128xf32>
    %44 = arith.truncf %43 : vector<256x128xf32> to vector<256x128xbf16>
    %c5 = arith.constant 5 : index
    %c0_39 = arith.constant 0 : index
    %c0_40 = arith.constant 0 : index
    %45 = vector.load %arg2[%c5, %c0_39, %c0_40] : memref<9x128x128xbf16, #tpu.memory_space<vmem>>, vector<1x128x128xbf16>
    %46 = vector.shape_cast %45 : vector<1x128x128xbf16> to vector<128x128xbf16>
    %cst_41 = arith.constant dense<0.000000e+00> : vector<256x128xf32>
    %47 = tpu.matmul %44, %46, %cst_41 {dimension_numbers = #tpu.dot_dimension_numbers<[1], [0], [0], [1], [0, 0, 1, 1], [], []>} : vector<256x128xbf16>, vector<128x128xbf16>, vector<256x128xf32> -> vector<256x128xf32>
    %48 = arith.addf %40, %47 : vector<256x128xf32>
    %c0_42 = arith.constant 0 : index
    %c2_43 = arith.constant 2 : index
    %c0_44 = arith.constant 0 : index
    %c0_45 = arith.constant 0 : index
    %49 = vector.load %arg1[%c0_42, %c2_43, %c0_44, %c0_45] : memref<1x18x18x128xf32, #tpu.memory_space<vmem>>, vector<1x16x16x128xf32>
    %50 = vector.shape_cast %49 : vector<1x16x16x128xf32> to vector<16x16x128xf32>
    %51 = vector.shape_cast %50 : vector<16x16x128xf32> to vector<256x128xf32>
    %52 = arith.truncf %51 : vector<256x128xf32> to vector<256x128xbf16>
    %c6 = arith.constant 6 : index
    %c0_46 = arith.constant 0 : index
    %c0_47 = arith.constant 0 : index
    %53 = vector.load %arg2[%c6, %c0_46, %c0_47] : memref<9x128x128xbf16, #tpu.memory_space<vmem>>, vector<1x128x128xbf16>
    %54 = vector.shape_cast %53 : vector<1x128x128xbf16> to vector<128x128xbf16>
    %cst_48 = arith.constant dense<0.000000e+00> : vector<256x128xf32>
    %55 = tpu.matmul %52, %54, %cst_48 {dimension_numbers = #tpu.dot_dimension_numbers<[1], [0], [0], [1], [0, 0, 1, 1], [], []>} : vector<256x128xbf16>, vector<128x128xbf16>, vector<256x128xf32> -> vector<256x128xf32>
    %56 = arith.addf %48, %55 : vector<256x128xf32>
    %c0_49 = arith.constant 0 : index
    %c2_50 = arith.constant 2 : index
    %c1_51 = arith.constant 1 : index
    %c0_52 = arith.constant 0 : index
    %57 = vector.load %arg1[%c0_49, %c2_50, %c1_51, %c0_52] : memref<1x18x18x128xf32, #tpu.memory_space<vmem>>, vector<1x16x16x128xf32>
    %58 = vector.shape_cast %57 : vector<1x16x16x128xf32> to vector<16x16x128xf32>
    %59 = vector.shape_cast %58 : vector<16x16x128xf32> to vector<256x128xf32>
    %60 = arith.truncf %59 : vector<256x128xf32> to vector<256x128xbf16>
    %c7 = arith.constant 7 : index
    %c0_53 = arith.constant 0 : index
    %c0_54 = arith.constant 0 : index
    %61 = vector.load %arg2[%c7, %c0_53, %c0_54] : memref<9x128x128xbf16, #tpu.memory_space<vmem>>, vector<1x128x128xbf16>
    %62 = vector.shape_cast %61 : vector<1x128x128xbf16> to vector<128x128xbf16>
    %cst_55 = arith.constant dense<0.000000e+00> : vector<256x128xf32>
    %63 = tpu.matmul %60, %62, %cst_55 {dimension_numbers = #tpu.dot_dimension_numbers<[1], [0], [0], [1], [0, 0, 1, 1], [], []>} : vector<256x128xbf16>, vector<128x128xbf16>, vector<256x128xf32> -> vector<256x128xf32>
    %64 = arith.addf %56, %63 : vector<256x128xf32>
    %c0_56 = arith.constant 0 : index
    %c2_57 = arith.constant 2 : index
    %c2_58 = arith.constant 2 : index
    %c0_59 = arith.constant 0 : index
    %65 = vector.load %arg1[%c0_56, %c2_57, %c2_58, %c0_59] : memref<1x18x18x128xf32, #tpu.memory_space<vmem>>, vector<1x16x16x128xf32>
    %66 = vector.shape_cast %65 : vector<1x16x16x128xf32> to vector<16x16x128xf32>
    %67 = vector.shape_cast %66 : vector<16x16x128xf32> to vector<256x128xf32>
    %68 = arith.truncf %67 : vector<256x128xf32> to vector<256x128xbf16>
    %c8 = arith.constant 8 : index
    %c0_60 = arith.constant 0 : index
    %c0_61 = arith.constant 0 : index
    %69 = vector.load %arg2[%c8, %c0_60, %c0_61] : memref<9x128x128xbf16, #tpu.memory_space<vmem>>, vector<1x128x128xbf16>
    %70 = vector.shape_cast %69 : vector<1x128x128xbf16> to vector<128x128xbf16>
    %cst_62 = arith.constant dense<0.000000e+00> : vector<256x128xf32>
    %71 = tpu.matmul %68, %70, %cst_62 {dimension_numbers = #tpu.dot_dimension_numbers<[1], [0], [0], [1], [0, 0, 1, 1], [], []>} : vector<256x128xbf16>, vector<128x128xbf16>, vector<256x128xf32> -> vector<256x128xf32>
    %72 = arith.addf %64, %71 : vector<256x128xf32>
    %73 = vector.shape_cast %72 : vector<256x128xf32> to vector<16x16x128xf32>
    %c0_63 = arith.constant 0 : index
    %c0_64 = arith.constant 0 : index
    %c0_65 = arith.constant 0 : index
    %c0_66 = arith.constant 0 : index
    %74 = vector.load %arg3[%c0_63, %c0_64, %c0_65, %c0_66] : memref<1x16x16x128xf32, #tpu.memory_space<vmem>>, vector<1x16x16x128xf32>
    %75 = vector.shape_cast %74 : vector<1x16x16x128xf32> to vector<16x16x128xf32>
    %76 = vector.shape_cast %73 : vector<16x16x128xf32> to vector<1x16x16x128xf32>
    tpu.vector_store %arg3[%c0_63, %c0_64, %c0_65, %c0_66], %76 {strides = array<i32>} : memref<1x16x16x128xf32, #tpu.memory_space<vmem>>, vector<1x16x16x128xf32>,
    %cst_67 = arith.constant dense<0.000000e+00> : vector<128xf32>
    %77 = vector.multi_reduction <add>, %72, %cst_67 [0] : vector<256x128xf32> to vector<128xf32>
    %78 = vector.shape_cast %77 : vector<128xf32> to vector<1x128xf32>
    %c0_68 = arith.constant 0 : index
    %c0_69 = arith.constant 0 : index
    %c0_70 = arith.constant 0 : index
    %79 = vector.load %arg4[%c0_68, %c0_69, %c0_70] : memref<1x1x128xf32, #tpu.memory_space<vmem>>, vector<1x1x128xf32>
    %80 = vector.shape_cast %79 : vector<1x1x128xf32> to vector<1x128xf32>
    %81 = vector.shape_cast %78 : vector<1x128xf32> to vector<1x1x128xf32>
    tpu.vector_store %arg4[%c0_68, %c0_69, %c0_70], %81 {strides = array<i32>} : memref<1x1x128xf32, #tpu.memory_space<vmem>>, vector<1x1x128xf32>,
    %82 = arith.mulf %72, %72 : vector<256x128xf32>
    %cst_71 = arith.constant dense<0.000000e+00> : vector<128xf32>
    %83 = vector.multi_reduction <add>, %82, %cst_71 [0] : vector<256x128xf32> to vector<128xf32>
    %84 = vector.shape_cast %83 : vector<128xf32> to vector<1x128xf32>
    %c0_72 = arith.constant 0 : index
    %c0_73 = arith.constant 0 : index
    %c0_74 = arith.constant 0 : index
    %85 = vector.load %arg5[%c0_72, %c0_73, %c0_74] : memref<1x1x128xf32, #tpu.memory_space<vmem>>, vector<1x1x128xf32>
    %86 = vector.shape_cast %85 : vector<1x1x128xf32> to vector<1x128xf32>
    %87 = vector.shape_cast %84 : vector<1x128xf32> to vector<1x1x128xf32>
    tpu.vector_store %arg5[%c0_72, %c0_73, %c0_74], %87 {strides = array<i32>} : memref<1x1x128xf32, #tpu.memory_space<vmem>>, vector<1x1x128xf32>,
    return
  }
  func.func @transform_0(%arg0: i32) -> (i32, i32, i32, i32) {
    %c0_i32 = arith.constant 0 : i32
    %c0_i32_0 = arith.constant 0 : i32
    %c0_i32_1 = arith.constant 0 : i32
    %c0_i32_2 = arith.constant 0 : i32
    return %arg0, %c0_i32, %c0_i32_0, %c0_i32_1 : i32, i32, i32, i32
  }
  func.func @transform_1(%arg0: i32) -> (i32, i32, i32) {
    %c0_i32 = arith.constant 0 : i32
    %c0_i32_0 = arith.constant 0 : i32
    %c0_i32_1 = arith.constant 0 : i32
    %c0_i32_2 = arith.constant 0 : i32
    return %c0_i32, %c0_i32_0, %c0_i32_1 : i32, i32, i32
  }
  func.func @transform_2(%arg0: i32) -> (i32, i32, i32, i32) {
    %c0_i32 = arith.constant 0 : i32
    %c0_i32_0 = arith.constant 0 : i32
    %c0_i32_1 = arith.constant 0 : i32
    %c0_i32_2 = arith.constant 0 : i32
    return %arg0, %c0_i32, %c0_i32_0, %c0_i32_1 : i32, i32, i32, i32
  }
  func.func @transform_3(%arg0: i32) -> (i32, i32, i32) {
    %c0_i32 = arith.constant 0 : i32
    %c0_i32_0 = arith.constant 0 : i32
    %c0_i32_1 = arith.constant 0 : i32
    return %arg0, %c0_i32, %c0_i32_0 : i32, i32, i32
  }
  func.func @transform_4(%arg0: i32) -> (i32, i32, i32) {
    %c0_i32 = arith.constant 0 : i32
    %c0_i32_0 = arith.constant 0 : i32
    %c0_i32_1 = arith.constant 0 : i32
    return %arg0, %c0_i32, %c0_i32_0 : i32, i32, i32
  }
}

module attributes {stable_mosaic.version = 11 : i64} {
  func.func @_bn_add_proj_relu_kernel(%arg0: i32, %arg1: memref<1x16x16x128xf32, #tpu.memory_space<vmem>>, %arg2: memref<8x128xf32, #tpu.memory_space<vmem>>, %arg3: memref<1x16x16x128xf32, #tpu.memory_space<vmem>>, %arg4: memref<128x128xbf16, #tpu.memory_space<vmem>>, %arg5: memref<1x16x16x128xf32, #tpu.memory_space<vmem>>) attributes {dimension_semantics = [#tpu.dimension_semantics<parallel>], iteration_bounds = array<i64: 2>, scalar_prefetch = 0 : i64, scratch_operands = 0 : i64, tpu.core_type = #tpu.core_type<tc>, window_params = [{transform_indices = @transform_0, window_bounds = array<i64: 1, 16, 16, 128>}, {pipeline_mode = #tpu.pipeline_mode<synchronous>, transform_indices = @transform_1, window_bounds = array<i64: 8, 128>}, {transform_indices = @transform_2, window_bounds = array<i64: 1, 16, 16, 128>}, {pipeline_mode = #tpu.pipeline_mode<synchronous>, transform_indices = @transform_3, window_bounds = array<i64: 128, 128>}, {transform_indices = @transform_4, window_bounds = array<i64: 1, 16, 16, 128>}]} {
    %c0 = arith.constant 0 : index
    %c0_0 = arith.constant 0 : index
    %0 = vector.load %arg2[%c0, %c0_0] : memref<8x128xf32, #tpu.memory_space<vmem>>, vector<1x128xf32>
    %c1 = arith.constant 1 : index
    %c0_1 = arith.constant 0 : index
    %1 = vector.load %arg2[%c1, %c0_1] : memref<8x128xf32, #tpu.memory_space<vmem>>, vector<1x128xf32>
    %c0_2 = arith.constant 0 : index
    %c0_3 = arith.constant 0 : index
    %c0_4 = arith.constant 0 : index
    %c0_5 = arith.constant 0 : index
    %2 = vector.load %arg1[%c0_2, %c0_3, %c0_4, %c0_5] : memref<1x16x16x128xf32, #tpu.memory_space<vmem>>, vector<1x16x16x128xf32>
    %3 = vector.shape_cast %2 : vector<1x16x16x128xf32> to vector<16x16x128xf32>
    %4 = vector.shape_cast %3 : vector<16x16x128xf32> to vector<256x128xf32>
    %c0_6 = arith.constant 0 : index
    %c0_7 = arith.constant 0 : index
    %c0_8 = arith.constant 0 : index
    %c0_9 = arith.constant 0 : index
    %5 = vector.load %arg3[%c0_6, %c0_7, %c0_8, %c0_9] : memref<1x16x16x128xf32, #tpu.memory_space<vmem>>, vector<1x16x16x128xf32>
    %6 = vector.shape_cast %5 : vector<1x16x16x128xf32> to vector<16x16x128xf32>
    %7 = vector.shape_cast %6 : vector<16x16x128xf32> to vector<256x128xf32>
    %8 = arith.truncf %7 : vector<256x128xf32> to vector<256x128xbf16>
    %c0_10 = arith.constant 0 : index
    %c0_11 = arith.constant 0 : index
    %9 = vector.load %arg4[%c0_10, %c0_11] : memref<128x128xbf16, #tpu.memory_space<vmem>>, vector<128x128xbf16>
    %cst = arith.constant dense<0.000000e+00> : vector<256x128xf32>
    %10 = tpu.matmul %8, %9, %cst {dimension_numbers = #tpu.dot_dimension_numbers<[1], [0], [0], [1], [0, 0, 1, 1], [], []>} : vector<256x128xbf16>, vector<128x128xbf16>, vector<256x128xf32> -> vector<256x128xf32>
    %11 = vector.broadcast %0 : vector<1x128xf32> to vector<256x128xf32>
    %12 = arith.mulf %4, %11 : vector<256x128xf32>
    %13 = vector.broadcast %1 : vector<1x128xf32> to vector<256x128xf32>
    %14 = arith.addf %12, %13 : vector<256x128xf32>
    %15 = arith.addf %14, %10 : vector<256x128xf32>
    %cst_12 = arith.constant 0.000000e+00 : f32
    %16 = vector.broadcast %cst_12 : f32 to vector<256x128xf32>
    %17 = arith.maximumf %15, %16 : vector<256x128xf32>
    %18 = vector.shape_cast %17 : vector<256x128xf32> to vector<16x16x128xf32>
    %c0_13 = arith.constant 0 : index
    %c0_14 = arith.constant 0 : index
    %c0_15 = arith.constant 0 : index
    %c0_16 = arith.constant 0 : index
    %19 = vector.load %arg5[%c0_13, %c0_14, %c0_15, %c0_16] : memref<1x16x16x128xf32, #tpu.memory_space<vmem>>, vector<1x16x16x128xf32>
    %20 = vector.shape_cast %19 : vector<1x16x16x128xf32> to vector<16x16x128xf32>
    %21 = vector.shape_cast %18 : vector<16x16x128xf32> to vector<1x16x16x128xf32>
    tpu.vector_store %arg5[%c0_13, %c0_14, %c0_15, %c0_16], %21 {strides = array<i32>} : memref<1x16x16x128xf32, #tpu.memory_space<vmem>>, vector<1x16x16x128xf32>,
    return
  }
  func.func @transform_0(%arg0: i32) -> (i32, i32, i32, i32) {
    %c0_i32 = arith.constant 0 : i32
    %c0_i32_0 = arith.constant 0 : i32
    %c0_i32_1 = arith.constant 0 : i32
    %c0_i32_2 = arith.constant 0 : i32
    return %arg0, %c0_i32, %c0_i32_0, %c0_i32_1 : i32, i32, i32, i32
  }
  func.func @transform_1(%arg0: i32) -> (i32, i32) {
    %c0_i32 = arith.constant 0 : i32
    %c0_i32_0 = arith.constant 0 : i32
    %c0_i32_1 = arith.constant 0 : i32
    return %c0_i32, %c0_i32_0 : i32, i32
  }
  func.func @transform_2(%arg0: i32) -> (i32, i32, i32, i32) {
    %c0_i32 = arith.constant 0 : i32
    %c0_i32_0 = arith.constant 0 : i32
    %c0_i32_1 = arith.constant 0 : i32
    %c0_i32_2 = arith.constant 0 : i32
    return %arg0, %c0_i32, %c0_i32_0, %c0_i32_1 : i32, i32, i32, i32
  }
  func.func @transform_3(%arg0: i32) -> (i32, i32) {
    %c0_i32 = arith.constant 0 : i32
    %c0_i32_0 = arith.constant 0 : i32
    %c0_i32_1 = arith.constant 0 : i32
    return %c0_i32, %c0_i32_0 : i32, i32
  }
  func.func @transform_4(%arg0: i32) -> (i32, i32, i32, i32) {
    %c0_i32 = arith.constant 0 : i32
    %c0_i32_0 = arith.constant 0 : i32
    %c0_i32_1 = arith.constant 0 : i32
    %c0_i32_2 = arith.constant 0 : i32
    return %arg0, %c0_i32, %c0_i32_0, %c0_i32_1 : i32, i32, i32, i32
  }
}

module attributes {stable_mosaic.version = 11 : i64} {
  func.func @_bn_relu_conv3x3_stats_kernel(%arg0: i32, %arg1: memref<1x16x16x128xf32, #tpu.memory_space<vmem>>, %arg2: memref<8x128xf32, #tpu.memory_space<vmem>>, %arg3: memref<9x128x128xbf16, #tpu.memory_space<vmem>>, %arg4: memref<1x16x16x128xf32, #tpu.memory_space<vmem>>, %arg5: memref<1x1x128xf32, #tpu.memory_space<vmem>>, %arg6: memref<1x1x128xf32, #tpu.memory_space<vmem>>, %arg7: memref<18x18x128xf32, #tpu.memory_space<vmem>>) attributes {dimension_semantics = [#tpu.dimension_semantics<parallel>], iteration_bounds = array<i64: 2>, scalar_prefetch = 0 : i64, scratch_operands = 1 : i64, tpu.core_type = #tpu.core_type<tc>, window_params = [{transform_indices = @transform_0, window_bounds = array<i64: 1, 16, 16, 128>}, {pipeline_mode = #tpu.pipeline_mode<synchronous>, transform_indices = @transform_1, window_bounds = array<i64: 8, 128>}, {pipeline_mode = #tpu.pipeline_mode<synchronous>, transform_indices = @transform_2, window_bounds = array<i64: 9, 128, 128>}, {transform_indices = @transform_3, window_bounds = array<i64: 1, 16, 16, 128>}, {transform_indices = @transform_4, window_bounds = array<i64: 1, 1, 128>}, {transform_indices = @transform_5, window_bounds = array<i64: 1, 1, 128>}]} {
    %c0 = arith.constant 0 : index
    %c0_0 = arith.constant 0 : index
    %0 = vector.load %arg2[%c0, %c0_0] : memref<8x128xf32, #tpu.memory_space<vmem>>, vector<1x128xf32>
    %1 = vector.shape_cast %0 : vector<1x128xf32> to vector<1x1x128xf32>
    %c1 = arith.constant 1 : index
    %c0_1 = arith.constant 0 : index
    %2 = vector.load %arg2[%c1, %c0_1] : memref<8x128xf32, #tpu.memory_space<vmem>>, vector<1x128xf32>
    %3 = vector.shape_cast %2 : vector<1x128xf32> to vector<1x1x128xf32>
    %c0_2 = arith.constant 0 : index
    %c0_3 = arith.constant 0 : index
    %c0_4 = arith.constant 0 : index
    %c0_5 = arith.constant 0 : index
    %4 = vector.load %arg1[%c0_2, %c0_3, %c0_4, %c0_5] : memref<1x16x16x128xf32, #tpu.memory_space<vmem>>, vector<1x16x16x128xf32>
    %5 = vector.shape_cast %4 : vector<1x16x16x128xf32> to vector<16x16x128xf32>
    %6 = vector.broadcast %1 : vector<1x1x128xf32> to vector<16x16x128xf32>
    %7 = arith.mulf %5, %6 : vector<16x16x128xf32>
    %8 = vector.broadcast %3 : vector<1x1x128xf32> to vector<16x16x128xf32>
    %9 = arith.addf %7, %8 : vector<16x16x128xf32>
    %cst = arith.constant 0.000000e+00 : f32
    %10 = vector.broadcast %cst : f32 to vector<16x16x128xf32>
    %11 = arith.maximumf %9, %10 : vector<16x16x128xf32>
    %cst_6 = arith.constant 0.000000e+00 : f32
    %12 = vector.broadcast %cst_6 : f32 to vector<18x18x128xf32>
    %c0_7 = arith.constant 0 : index
    %c0_8 = arith.constant 0 : index
    %c0_9 = arith.constant 0 : index
    %13 = vector.load %arg7[%c0_7, %c0_8, %c0_9] : memref<18x18x128xf32, #tpu.memory_space<vmem>>, vector<18x18x128xf32>
    tpu.vector_store %arg7[%c0_7, %c0_8, %c0_9], %12 {strides = array<i32>} : memref<18x18x128xf32, #tpu.memory_space<vmem>>, vector<18x18x128xf32>,
    %c1_10 = arith.constant 1 : index
    %c1_11 = arith.constant 1 : index
    %c0_12 = arith.constant 0 : index
    %14 = vector.load %arg7[%c1_10, %c1_11, %c0_12] : memref<18x18x128xf32, #tpu.memory_space<vmem>>, vector<16x16x128xf32>
    tpu.vector_store %arg7[%c1_10, %c1_11, %c0_12], %11 {strides = array<i32>} : memref<18x18x128xf32, #tpu.memory_space<vmem>>, vector<16x16x128xf32>,
    %cst_13 = arith.constant 0.000000e+00 : f32
    %15 = vector.broadcast %cst_13 : f32 to vector<256x128xf32>
    %c0_14 = arith.constant 0 : index
    %c0_15 = arith.constant 0 : index
    %c0_16 = arith.constant 0 : index
    %16 = vector.load %arg7[%c0_14, %c0_15, %c0_16] : memref<18x18x128xf32, #tpu.memory_space<vmem>>, vector<16x16x128xf32>
    %17 = vector.shape_cast %16 : vector<16x16x128xf32> to vector<256x128xf32>
    %18 = arith.truncf %17 : vector<256x128xf32> to vector<256x128xbf16>
    %c0_17 = arith.constant 0 : index
    %c0_18 = arith.constant 0 : index
    %c0_19 = arith.constant 0 : index
    %19 = vector.load %arg3[%c0_17, %c0_18, %c0_19] : memref<9x128x128xbf16, #tpu.memory_space<vmem>>, vector<1x128x128xbf16>
    %20 = vector.shape_cast %19 : vector<1x128x128xbf16> to vector<128x128xbf16>
    %cst_20 = arith.constant dense<0.000000e+00> : vector<256x128xf32>
    %21 = tpu.matmul %18, %20, %cst_20 {dimension_numbers = #tpu.dot_dimension_numbers<[1], [0], [0], [1], [0, 0, 1, 1], [], []>} : vector<256x128xbf16>, vector<128x128xbf16>, vector<256x128xf32> -> vector<256x128xf32>
    %22 = arith.addf %15, %21 : vector<256x128xf32>
    %c0_21 = arith.constant 0 : index
    %c1_22 = arith.constant 1 : index
    %c0_23 = arith.constant 0 : index
    %23 = vector.load %arg7[%c0_21, %c1_22, %c0_23] : memref<18x18x128xf32, #tpu.memory_space<vmem>>, vector<16x16x128xf32>
    %24 = vector.shape_cast %23 : vector<16x16x128xf32> to vector<256x128xf32>
    %25 = arith.truncf %24 : vector<256x128xf32> to vector<256x128xbf16>
    %c1_24 = arith.constant 1 : index
    %c0_25 = arith.constant 0 : index
    %c0_26 = arith.constant 0 : index
    %26 = vector.load %arg3[%c1_24, %c0_25, %c0_26] : memref<9x128x128xbf16, #tpu.memory_space<vmem>>, vector<1x128x128xbf16>
    %27 = vector.shape_cast %26 : vector<1x128x128xbf16> to vector<128x128xbf16>
    %cst_27 = arith.constant dense<0.000000e+00> : vector<256x128xf32>
    %28 = tpu.matmul %25, %27, %cst_27 {dimension_numbers = #tpu.dot_dimension_numbers<[1], [0], [0], [1], [0, 0, 1, 1], [], []>} : vector<256x128xbf16>, vector<128x128xbf16>, vector<256x128xf32> -> vector<256x128xf32>
    %29 = arith.addf %22, %28 : vector<256x128xf32>
    %c0_28 = arith.constant 0 : index
    %c2 = arith.constant 2 : index
    %c0_29 = arith.constant 0 : index
    %30 = vector.load %arg7[%c0_28, %c2, %c0_29] : memref<18x18x128xf32, #tpu.memory_space<vmem>>, vector<16x16x128xf32>
    %31 = vector.shape_cast %30 : vector<16x16x128xf32> to vector<256x128xf32>
    %32 = arith.truncf %31 : vector<256x128xf32> to vector<256x128xbf16>
    %c2_30 = arith.constant 2 : index
    %c0_31 = arith.constant 0 : index
    %c0_32 = arith.constant 0 : index
    %33 = vector.load %arg3[%c2_30, %c0_31, %c0_32] : memref<9x128x128xbf16, #tpu.memory_space<vmem>>, vector<1x128x128xbf16>
    %34 = vector.shape_cast %33 : vector<1x128x128xbf16> to vector<128x128xbf16>
    %cst_33 = arith.constant dense<0.000000e+00> : vector<256x128xf32>
    %35 = tpu.matmul %32, %34, %cst_33 {dimension_numbers = #tpu.dot_dimension_numbers<[1], [0], [0], [1], [0, 0, 1, 1], [], []>} : vector<256x128xbf16>, vector<128x128xbf16>, vector<256x128xf32> -> vector<256x128xf32>
    %36 = arith.addf %29, %35 : vector<256x128xf32>
    %c1_34 = arith.constant 1 : index
    %c0_35 = arith.constant 0 : index
    %c0_36 = arith.constant 0 : index
    %37 = vector.load %arg7[%c1_34, %c0_35, %c0_36] : memref<18x18x128xf32, #tpu.memory_space<vmem>>, vector<16x16x128xf32>
    %38 = vector.shape_cast %37 : vector<16x16x128xf32> to vector<256x128xf32>
    %39 = arith.truncf %38 : vector<256x128xf32> to vector<256x128xbf16>
    %c3 = arith.constant 3 : index
    %c0_37 = arith.constant 0 : index
    %c0_38 = arith.constant 0 : index
    %40 = vector.load %arg3[%c3, %c0_37, %c0_38] : memref<9x128x128xbf16, #tpu.memory_space<vmem>>, vector<1x128x128xbf16>
    %41 = vector.shape_cast %40 : vector<1x128x128xbf16> to vector<128x128xbf16>
    %cst_39 = arith.constant dense<0.000000e+00> : vector<256x128xf32>
    %42 = tpu.matmul %39, %41, %cst_39 {dimension_numbers = #tpu.dot_dimension_numbers<[1], [0], [0], [1], [0, 0, 1, 1], [], []>} : vector<256x128xbf16>, vector<128x128xbf16>, vector<256x128xf32> -> vector<256x128xf32>
    %43 = arith.addf %36, %42 : vector<256x128xf32>
    %c1_40 = arith.constant 1 : index
    %c1_41 = arith.constant 1 : index
    %c0_42 = arith.constant 0 : index
    %44 = vector.load %arg7[%c1_40, %c1_41, %c0_42] : memref<18x18x128xf32, #tpu.memory_space<vmem>>, vector<16x16x128xf32>
    %45 = vector.shape_cast %44 : vector<16x16x128xf32> to vector<256x128xf32>
    %46 = arith.truncf %45 : vector<256x128xf32> to vector<256x128xbf16>
    %c4 = arith.constant 4 : index
    %c0_43 = arith.constant 0 : index
    %c0_44 = arith.constant 0 : index
    %47 = vector.load %arg3[%c4, %c0_43, %c0_44] : memref<9x128x128xbf16, #tpu.memory_space<vmem>>, vector<1x128x128xbf16>
    %48 = vector.shape_cast %47 : vector<1x128x128xbf16> to vector<128x128xbf16>
    %cst_45 = arith.constant dense<0.000000e+00> : vector<256x128xf32>
    %49 = tpu.matmul %46, %48, %cst_45 {dimension_numbers = #tpu.dot_dimension_numbers<[1], [0], [0], [1], [0, 0, 1, 1], [], []>} : vector<256x128xbf16>, vector<128x128xbf16>, vector<256x128xf32> -> vector<256x128xf32>
    %50 = arith.addf %43, %49 : vector<256x128xf32>
    %c1_46 = arith.constant 1 : index
    %c2_47 = arith.constant 2 : index
    %c0_48 = arith.constant 0 : index
    %51 = vector.load %arg7[%c1_46, %c2_47, %c0_48] : memref<18x18x128xf32, #tpu.memory_space<vmem>>, vector<16x16x128xf32>
    %52 = vector.shape_cast %51 : vector<16x16x128xf32> to vector<256x128xf32>
    %53 = arith.truncf %52 : vector<256x128xf32> to vector<256x128xbf16>
    %c5 = arith.constant 5 : index
    %c0_49 = arith.constant 0 : index
    %c0_50 = arith.constant 0 : index
    %54 = vector.load %arg3[%c5, %c0_49, %c0_50] : memref<9x128x128xbf16, #tpu.memory_space<vmem>>, vector<1x128x128xbf16>
    %55 = vector.shape_cast %54 : vector<1x128x128xbf16> to vector<128x128xbf16>
    %cst_51 = arith.constant dense<0.000000e+00> : vector<256x128xf32>
    %56 = tpu.matmul %53, %55, %cst_51 {dimension_numbers = #tpu.dot_dimension_numbers<[1], [0], [0], [1], [0, 0, 1, 1], [], []>} : vector<256x128xbf16>, vector<128x128xbf16>, vector<256x128xf32> -> vector<256x128xf32>
    %57 = arith.addf %50, %56 : vector<256x128xf32>
    %c2_52 = arith.constant 2 : index
    %c0_53 = arith.constant 0 : index
    %c0_54 = arith.constant 0 : index
    %58 = vector.load %arg7[%c2_52, %c0_53, %c0_54] : memref<18x18x128xf32, #tpu.memory_space<vmem>>, vector<16x16x128xf32>
    %59 = vector.shape_cast %58 : vector<16x16x128xf32> to vector<256x128xf32>
    %60 = arith.truncf %59 : vector<256x128xf32> to vector<256x128xbf16>
    %c6 = arith.constant 6 : index
    %c0_55 = arith.constant 0 : index
    %c0_56 = arith.constant 0 : index
    %61 = vector.load %arg3[%c6, %c0_55, %c0_56] : memref<9x128x128xbf16, #tpu.memory_space<vmem>>, vector<1x128x128xbf16>
    %62 = vector.shape_cast %61 : vector<1x128x128xbf16> to vector<128x128xbf16>
    %cst_57 = arith.constant dense<0.000000e+00> : vector<256x128xf32>
    %63 = tpu.matmul %60, %62, %cst_57 {dimension_numbers = #tpu.dot_dimension_numbers<[1], [0], [0], [1], [0, 0, 1, 1], [], []>} : vector<256x128xbf16>, vector<128x128xbf16>, vector<256x128xf32> -> vector<256x128xf32>
    %64 = arith.addf %57, %63 : vector<256x128xf32>
    %c2_58 = arith.constant 2 : index
    %c1_59 = arith.constant 1 : index
    %c0_60 = arith.constant 0 : index
    %65 = vector.load %arg7[%c2_58, %c1_59, %c0_60] : memref<18x18x128xf32, #tpu.memory_space<vmem>>, vector<16x16x128xf32>
    %66 = vector.shape_cast %65 : vector<16x16x128xf32> to vector<256x128xf32>
    %67 = arith.truncf %66 : vector<256x128xf32> to vector<256x128xbf16>
    %c7 = arith.constant 7 : index
    %c0_61 = arith.constant 0 : index
    %c0_62 = arith.constant 0 : index
    %68 = vector.load %arg3[%c7, %c0_61, %c0_62] : memref<9x128x128xbf16, #tpu.memory_space<vmem>>, vector<1x128x128xbf16>
    %69 = vector.shape_cast %68 : vector<1x128x128xbf16> to vector<128x128xbf16>
    %cst_63 = arith.constant dense<0.000000e+00> : vector<256x128xf32>
    %70 = tpu.matmul %67, %69, %cst_63 {dimension_numbers = #tpu.dot_dimension_numbers<[1], [0], [0], [1], [0, 0, 1, 1], [], []>} : vector<256x128xbf16>, vector<128x128xbf16>, vector<256x128xf32> -> vector<256x128xf32>
    %71 = arith.addf %64, %70 : vector<256x128xf32>
    %c2_64 = arith.constant 2 : index
    %c2_65 = arith.constant 2 : index
    %c0_66 = arith.constant 0 : index
    %72 = vector.load %arg7[%c2_64, %c2_65, %c0_66] : memref<18x18x128xf32, #tpu.memory_space<vmem>>, vector<16x16x128xf32>
    %73 = vector.shape_cast %72 : vector<16x16x128xf32> to vector<256x128xf32>
    %74 = arith.truncf %73 : vector<256x128xf32> to vector<256x128xbf16>
    %c8 = arith.constant 8 : index
    %c0_67 = arith.constant 0 : index
    %c0_68 = arith.constant 0 : index
    %75 = vector.load %arg3[%c8, %c0_67, %c0_68] : memref<9x128x128xbf16, #tpu.memory_space<vmem>>, vector<1x128x128xbf16>
    %76 = vector.shape_cast %75 : vector<1x128x128xbf16> to vector<128x128xbf16>
    %cst_69 = arith.constant dense<0.000000e+00> : vector<256x128xf32>
    %77 = tpu.matmul %74, %76, %cst_69 {dimension_numbers = #tpu.dot_dimension_numbers<[1], [0], [0], [1], [0, 0, 1, 1], [], []>} : vector<256x128xbf16>, vector<128x128xbf16>, vector<256x128xf32> -> vector<256x128xf32>
    %78 = arith.addf %71, %77 : vector<256x128xf32>
    %79 = vector.shape_cast %78 : vector<256x128xf32> to vector<16x16x128xf32>
    %c0_70 = arith.constant 0 : index
    %c0_71 = arith.constant 0 : index
    %c0_72 = arith.constant 0 : index
    %c0_73 = arith.constant 0 : index
    %80 = vector.load %arg4[%c0_70, %c0_71, %c0_72, %c0_73] : memref<1x16x16x128xf32, #tpu.memory_space<vmem>>, vector<1x16x16x128xf32>
    %81 = vector.shape_cast %80 : vector<1x16x16x128xf32> to vector<16x16x128xf32>
    %82 = vector.shape_cast %79 : vector<16x16x128xf32> to vector<1x16x16x128xf32>
    tpu.vector_store %arg4[%c0_70, %c0_71, %c0_72, %c0_73], %82 {strides = array<i32>} : memref<1x16x16x128xf32, #tpu.memory_space<vmem>>, vector<1x16x16x128xf32>,
    %cst_74 = arith.constant dense<0.000000e+00> : vector<128xf32>
    %83 = vector.multi_reduction <add>, %78, %cst_74 [0] : vector<256x128xf32> to vector<128xf32>
    %84 = vector.shape_cast %83 : vector<128xf32> to vector<1x128xf32>
    %c0_75 = arith.constant 0 : index
    %c0_76 = arith.constant 0 : index
    %c0_77 = arith.constant 0 : index
    %85 = vector.load %arg5[%c0_75, %c0_76, %c0_77] : memref<1x1x128xf32, #tpu.memory_space<vmem>>, vector<1x1x128xf32>
    %86 = vector.shape_cast %85 : vector<1x1x128xf32> to vector<1x128xf32>
    %87 = vector.shape_cast %84 : vector<1x128xf32> to vector<1x1x128xf32>
    tpu.vector_store %arg5[%c0_75, %c0_76, %c0_77], %87 {strides = array<i32>} : memref<1x1x128xf32, #tpu.memory_space<vmem>>, vector<1x1x128xf32>,
    %88 = arith.mulf %78, %78 : vector<256x128xf32>
    %cst_78 = arith.constant dense<0.000000e+00> : vector<128xf32>
    %89 = vector.multi_reduction <add>, %88, %cst_78 [0] : vector<256x128xf32> to vector<128xf32>
    %90 = vector.shape_cast %89 : vector<128xf32> to vector<1x128xf32>
    %c0_79 = arith.constant 0 : index
    %c0_80 = arith.constant 0 : index
    %c0_81 = arith.constant 0 : index
    %91 = vector.load %arg6[%c0_79, %c0_80, %c0_81] : memref<1x1x128xf32, #tpu.memory_space<vmem>>, vector<1x1x128xf32>
    %92 = vector.shape_cast %91 : vector<1x1x128xf32> to vector<1x128xf32>
    %93 = vector.shape_cast %90 : vector<1x128xf32> to vector<1x1x128xf32>
    tpu.vector_store %arg6[%c0_79, %c0_80, %c0_81], %93 {strides = array<i32>} : memref<1x1x128xf32, #tpu.memory_space<vmem>>, vector<1x1x128xf32>,
    return
  }
  func.func @transform_0(%arg0: i32) -> (i32, i32, i32, i32) {
    %c0_i32 = arith.constant 0 : i32
    %c0_i32_0 = arith.constant 0 : i32
    %c0_i32_1 = arith.constant 0 : i32
    %c0_i32_2 = arith.constant 0 : i32
    return %arg0, %c0_i32, %c0_i32_0, %c0_i32_1 : i32, i32, i32, i32
  }
  func.func @transform_1(%arg0: i32) -> (i32, i32) {
    %c0_i32 = arith.constant 0 : i32
    %c0_i32_0 = arith.constant 0 : i32
    %c0_i32_1 = arith.constant 0 : i32
    return %c0_i32, %c0_i32_0 : i32, i32
  }
  func.func @transform_2(%arg0: i32) -> (i32, i32, i32) {
    %c0_i32 = arith.constant 0 : i32
    %c0_i32_0 = arith.constant 0 : i32
    %c0_i32_1 = arith.constant 0 : i32
    %c0_i32_2 = arith.constant 0 : i32
    return %c0_i32, %c0_i32_0, %c0_i32_1 : i32, i32, i32
  }
  func.func @transform_3(%arg0: i32) -> (i32, i32, i32, i32) {
    %c0_i32 = arith.constant 0 : i32
    %c0_i32_0 = arith.constant 0 : i32
    %c0_i32_1 = arith.constant 0 : i32
    %c0_i32_2 = arith.constant 0 : i32
    return %arg0, %c0_i32, %c0_i32_0, %c0_i32_1 : i32, i32, i32, i32
  }
  func.func @transform_4(%arg0: i32) -> (i32, i32, i32) {
    %c0_i32 = arith.constant 0 : i32
    %c0_i32_0 = arith.constant 0 : i32
    %c0_i32_1 = arith.constant 0 : i32
    return %arg0, %c0_i32, %c0_i32_0 : i32, i32, i32
  }
  func.func @transform_5(%arg0: i32) -> (i32, i32, i32) {
    %c0_i32 = arith.constant 0 : i32
    %c0_i32_0 = arith.constant 0 : i32
    %c0_i32_1 = arith.constant 0 : i32
    return %arg0, %c0_i32, %c0_i32_0 : i32, i32, i32
  }
}

</mosaic_0001>

<bundles_post_ra>
// kernel: residual_block_forward.5
= control target key start
LH: loop header
LB: loop body
LE: loop exit
PB: predicated region body
PF: predicated region fallthrough
CT: control target
= control target key end

     0   :  { %s924_s15 = smov 0   ;;  %s1149_s0 = inlined_call_operand.vmem [shape: f32[2,16,16,128], index: 0, kind: input, shape index: {}]   ;;  %s1150_s1 = inlined_call_operand.vmem [shape: f32[8,128], index: 1, kind: input, shape index: {}]   ;;  %s1151_s2 = inlined_call_operand.vmem [shape: f32[2,16,16,128], index: 2, kind: input, shape index: {}]   ;;  %s1152_s3 = inlined_call_operand.vmem [shape: bf16[128,128], index: 3, kind: input, shape index: {}]   ;;  %s1153_s4 = inlined_call_operand.vmem [shape: f32[2,16,16,128], index: 4, kind: output, shape index: {}]  }
   0x1 LB: > { %s761_s16 = sadd.s32 4294967295, %s897_s15   ;;  %p765_p0 = scmp.ge.s32.totalorder %s897_s15, 1  ;;  %s897_s15 = sphi %s924_s15, %s14_s15  }
   0x2   : > { %p172_p1 = scmp.lt.s32.totalorder %s897_s15, 3 }
   0x4   : > { %p173_p2 = pnand %p765_p0, %p172_p1 }
   0x5   : > { %p203_p3 = scmp.lt.s32.totalorder (!%p173_p2), %s761_s16, 1 }
   0x6   : > { %176 = sbr.rel (%p173_p2) target bundleno = 272 (0x110), region = 36 }
   0xb   : > { %v883_v0 = vld [vmem:[%s1152_s3 + $0x38] sm:$0xff]   ;;  %v884_v1 = vld [vmem:[%s1152_s3 + $0x30] sm:$0xff]   ;;  %s1155_s16 = smov (!%p203_p3, %s761_s16), 1  ;;  %v885_v2 = vld [vmem:[%s1152_s3 + $0x28] sm:$0xff]  }
   0xc   : > { %811 = vmatprep.subr.bf16.mxu0 %v883_v0  ;;  %859 = vmatprep.subr.bf16.mxu1 %v883_v0  ;;  %s941_s23 = sshll.u32 %s1155_s16, 8  ;;  %v886_v3 = vld [vmem:[%s1152_s3 + $0x20] sm:$0xff]   ;;  %v887_v10 = vld [vmem:[%s1152_s3 + $0x18] sm:$0xff]   ;;  %v888_v11 = vld [vmem:[%s1152_s3 + $0x10] sm:$0xff]  }
   0xd   : > { %812 = vmatpush3.bf16.msra.mxu0 %v883_v0  ;;  %867 = vmatpush3.bf16.msra.mxu1 %v883_v0  ;;  %s947_s26 = scalar_lea.vmem %s1151_s2, %s941_s23  ;;  %v889_v12 = vld [vmem:[%s1152_s3 + $0x8] sm:$0xff]   ;;  %v890_v13 = vld [vmem:[%s1152_s3] sm:$0xff]   ;;  %s1000_s13 = scalar_lea.vmem %s1149_s0, %s941_s23 }
   0xe   : > { %813 = vmatprep.subr.bf16.mxu0 %v884_v1  ;;  %860 = vmatprep.subr.bf16.mxu1 %v884_v1  ;;  %v253_v4 = vld [vmem:[%s947_s26] sm:$0xff]  ;;  %v254_v5 = vld [vmem:[%s947_s26 + $0x8] sm:$0xff]  ;;  %v255_v14 = vld [vmem:[%s947_s26 + $0x10] sm:$0xff]  ;;  %s1046_s21 = scalar_lea.vmem %s1153_s4, %s941_s23 }
   0xf   : > { %v269_v6 = vld [vmem:[%s947_s26 + $0x80] sm:$0xff]  ;;  %v285_v7 = vpack.c.bf16 %v254_v5, %v253_v4  ;;  %v270_v8 = vld [vmem:[%s947_s26 + $0x88] sm:$0xff]  ;;  %v256_v15 = vld [vmem:[%s947_s26 + $0x18] sm:$0xff] }
  0x10   : > { %v293_v9 = vpack.c.bf16 %v270_v8, %v269_v6  ;;  %v271_v16 = vld [vmem:[%s947_s26 + $0x90] sm:$0xff]  ;;  %v272_v17 = vld [vmem:[%s947_s26 + $0x98] sm:$0xff]  ;;  %v257_v18 = vld [vmem:[%s947_s26 + $0x20] sm:$0xff]  ;;  %v286_v22 = vpack.c.bf16 %v256_v15, %v255_v14 }
  0x11   : > { %814 = vmatpush3.bf16.msra.mxu0 %v884_v1  ;;  %868 = vmatpush3.bf16.msra.mxu1 %v884_v1  ;;  %v258_v19 = vld [vmem:[%s947_s26 + $0x28] sm:$0xff]  ;;  %v273_v20 = vld [vmem:[%s947_s26 + $0xa0] sm:$0xff]  ;;  %v294_v23 = vpack.c.bf16 %v272_v17, %v271_v16  ;;  %v259_v26 = vld [vmem:[%s947_s26 + $0x30] sm:$0xff] }
  0x12   : > { %815 = vmatprep.subr.bf16.mxu0 %v885_v2  ;;  %861 = vmatprep.subr.bf16.mxu1 %v885_v2  ;;  %v274_v21 = vld [vmem:[%s947_s26 + $0xa8] sm:$0xff]  ;;  %v287_v24 = vpack.c.bf16 %v258_v19, %v257_v18  ;;  %v260_v27 = vld [vmem:[%s947_s26 + $0x38] sm:$0xff]  ;;  %v275_v28 = vld [vmem:[%s947_s26 + $0xb0] sm:$0xff] }
  0x13   : > { %827 = vmatprep.mubr.bf16.mxu0 %v285_v7  ;;  %843 = vmatprep.mubr.bf16.mxu1 %v293_v9  ;;  %v295_v25 = vpack.c.bf16 %v274_v21, %v273_v20  ;;  %v276_v29 = vld [vmem:[%s947_s26 + $0xb8] sm:$0xff]  ;;  %v261_v30 = vld [vmem:[%s947_s26 + $0x40] sm:$0xff]  ;;  %v262_v31 = vld [vmem:[%s947_s26 + $0x48] sm:$0xff]  ;;  %v288_v34 = vpack.c.bf16 %v260_v27, %v259_v26 }
  0x14   : > { %v277_v32 = vld [vmem:[%s947_s26 + $0xc0] sm:$0xff]  ;;  %v278_v33 = vld [vmem:[%s947_s26 + $0xc8] sm:$0xff]  ;;  %v296_v35 = vpack.c.bf16 %v276_v29, %v275_v28  ;;  %v289_v36 = vpack.c.bf16 %v262_v31, %v261_v30  ;;  %v263_v38 = vld [vmem:[%s947_s26 + $0x50] sm:$0xff] }
  0x15   : > { %816 = vmatpush3.bf16.msra.mxu0 %v885_v2  ;;  %869 = vmatpush3.bf16.msra.mxu1 %v885_v2  ;;  %v297_v37 = vpack.c.bf16 %v278_v33, %v277_v32  ;;  %v264_v39 = vld [vmem:[%s947_s26 + $0x58] sm:$0xff]  ;;  %v279_v40 = vld [vmem:[%s947_s26 + $0xd0] sm:$0xff]  ;;  %v265_v42 = vld [vmem:[%s947_s26 + $0x60] sm:$0xff] }
  0x16   : > { %817 = vmatprep.subr.bf16.mxu0 %v886_v3  ;;  %862 = vmatprep.subr.bf16.mxu1 %v886_v3  ;;  %v280_v41 = vld [vmem:[%s947_s26 + $0xd8] sm:$0xff]  ;;  %v266_v43 = vld [vmem:[%s947_s26 + $0x68] sm:$0xff]  ;;  %v281_v44 = vld [vmem:[%s947_s26 + $0xe0] sm:$0xff]  ;;  %v290_v46 = vpack.c.bf16 %v264_v39, %v263_v38 }
  0x17   : > { %v282_v45 = vld [vmem:[%s947_s26 + $0xe8] sm:$0xff]  ;;  %v298_v47 = vpack.c.bf16 %v280_v41, %v279_v40  ;;  %v291_v48 = vpack.c.bf16 %v266_v43, %v265_v42  ;;  %v267_v50 = vld [vmem:[%s947_s26 + $0x70] sm:$0xff]  ;;  %v268_v51 = vld [vmem:[%s947_s26 + $0x78] sm:$0xff] }
  0x18   : > { %v299_v49 = vpack.c.bf16 %v282_v45, %v281_v44  ;;  %v283_v52 = vld [vmem:[%s947_s26 + $0xf0] sm:$0xff]  ;;  %v284_v53 = vld [vmem:[%s947_s26 + $0xf8] sm:$0xff]  ;;  %v292_v54 = vpack.c.bf16 %v268_v51, %v267_v50  ;;  %v1005_v56 = vld [vmem:[%s1150_s1] ss:$0 sm:$0xff] }
  0x19   : > { %818 = vmatpush3.bf16.msra.mxu0 %v886_v3  ;;  %870 = vmatpush3.bf16.msra.mxu1 %v886_v3  ;;  %v300_v55 = vpack.c.bf16 %v284_v53, %v283_v52  ;;  %v223_v57 = vld [vmem:[%s1000_s13 + $0x10] sm:$0xff]  ;;  %v221_v59 = vld [vmem:[%s1000_s13] sm:$0xff]  ;;  %v224_v0 = vld [vmem:[%s1000_s13 + $0x18] sm:$0xff] }
  0x1a   : > { %819 = vmatprep.subr.bf16.mxu0 %v887_v10  ;;  %863 = vmatprep.subr.bf16.mxu1 %v887_v10  ;;  %v239_v58 = vld [vmem:[%s1000_s13 + $0x90] sm:$0xff]  ;;  %v237_v60 = vld [vmem:[%s1000_s13 + $0x80] sm:$0xff]  ;;  %v532_v61 = vmul.f32 %v1005_v56, %v223_v57  ;;  %v240_v1 = vld [vmem:[%s1000_s13 + $0x98] sm:$0xff]  ;;  %v530_v2 = vmul.f32 %v1005_v56, %v221_v59  ;;  %v533_v8 = vmul.f32 %v1005_v56, %v224_v0 }
  0x1b   : > { %v548_v62 = vmul.f32 %v1005_v56, %v239_v58  ;;  %v1016_v63 = vld [vmem:[%s1150_s1 + $0x1] ss:$0 sm:$0xff]  ;;  %v546_v3 = vmul.f32 %v1005_v56, %v237_v60  ;;  %v222_v4 = vld [vmem:[%s1000_s13 + $0x8] sm:$0xff]  ;;  %v549_v9 = vmul.f32 %v1005_v56, %v240_v1  ;;  %v228_v26 = vld [vmem:[%s1000_s13 + $0x38] sm:$0xff] }
  0x1c   : > { %v238_v5 = vld [vmem:[%s1000_s13 + $0x88] sm:$0xff]  ;;  %v568_v6 = vadd.f32 %v1016_v63, %v532_v61  ;;  %v566_v14 = vadd.f32 %v1016_v63, %v530_v2  ;;  %v225_v16 = vld [vmem:[%s1000_s13 + $0x20] sm:$0xff]  ;;  %v244_v27 = vld [vmem:[%s1000_s13 + $0xb8] sm:$0xff]  ;;  %v537_v44 = vmul.f32 %v1005_v56, %v228_v26 }
  0x1d   : > { %820 = vmatpush3.bf16.msra.mxu0 %v887_v10  ;;  %871 = vmatpush3.bf16.msra.mxu1 %v887_v10  ;;  %v584_v7 = vadd.f32 %v1016_v63, %v548_v62  ;;  %v227_v10 = vld [vmem:[%s1000_s13 + $0x30] sm:$0xff]  ;;  %v582_v15 = vadd.f32 %v1016_v63, %v546_v3  ;;  %v241_v17 = vld [vmem:[%s1000_s13 + $0xa0] sm:$0xff]  ;;  %v534_v32 = vmul.f32 %v1005_v56, %v225_v16  ;;  %v226_v38 = vld [vmem:[%s1000_s13 + $0x28] sm:$0xff] }
  0x1e   : > { %821 = vmatprep.subr.bf16.mxu0 %v888_v11  ;;  %864 = vmatprep.subr.bf16.mxu1 %v888_v11  ;;  %v536_v20 = vmul.f32 %v1005_v56, %v227_v10  ;;  %v550_v33 = vmul.f32 %v1005_v56, %v241_v17  ;;  %v242_v39 = vld [vmem:[%s1000_s13 + $0xa8] sm:$0xff]  ;;  %v553_v45 = vmul.f32 %v1005_v56, %v244_v27  ;;  %v231_v50 = vld [vmem:[%s1000_s13 + $0x50] sm:$0xff]  ;;  %v229_v0 = vld [vmem:[%s1000_s13 + $0x40] sm:$0xff] }
  0x1f   : > { %v247_v51 = vld [vmem:[%s1000_s13 + $0xd0] sm:$0xff]  ;;  %v535_v57 = vmul.f32 %v1005_v56, %v226_v38  ;;  %v551_v58 = vmul.f32 %v1005_v56, %v242_v39  ;;  %v245_v1 = vld [vmem:[%s1000_s13 + $0xc0] sm:$0xff] }
  0x20   : > { %v572_v42 = vadd.f32 %v1016_v63, %v536_v20 }
  0x21   : > { %822 = vmatpush3.bf16.msra.mxu0 %v888_v11  ;;  %872 = vmatpush3.bf16.msra.mxu1 %v888_v11  ;;  %v243_v11 = vld [vmem:[%s1000_s13 + $0xb0] sm:$0xff]  ;;  %v571_v16 = vadd.f32 %v1016_v63, %v535_v57  ;;  %v587_v17 = vadd.f32 %v1016_v63, %v551_v58 }
  0x22   : > { %823 = vmatprep.subr.bf16.mxu0 %v889_v12  ;;  %865 = vmatprep.subr.bf16.mxu1 %v889_v12  ;;  %v552_v21 = vmul.f32 %v1005_v56, %v243_v11 }
  0x24   : > { %v588_v43 = vadd.f32 %v1016_v63, %v552_v21 }
  0x25   : > { %824 = vmatpush3.bf16.msra.mxu0 %v889_v12  ;;  %873 = vmatpush3.bf16.msra.mxu1 %v889_v12  ;;  %v531_v12 = vmul.f32 %v1005_v56, %v222_v4  ;;  %v573_v4 = vadd.f32 %v1016_v63, %v537_v44 }
  0x26   : > { %825 = vmatprep.subr.bf16.mxu0 %v890_v13  ;;  %866 = vmatprep.subr.bf16.mxu1 %v890_v13 }
  0x27   : > { %v567_v30 = vadd.f32 %v1016_v63, %v531_v12  ;;  %v232_v12 = vld [vmem:[%s1000_s13 + $0x58] sm:$0xff] }
  0x29   : > { %826 = vmatpush3.bf16.msra.mxu0 %v890_v13  ;;  %874 = vmatpush3.bf16.msra.mxu1 %v890_v13  ;;  %v547_v13 = vmul.f32 %v1005_v56, %v238_v5  ;;  %v589_v5 = vadd.f32 %v1016_v63, %v553_v45 }
  0x2b   : > { %v583_v31 = vadd.f32 %v1016_v63, %v547_v13  ;;  %v248_v13 = vld [vmem:[%s1000_s13 + $0xd8] sm:$0xff] }
  0x2c   : > { %828 = vmatmul.mubr.bf16.vlgmr.msra.gmra.mxu0 %v286_v22  ;;  %844 = vmatmul.mubr.bf16.vlgmr.msra.gmra.mxu1 %v294_v23 }
  0x2d   : > { %831 = vmatprep.mubr.bf16.mxu0 %v287_v24  ;;  %847 = vmatprep.mubr.bf16.mxu1 %v295_v25  ;;  %v569_v24 = vadd.f32 %v1016_v63, %v533_v8  ;;  %v585_v25 = vadd.f32 %v1016_v63, %v549_v9 }
  0x34   : > { %832 = vmatmul.mubr.bf16.gmra.mxu0 %v288_v34  ;;  %848 = vmatmul.mubr.bf16.gmra.mxu1 %v296_v35 }
  0x35   : > { %835 = vmatprep.mubr.bf16.mxu0 %v289_v36  ;;  %851 = vmatprep.mubr.bf16.mxu1 %v297_v37 }
  0x3c   : > { %836 = vmatmul.mubr.bf16.gmra.mxu0 %v290_v46  ;;  %852 = vmatmul.mubr.bf16.gmra.mxu1 %v298_v47 }
  0x3d   : > { %839 = vmatprep.mubr.bf16.mxu0 %v291_v48  ;;  %855 = vmatprep.mubr.bf16.mxu1 %v299_v49 }
  0x44   : > { %840 = vmatmul.mubr.bf16.gmra.mxu0 %v292_v54  ;;  %856 = vmatmul.mubr.bf16.gmra.mxu1 %v300_v55  ;;  %v570_v54 = vadd.f32 %v1016_v63, %v534_v32  ;;  %v586_v55 = vadd.f32 %v1016_v63, %v550_v33 }
  0xec   : > { %v829_v18 = vpop.f32.mrf.mxu0  ;;  %v845_v19 = vpop.f32.mrf.mxu1 }
  0xed   : > { %v600_v22 = vadd.f32 %v829_v18, %v568_v6  ;;  %v616_v23 = vadd.f32 %v845_v19, %v584_v7  ;;  %v540_v6 = vmul.f32 %v1005_v56, %v231_v50  ;;  %v556_v7 = vmul.f32 %v1005_v56, %v247_v51 }
  0xee   : > { %v399_v28 = vpop.f32.mrf.mxu0  ;;  %v463_v29 = vpop.f32.mrf.mxu1  ;;  %v538_v18 = vmul.f32 %v1005_v56, %v229_v0  ;;  %v554_v19 = vmul.f32 %v1005_v56, %v245_v1 }
  0xef   : > { %v632_v34 = vmax.f32 %v600_v22, 0.0  ;;  %v648_v35 = vmax.f32 %v616_v23, 0.0  ;;  %v598_v36 = vadd.f32 %v566_v14, %v399_v28  ;;  %v614_v37 = vadd.f32 %v582_v15, %v463_v29 }
  0xf0   : > { %v830_v40 = vpop.f32.mrf.mxu0  ;;  %v846_v41 = vpop.f32.mrf.mxu1  ;;  %v576_v28 = vadd.f32 %v1016_v63, %v540_v6  ;;  %v592_v29 = vadd.f32 %v1016_v63, %v556_v7 }
  0xf1   : > { %664 = vst [vmem:[%s1046_s21 + $0x10] sm:$0xff] %v632_v34  ;;  %680 = vst [vmem:[%s1046_s21 + $0x90] sm:$0xff] %v648_v35  ;;  %v630_v46 = vmax.f32 %v598_v36, 0.0  ;;  %v646_v47 = vmax.f32 %v614_v37, 0.0  ;;  %v601_v48 = vadd.f32 %v830_v40, %v569_v24  ;;  %v617_v49 = vadd.f32 %v846_v41, %v585_v25  ;;  %v230_v24 = vld [vmem:[%s1000_s13 + $0x48] sm:$0xff]  ;;  %v235_v36 = vld [vmem:[%s1000_s13 + $0x70] sm:$0xff] }
  0xf2   : > { %v402_v52 = vpop.f32.mrf.mxu0  ;;  %v466_v53 = vpop.f32.mrf.mxu1  ;;  %v246_v25 = vld [vmem:[%s1000_s13 + $0xc8] sm:$0xff]  ;;  %v251_v37 = vld [vmem:[%s1000_s13 + $0xf0] sm:$0xff]  ;;  %v574_v40 = vadd.f32 %v1016_v63, %v538_v18  ;;  %v590_v41 = vadd.f32 %v1016_v63, %v554_v19 }
  0xf3   : > { %662 = vst [vmem:[%s1046_s21] sm:$0xff] %v630_v46  ;;  %678 = vst [vmem:[%s1046_s21 + $0x80] sm:$0xff] %v646_v47  ;;  %v633_v59 = vmax.f32 %v601_v48, 0.0  ;;  %v649_v60 = vmax.f32 %v617_v49, 0.0  ;;  %v599_v61 = vadd.f32 %v567_v30, %v402_v52  ;;  %v615_v62 = vadd.f32 %v583_v31, %v466_v53  ;;  %v233_v48 = vld [vmem:[%s1000_s13 + $0x60] sm:$0xff] }
  0xf4   : > { %v833_v2 = vpop.f32.mrf.mxu0  ;;  %v849_v3 = vpop.f32.mrf.mxu1  ;;  %v541_v30 = vmul.f32 %v1005_v56, %v232_v12  ;;  %v557_v31 = vmul.f32 %v1005_v56, %v248_v13  ;;  %v249_v49 = vld [vmem:[%s1000_s13 + $0xe0] sm:$0xff] }
  0xf5   : > { %665 = vst [vmem:[%s1046_s21 + $0x18] sm:$0xff] %v633_v59  ;;  %681 = vst [vmem:[%s1046_s21 + $0x98] sm:$0xff] %v649_v60  ;;  %v631_v8 = vmax.f32 %v599_v61, 0.0  ;;  %v647_v9 = vmax.f32 %v615_v62, 0.0  ;;  %v604_v10 = vadd.f32 %v833_v2, %v572_v42  ;;  %v620_v11 = vadd.f32 %v849_v3, %v588_v43  ;;  %v236_v61 = vld [vmem:[%s1000_s13 + $0x78] sm:$0xff] }
  0xf6   : > { %v415_v14 = vpop.f32.mrf.mxu0  ;;  %v479_v15 = vpop.f32.mrf.mxu1  ;;  %v539_v42 = vmul.f32 %v1005_v56, %v230_v24  ;;  %v555_v43 = vmul.f32 %v1005_v56, %v246_v25  ;;  %v577_v52 = vadd.f32 %v1016_v63, %v541_v30  ;;  %v593_v53 = vadd.f32 %v1016_v63, %v557_v31  ;;  %v252_v62 = vld [vmem:[%s1000_s13 + $0xf8] sm:$0xff] }
  0xf7   : > { %663 = vst [vmem:[%s1046_s21 + $0x8] sm:$0xff] %v631_v8  ;;  %679 = vst [vmem:[%s1046_s21 + $0x88] sm:$0xff] %v647_v9  ;;  %v636_v20 = vmax.f32 %v604_v10, 0.0  ;;  %v652_v21 = vmax.f32 %v620_v11, 0.0  ;;  %v602_v22 = vadd.f32 %v570_v54, %v415_v14  ;;  %v618_v23 = vadd.f32 %v586_v55, %v479_v15  ;;  %v234_v10 = vld [vmem:[%s1000_s13 + $0x68] sm:$0xff] }
  0xf8   : > { %v834_v26 = vpop.f32.mrf.mxu0  ;;  %v850_v27 = vpop.f32.mrf.mxu1  ;;  %v544_v54 = vmul.f32 %v1005_v56, %v235_v36  ;;  %v560_v55 = vmul.f32 %v1005_v56, %v251_v37  ;;  %v575_v2 = vadd.f32 %v1016_v63, %v539_v42  ;;  %v591_v3 = vadd.f32 %v1016_v63, %v555_v43  ;;  %v250_v11 = vld [vmem:[%s1000_s13 + $0xe8] sm:$0xff] }
  0xf9   : > { %668 = vst [vmem:[%s1046_s21 + $0x30] sm:$0xff] %v636_v20  ;;  %684 = vst [vmem:[%s1046_s21 + $0xb0] sm:$0xff] %v652_v21  ;;  %v634_v32 = vmax.f32 %v602_v22, 0.0  ;;  %v650_v33 = vmax.f32 %v618_v23, 0.0  ;;  %v605_v34 = vadd.f32 %v834_v26, %v573_v4  ;;  %v621_v35 = vadd.f32 %v850_v27, %v589_v5 }
  0xfa   : > { %v418_v38 = vpop.f32.mrf.mxu0  ;;  %v482_v39 = vpop.f32.mrf.mxu1  ;;  %v542_v4 = vmul.f32 %v1005_v56, %v233_v48  ;;  %v558_v5 = vmul.f32 %v1005_v56, %v249_v49  ;;  %v580_v14 = vadd.f32 %v1016_v63, %v544_v54  ;;  %v596_v15 = vadd.f32 %v1016_v63, %v560_v55 }
  0xfb   : > { %666 = vst [vmem:[%s1046_s21 + $0x20] sm:$0xff] %v634_v32  ;;  %682 = vst [vmem:[%s1046_s21 + $0xa0] sm:$0xff] %v650_v33  ;;  %v637_v44 = vmax.f32 %v605_v34, 0.0  ;;  %v653_v45 = vmax.f32 %v621_v35, 0.0  ;;  %v603_v46 = vadd.f32 %v571_v16, %v418_v38  ;;  %v619_v47 = vadd.f32 %v587_v17, %v482_v39 }
  0xfc   : > { %v837_v50 = vpop.f32.mrf.mxu0  ;;  %v853_v51 = vpop.f32.mrf.mxu1  ;;  %v545_v16 = vmul.f32 %v1005_v56, %v236_v61  ;;  %v561_v17 = vmul.f32 %v1005_v56, %v252_v62  ;;  %v578_v24 = vadd.f32 %v1016_v63, %v542_v4  ;;  %v594_v25 = vadd.f32 %v1016_v63, %v558_v5 }
  0xfd   : > { %669 = vst [vmem:[%s1046_s21 + $0x38] sm:$0xff] %v637_v44  ;;  %685 = vst [vmem:[%s1046_s21 + $0xb8] sm:$0xff] %v653_v45  ;;  %v635_v57 = vmax.f32 %v603_v46, 0.0  ;;  %v651_v58 = vmax.f32 %v619_v47, 0.0  ;;  %v608_v59 = vadd.f32 %v837_v50, %v576_v28  ;;  %v624_v60 = vadd.f32 %v853_v51, %v592_v29 }
  0xfe   : > { %v431_v0 = vpop.f32.mrf.mxu0  ;;  %v495_v1 = vpop.f32.mrf.mxu1  ;;  %v543_v26 = vmul.f32 %v1005_v56, %v234_v10  ;;  %v559_v27 = vmul.f32 %v1005_v56, %v250_v11  ;;  %v581_v34 = vadd.f32 %v1016_v63, %v545_v16  ;;  %v597_v35 = vadd.f32 %v1016_v63, %v561_v17 }
  0xff   : > { %667 = vst [vmem:[%s1046_s21 + $0x28] sm:$0xff] %v635_v57  ;;  %683 = vst [vmem:[%s1046_s21 + $0xa8] sm:$0xff] %v651_v58  ;;  %v640_v6 = vmax.f32 %v608_v59, 0.0  ;;  %v656_v7 = vmax.f32 %v624_v60, 0.0  ;;  %v606_v8 = vadd.f32 %v574_v40, %v431_v0  ;;  %v622_v9 = vadd.f32 %v590_v41, %v495_v1 }
 0x100   : > { %v838_v12 = vpop.f32.mrf.mxu0  ;;  %v854_v13 = vpop.f32.mrf.mxu1  ;;  %v579_v41 = vadd.f32 %v1016_v63, %v543_v26  ;;  %v595_v42 = vadd.f32 %v1016_v63, %v559_v27 }
 0x101   : > { %672 = vst [vmem:[%s1046_s21 + $0x50] sm:$0xff] %v640_v6  ;;  %688 = vst [vmem:[%s1046_s21 + $0xd0] sm:$0xff] %v656_v7  ;;  %v638_v18 = vmax.f32 %v606_v8, 0.0  ;;  %v654_v19 = vmax.f32 %v622_v9, 0.0  ;;  %v609_v20 = vadd.f32 %v838_v12, %v577_v52  ;;  %v625_v21 = vadd.f32 %v854_v13, %v593_v53 }
 0x102   : > { %v434_v22 = vpop.f32.mrf.mxu0  ;;  %v498_v23 = vpop.f32.mrf.mxu1 }
 0x103   : > { %670 = vst [vmem:[%s1046_s21 + $0x40] sm:$0xff] %v638_v18  ;;  %686 = vst [vmem:[%s1046_s21 + $0xc0] sm:$0xff] %v654_v19  ;;  %v641_v28 = vmax.f32 %v609_v20, 0.0  ;;  %v657_v29 = vmax.f32 %v625_v21, 0.0  ;;  %v607_v30 = vadd.f32 %v575_v2, %v434_v22  ;;  %v623_v31 = vadd.f32 %v591_v3, %v498_v23 }
 0x104   : > { %v841_v32 = vpop.f32.mrf.mxu0  ;;  %v857_v33 = vpop.f32.mrf.mxu1 }
 0x105   : > { %673 = vst [vmem:[%s1046_s21 + $0x58] sm:$0xff] %v641_v28  ;;  %689 = vst [vmem:[%s1046_s21 + $0xd8] sm:$0xff] %v657_v29  ;;  %v639_v36 = vmax.f32 %v607_v30, 0.0  ;;  %v655_v37 = vmax.f32 %v623_v31, 0.0  ;;  %v612_v56 = vadd.f32 %v841_v32, %v580_v14  ;;  %v628_v38 = vadd.f32 %v857_v33, %v596_v15 }
 0x106   : > { %v447_v39 = vpop.f32.mrf.mxu0  ;;  %v511_v40 = vpop.f32.mrf.mxu1 }
 0x107   : > { %671 = vst [vmem:[%s1046_s21 + $0x48] sm:$0xff] %v639_v36  ;;  %687 = vst [vmem:[%s1046_s21 + $0xc8] sm:$0xff] %v655_v37  ;;  %v644_v43 = vmax.f32 %v612_v56, 0.0  ;;  %v660_v44 = vmax.f32 %v628_v38, 0.0  ;;  %v610_v45 = vadd.f32 %v578_v24, %v447_v39  ;;  %v626_v46 = vadd.f32 %v594_v25, %v511_v40 }
 0x108   : > { %v842_v47 = vpop.f32.mrf.mxu0  ;;  %v858_v48 = vpop.f32.mrf.mxu1 }
 0x109   : > { %676 = vst [vmem:[%s1046_s21 + $0x70] sm:$0xff] %v644_v43  ;;  %692 = vst [vmem:[%s1046_s21 + $0xf0] sm:$0xff] %v660_v44  ;;  %v642_v49 = vmax.f32 %v610_v45, 0.0  ;;  %v658_v50 = vmax.f32 %v626_v46, 0.0  ;;  %v613_v51 = vadd.f32 %v842_v47, %v581_v34  ;;  %v629_v63 = vadd.f32 %v858_v48, %v597_v35 }
 0x10a   : > { %v450_v52 = vpop.f32.mrf.mxu0  ;;  %v514_v53 = vpop.f32.mrf.mxu1 }
 0x10b   : > { %674 = vst [vmem:[%s1046_s21 + $0x60] sm:$0xff] %v642_v49  ;;  %690 = vst [vmem:[%s1046_s21 + $0xe0] sm:$0xff] %v658_v50  ;;  %v645_v54 = vmax.f32 %v613_v51, 0.0  ;;  %v661_v55 = vmax.f32 %v629_v63, 0.0  ;;  %v611_v57 = vadd.f32 %v579_v41, %v450_v52  ;;  %v627_v58 = vadd.f32 %v595_v42, %v514_v53 }
 0x10d   : > { %677 = vst [vmem:[%s1046_s21 + $0x78] sm:$0xff] %v645_v54  ;;  %693 = vst [vmem:[%s1046_s21 + $0xf8] sm:$0xff] %v661_v55  ;;  %v643_v59 = vmax.f32 %v611_v57, 0.0  ;;  %v659_v60 = vmax.f32 %v627_v58, 0.0 }
 0x10f   : > { %675 = vst [vmem:[%s1046_s21 + $0x68] sm:$0xff] %v643_v59  ;;  %691 = vst [vmem:[%s1046_s21 + $0xe8] sm:$0xff] %v659_v60 }
 0x110 PF: > { %s14_s15 = sadd.s32 1, %s897_s15  }
 0x111   : > { %p11_p4 = scmp.ge.s32.totalorder %s14_s15, 4  }
 0x113   :  { %13 = sbr.rel (!%p11_p4) target bundleno = 1 (0x1), region = 69 }

// kernel: residual_block_forward.3
= control target key start
LH: loop header
LB: loop body
LE: loop exit
PB: predicated region body
PF: predicated region fallthrough
CT: control target
= control target key end

     0   :  { %s4333_s15 = smov 0   ;;  %s5458_s0 = inlined_call_operand.vmem [shape: f32[2,18,18,128], index: 0, kind: input, shape index: {}]   ;;  %s5459_s1 = inlined_call_operand.vmem [shape: bf16[9,128,128], index: 1, kind: input, shape index: {}]   ;;  %s5460_s2 = inlined_call_operand.vmem [shape: f32[2,16,16,128], index: 2, kind: output, shape index: {0}]   ;;  %s5461_s3 = inlined_call_operand.vmem [shape: f32[2,1,128], index: 3, kind: output, shape index: {1}]   ;;  %s5462_s4 = inlined_call_operand.vmem [shape: f32[2,1,128], index: 4, kind: output, shape index: {2}]  }
   0x1 LB: > { %s3152_s16 = sadd.s32 4294967295, %s4306_s15   ;;  %p3156_p0 = scmp.ge.s32.totalorder %s4306_s15, 1  ;;  %s4306_s15 = sphi %s4333_s15, %s15_s15  }
   0x2   : > { %p167_p1 = scmp.lt.s32.totalorder %s4306_s15, 3 }
   0x4   : > { %p168_p2 = pnand %p3156_p0, %p167_p1 }
   0x6   : > { %171 = sbr.rel (%p168_p2) target bundleno = 549 (0x225), region = 28 }
   0xb   : > { %v4228_v0 = vld [vmem:[%s5459_s1 + $0x78] sm:$0xff]   ;;  %p199_p3 = scmp.lt.s32.totalorder %s3152_s16, 1  ;;  %v4229_v1 = vld [vmem:[%s5459_s1 + $0x70] sm:$0xff]   ;;  %v4230_v2 = vld [vmem:[%s5459_s1 + $0x68] sm:$0xff]  }
   0xc   : > { %3771 = vmatprep.subr.bf16.mxu0 %v4228_v0  ;;  %4203 = vmatprep.subr.bf16.mxu1 %v4228_v0  ;;  %v4231_v3 = vld [vmem:[%s5459_s1 + $0x60] sm:$0xff]   ;;  %v4232_v10 = vld [vmem:[%s5459_s1 + $0x58] sm:$0xff]   ;;  %v4233_v11 = vld [vmem:[%s5459_s1 + $0x50] sm:$0xff]  }
   0xd   : > { %s5546_s16 = smov (!%p199_p3, %s3152_s16), 1  ;;  %3772 = vmatpush3.bf16.msra.mxu0 %v4228_v0  ;;  %4211 = vmatpush3.bf16.msra.mxu1 %v4228_v0  ;;  %v4234_v12 = vld [vmem:[%s5459_s1 + $0x48] sm:$0xff]   ;;  %v4235_v13 = vld [vmem:[%s5459_s1 + $0x40] sm:$0xff]   ;;  %v4236_v18 = vld [vmem:[%s5459_s1 + $0x38] sm:$0xff]  }
   0xe   : > { %3773 = vmatprep.subr.bf16.mxu0 %v4229_v1  ;;  %4204 = vmatprep.subr.bf16.mxu1 %v4229_v1  ;;  %s4219_s23 = smul.u32 432, %s5546_s16  ;;  %v4237_v19 = vld [vmem:[%s5459_s1 + $0xb8] sm:$0xff]   ;;  %v4238_v26 = vld [vmem:[%s5459_s1 + $0x30] sm:$0xff]   ;;  %v4240_v34 = vld [vmem:[%s5459_s1 + $0x28] sm:$0xff]   ;;  %s211_s6 = scalar_lea.vmem %s5461_s3, %s5546_s16 }
   0xf   : > { %v4239_v27 = vld [vmem:[%s5459_s1 + $0xb0] sm:$0xff]   ;;  %v4241_v35 = vld [vmem:[%s5459_s1 + $0xa8] sm:$0xff]   ;;  %v4242_v42 = vld [vmem:[%s5459_s1 + $0x20] sm:$0xff]   ;;  %s214_s9 = scalar_lea.vmem %s5462_s4, %s5546_s16 }
  0x10   : > { %s4356_s26 = scalar_lea.vmem %s5458_s0, %s4219_s23  ;;  %v4243_v43 = vld [vmem:[%s5459_s1 + $0xa0] sm:$0xff]   ;;  %v4244_v50 = vld [vmem:[%s5459_s1 + $0x18] sm:$0xff]   ;;  %v4246_v58 = vld [vmem:[%s5459_s1 + $0x10] sm:$0xff]  }
  0x11   : > { %3774 = vmatpush3.bf16.msra.mxu0 %v4229_v1  ;;  %4212 = vmatpush3.bf16.msra.mxu1 %v4229_v1  ;;  %v280_v4 = vld [vmem:[%s4356_s26 + $0x1] sm:$0xff]  ;;  %v281_v5 = vld [vmem:[%s4356_s26 + $0x9] sm:$0xff]  ;;  %v282_v14 = vld [vmem:[%s4356_s26 + $0x19] sm:$0xff] }
  0x12   : > { %3775 = vmatprep.subr.bf16.mxu0 %v4230_v2  ;;  %4205 = vmatprep.subr.bf16.mxu1 %v4230_v2  ;;  %v296_v6 = vld [vmem:[%s4356_s26 + $0xc1] sm:$0xff]  ;;  %v312_v7 = vpack.c.bf16 %v281_v5, %v280_v4  ;;  %v297_v8 = vld [vmem:[%s4356_s26 + $0xc9] sm:$0xff]  ;;  %v298_v16 = vld [vmem:[%s4356_s26 + $0xd9] sm:$0xff] }
  0x13   : > { %v4365_v9 = vpack.c.bf16 %v297_v8, %v296_v6  ;;  %v283_v15 = vld [vmem:[%s4356_s26 + $0x21] sm:$0xff]  ;;  %v284_v20 = vld [vmem:[%s4356_s26 + $0x31] sm:$0xff]  ;;  %v285_v21 = vld [vmem:[%s4356_s26 + $0x39] sm:$0xff] }
  0x14   : > { %3787 = vmatprep.mubr.bf16.mxu0 %v312_v7  ;;  %v299_v17 = vld [vmem:[%s4356_s26 + $0xe1] sm:$0xff]  ;;  %v4392_v22 = vpack.c.bf16 %v283_v15, %v282_v14  ;;  %v300_v24 = vld [vmem:[%s4356_s26 + $0xf1] sm:$0xff]  ;;  %v301_v25 = vld [vmem:[%s4356_s26 + $0xf9] sm:$0xff]  ;;  %v4404_v28 = vpack.c.bf16 %v285_v21, %v284_v20 }
  0x15   : > { %3776 = vmatpush3.bf16.msra.mxu0 %v4230_v2  ;;  %4213 = vmatpush3.bf16.msra.mxu1 %v4230_v2  ;;  %v4394_v23 = vpack.c.bf16 %v299_v17, %v298_v16  ;;  %v4406_v29 = vpack.c.bf16 %v301_v25, %v300_v24  ;;  %v286_v30 = vld [vmem:[%s4356_s26 + $0x49] sm:$0xff]  ;;  %v287_v31 = vld [vmem:[%s4356_s26 + $0x51] sm:$0xff]  ;;  %v288_v36 = vld [vmem:[%s4356_s26 + $0x61] sm:$0xff] }
  0x16   : > { %3777 = vmatprep.subr.bf16.mxu0 %v4231_v3  ;;  %4206 = vmatprep.subr.bf16.mxu1 %v4231_v3  ;;  %v302_v32 = vld [vmem:[%s4356_s26 + $0x109] sm:$0xff]  ;;  %v303_v33 = vld [vmem:[%s4356_s26 + $0x111] sm:$0xff]  ;;  %v304_v38 = vld [vmem:[%s4356_s26 + $0x121] sm:$0xff]  ;;  %v4425_v39 = vpack.c.bf16 %v287_v31, %v286_v30 }
  0x17   : > { %3803 = vmatprep.mubr.bf16.mxu1 %v4365_v9  ;;  %v289_v37 = vld [vmem:[%s4356_s26 + $0x69] sm:$0xff]  ;;  %v4427_v40 = vpack.c.bf16 %v303_v33, %v302_v32  ;;  %v290_v46 = vld [vmem:[%s4356_s26 + $0x79] sm:$0xff]  ;;  %v291_v47 = vld [vmem:[%s4356_s26 + $0x81] sm:$0xff] }
  0x18   : > { %v305_v41 = vld [vmem:[%s4356_s26 + $0x129] sm:$0xff]  ;;  %v4436_v44 = vpack.c.bf16 %v289_v37, %v288_v36  ;;  %v306_v48 = vld [vmem:[%s4356_s26 + $0x139] sm:$0xff]  ;;  %v307_v49 = vld [vmem:[%s4356_s26 + $0x141] sm:$0xff]  ;;  %v4456_v54 = vpack.c.bf16 %v291_v47, %v290_v46 }
  0x19   : > { %3778 = vmatpush3.bf16.msra.mxu0 %v4231_v3  ;;  %4214 = vmatpush3.bf16.msra.mxu1 %v4231_v3  ;;  %v4438_v45 = vpack.c.bf16 %v305_v41, %v304_v38  ;;  %v4245_v51 = vld [vmem:[%s5459_s1 + $0x98] sm:$0xff]   ;;  %v4458_v55 = vpack.c.bf16 %v307_v49, %v306_v48  ;;  %v4247_v59 = vld [vmem:[%s5459_s1 + $0x90] sm:$0xff]   ;;  %v4248_v2 = vld [vmem:[%s5459_s1 + $0x8] sm:$0xff]  }
  0x1a   : > { %3779 = vmatprep.subr.bf16.mxu0 %v4232_v10  ;;  %4207 = vmatprep.subr.bf16.mxu1 %v4232_v10  ;;  %v292_v52 = vld [vmem:[%s4356_s26 + $0x91] sm:$0xff]  ;;  %v293_v53 = vld [vmem:[%s4356_s26 + $0x99] sm:$0xff]  ;;  %v294_v62 = vld [vmem:[%s4356_s26 + $0xa9] sm:$0xff] }
  0x1b   : > { %v308_v56 = vld [vmem:[%s4356_s26 + $0x151] sm:$0xff]  ;;  %v309_v57 = vld [vmem:[%s4356_s26 + $0x159] sm:$0xff]  ;;  %v4468_v60 = vpack.c.bf16 %v293_v53, %v292_v52  ;;  %v310_v0 = vld [vmem:[%s4356_s26 + $0x169] sm:$0xff] }
  0x1c   : > { %v4470_v61 = vpack.c.bf16 %v309_v57, %v308_v56  ;;  %v295_v63 = vld [vmem:[%s4356_s26 + $0xb1] sm:$0xff]  ;;  %v4249_v3 = vld [vmem:[%s5459_s1 + $0x88] sm:$0xff]   ;;  %v216_v4 = vld [vmem:[%s4356_s26] sm:$0xff] }
  0x1d   : > { %3780 = vmatpush3.bf16.msra.mxu0 %v4232_v10  ;;  %4215 = vmatpush3.bf16.msra.mxu1 %v4232_v10  ;;  %v311_v1 = vld [vmem:[%s4356_s26 + $0x171] sm:$0xff]  ;;  %v4487_v5 = vpack.c.bf16 %v295_v63, %v294_v62  ;;  %v217_v7 = vld [vmem:[%s4356_s26 + $0x8] sm:$0xff]  ;;  %v219_v16 = vld [vmem:[%s4356_s26 + $0x20] sm:$0xff] }
  0x1e   : > { %3781 = vmatprep.subr.bf16.mxu0 %v4233_v11  ;;  %4208 = vmatprep.subr.bf16.mxu1 %v4233_v11  ;;  %v4489_v6 = vpack.c.bf16 %v311_v1, %v310_v0  ;;  %v763_v8 = vld [vmem:[%s4356_s26 + $0x2] sm:$0xff]  ;;  %v764_v10 = vld [vmem:[%s4356_s26 + $0xa] sm:$0xff]  ;;  %v218_v15 = vld [vmem:[%s4356_s26 + $0x18] sm:$0xff] }
  0x1f   : > { %v795_v14 = vpack.c.bf16 %v764_v10, %v763_v8  ;;  %v765_v17 = vld [vmem:[%s4356_s26 + $0x1a] sm:$0xff]  ;;  %v220_v21 = vld [vmem:[%s4356_s26 + $0x30] sm:$0xff]  ;;  %v4256_v47 = vld [vmem:[%s5459_s1 + $0xe8] sm:$0xff]  }
  0x20   : > { %v4253_v20 = vld [vmem:[%s5459_s1 + $0x138] sm:$0xff]   ;;  %v4254_v33 = vld [vmem:[%s5459_s1 + $0xf0] sm:$0xff]   ;;  %v224_v41 = vld [vmem:[%s4356_s26 + $0x60] sm:$0xff] }
  0x21   : > { %3782 = vmatpush3.bf16.msra.mxu0 %v4233_v11  ;;  %4216 = vmatpush3.bf16.msra.mxu1 %v4233_v11  ;;  %v4250_v11 = vld [vmem:[%s5459_s1] sm:$0xff]   ;;  %v221_v24 = vld [vmem:[%s4356_s26 + $0x38] sm:$0xff]  ;;  %v769_v36 = vld [vmem:[%s4356_s26 + $0x4a] sm:$0xff] }
  0x22   : > { %3783 = vmatprep.subr.bf16.mxu0 %v4234_v12  ;;  %4209 = vmatprep.subr.bf16.mxu1 %v4234_v12  ;;  %v767_v25 = vld [vmem:[%s4356_s26 + $0x32] sm:$0xff]  ;;  %v4520_v31 = vpack.c.bf16 %v221_v24, %v220_v21  ;;  %v772_v46 = vld [vmem:[%s4356_s26 + $0x6a] sm:$0xff]  ;;  %v4258_v53 = vld [vmem:[%s5459_s1 + $0xe0] sm:$0xff]  }
  0x23   : > { %v4255_v37 = vld [vmem:[%s5459_s1 + $0x130] sm:$0xff]   ;;  %v4257_v48 = vld [vmem:[%s5459_s1 + $0x128] sm:$0xff]   ;;  %v226_v56 = vld [vmem:[%s4356_s26 + $0x78] sm:$0xff] }
  0x24   : > { %v770_v38 = vld [vmem:[%s4356_s26 + $0x52] sm:$0xff]  ;;  %v227_v57 = vld [vmem:[%s4356_s26 + $0x80] sm:$0xff]  ;;  %v780_v21 = vld [vmem:[%s4356_s26 + $0xca] sm:$0xff] }
  0x25   : > { %3784 = vmatpush3.bf16.msra.mxu0 %v4234_v12  ;;  %4217 = vmatpush3.bf16.msra.mxu1 %v4234_v12  ;;  %v4251_v12 = vld [vmem:[%s5459_s1 + $0x80] sm:$0xff]   ;;  %v228_v63 = vld [vmem:[%s4356_s26 + $0x90] sm:$0xff]  ;;  %v229_v0 = vld [vmem:[%s4356_s26 + $0x98] sm:$0xff] }
  0x26   : > { %3785 = vmatprep.subr.bf16.mxu0 %v4235_v13  ;;  %4210 = vmatprep.subr.bf16.mxu1 %v4235_v13  ;;  %v4259_v62 = vld [vmem:[%s5459_s1 + $0x120] sm:$0xff]   ;;  %v775_v1 = vld [vmem:[%s4356_s26 + $0x92] sm:$0xff]  ;;  %v4584_v10 = vpack.c.bf16 %v229_v0, %v228_v63  ;;  %v4264_v24 = vld [vmem:[%s5459_s1 + $0xc8] sm:$0xff]  }
  0x27   : > { %v238_v0 = vld [vmem:[%s4356_s26 + $0x108] sm:$0xff] }
  0x29   : > { %3786 = vmatpush3.bf16.msra.mxu0 %v4235_v13  ;;  %4218 = vmatpush3.bf16.msra.mxu1 %v4235_v13  ;;  %v248_v13 = vpack.c.bf16 %v217_v7, %v216_v4  ;;  %v4261_v4 = vld [vmem:[%s5459_s1 + $0x118] sm:$0xff]   ;;  %v4580_v7 = vpack.c.bf16 %v227_v57, %v226_v56 }
  0x2a   : > { %3819 = vmatprep.subr.bf16.mxu1 %v4236_v18  ;;  %3867 = vmatprep.subr.bf16.mxu0 %v4237_v19  ;;  %v4268_v56 = vld [vmem:[%s5459_s1 + $0x178] sm:$0xff]  }
  0x2b   : > { %v4269_v57 = vld [vmem:[%s5459_s1 + $0x1b8] sm:$0xff]  }
  0x2c   : > { %3788 = vmatmul.mubr.bf16.vlgmr.msra.gmra.mxu0 %v4392_v22  ;;  %3804 = vmatmul.mubr.bf16.vlgmr.msra.gmra.mxu1 %v4394_v23 }
  0x2d   : > { %3820 = vmatpush3.bf16.msra.mxu1 %v4236_v18  ;;  %3868 = vmatpush3.bf16.msra.mxu0 %v4237_v19  ;;  %v766_v18 = vld [vmem:[%s4356_s26 + $0x22] sm:$0xff]  ;;  %v4252_v19 = vld [vmem:[%s5459_s1 + $0xf8] sm:$0xff]  }
  0x2e   : > { %3821 = vmatprep.subr.bf16.mxu1 %v4238_v26  ;;  %3869 = vmatprep.subr.bf16.mxu0 %v4239_v27  ;;  %v4518_v30 = vpack.c.bf16 %v766_v18, %v765_v17  ;;  %v4263_v17 = vld [vmem:[%s5459_s1 + $0x110] sm:$0xff]   ;;  %v232_v18 = vld [vmem:[%s4356_s26 + $0xc0] sm:$0xff] }
  0x2f   : > { %3791 = vmatprep.mubr.bf16.mxu0 %v4404_v28  ;;  %3807 = vmatprep.mubr.bf16.mxu1 %v4406_v29 }
  0x31   : > { %3822 = vmatpush3.bf16.msra.mxu1 %v4238_v26  ;;  %3870 = vmatpush3.bf16.msra.mxu0 %v4239_v27  ;;  %v768_v26 = vld [vmem:[%s4356_s26 + $0x3a] sm:$0xff]  ;;  %v4516_v27 = vpack.c.bf16 %v219_v16, %v218_v15  ;;  %v777_v15 = vld [vmem:[%s4356_s26 + $0xaa] sm:$0xff]  ;;  %v778_v16 = vld [vmem:[%s4356_s26 + $0xb2] sm:$0xff] }
  0x32   : > { %3823 = vmatprep.subr.bf16.mxu1 %v4240_v34  ;;  %3871 = vmatprep.subr.bf16.mxu0 %v4241_v35  ;;  %v4522_v32 = vpack.c.bf16 %v768_v26, %v767_v25  ;;  %v4265_v25 = vld [vmem:[%s5459_s1 + $0x108] sm:$0xff]  }
  0x34   : > { %3792 = vmatmul.mubr.bf16.gmra.mxu0 %v4425_v39  ;;  %3808 = vmatmul.mubr.bf16.gmra.mxu1 %v4427_v40 }
  0x35   : > { %3824 = vmatpush3.bf16.msra.mxu1 %v4240_v34  ;;  %3872 = vmatpush3.bf16.msra.mxu0 %v4241_v35  ;;  %v222_v34 = vld [vmem:[%s4356_s26 + $0x48] sm:$0xff]  ;;  %v223_v35 = vld [vmem:[%s4356_s26 + $0x50] sm:$0xff] }
  0x36   : > { %3825 = vmatprep.subr.bf16.mxu1 %v4242_v42  ;;  %3873 = vmatprep.subr.bf16.mxu0 %v4243_v43  ;;  %v4548_v49 = vpack.c.bf16 %v223_v35, %v222_v34 }
  0x37   : > { %3795 = vmatprep.mubr.bf16.mxu0 %v4436_v44  ;;  %3811 = vmatprep.mubr.bf16.mxu1 %v4438_v45 }
  0x39   : > { %3826 = vmatpush3.bf16.msra.mxu1 %v4242_v42  ;;  %3874 = vmatpush3.bf16.msra.mxu0 %v4243_v43  ;;  %v225_v42 = vld [vmem:[%s4356_s26 + $0x68] sm:$0xff] }
  0x3a   : > { %3827 = vmatprep.subr.bf16.mxu1 %v4244_v50  ;;  %3875 = vmatprep.subr.bf16.mxu0 %v4245_v51  ;;  %v771_v43 = vld [vmem:[%s4356_s26 + $0x62] sm:$0xff] }
  0x3b   : > { %v4554_v52 = vpack.c.bf16 %v772_v46, %v771_v43  ;;  %v4267_v43 = vld [vmem:[%s5459_s1 + $0x100] sm:$0xff]   ;;  %v236_v46 = vld [vmem:[%s4356_s26 + $0xf0] sm:$0xff] }
  0x3c   : > { %3796 = vmatmul.mubr.bf16.gmra.mxu0 %v4456_v54  ;;  %3812 = vmatmul.mubr.bf16.gmra.mxu1 %v4458_v55 }
  0x3d   : > { %3828 = vmatpush3.bf16.msra.mxu1 %v4244_v50  ;;  %3876 = vmatpush3.bf16.msra.mxu0 %v4245_v51  ;;  %v4550_v50 = vpack.c.bf16 %v770_v38, %v769_v36  ;;  %v4552_v51 = vpack.c.bf16 %v225_v42, %v224_v41  ;;  %v4266_v36 = vld [vmem:[%s5459_s1 + $0xc0] sm:$0xff]  }
  0x3e   : > { %3829 = vmatprep.subr.bf16.mxu1 %v4246_v58  ;;  %3877 = vmatprep.subr.bf16.mxu0 %v4247_v59  ;;  %v235_v38 = vld [vmem:[%s4356_s26 + $0xe0] sm:$0xff] }
  0x3f   : > { %3799 = vmatprep.mubr.bf16.mxu0 %v4468_v60  ;;  %3815 = vmatprep.mubr.bf16.mxu1 %v4470_v61  ;;  %v781_v41 = vld [vmem:[%s4356_s26 + $0xda] sm:$0xff]  ;;  %v782_v42 = vld [vmem:[%s4356_s26 + $0xe2] sm:$0xff] }
  0x41   : > { %3830 = vmatpush3.bf16.msra.mxu1 %v4246_v58  ;;  %3878 = vmatpush3.bf16.msra.mxu0 %v4247_v59  ;;  %v773_v58 = vld [vmem:[%s4356_s26 + $0x7a] sm:$0xff]  ;;  %v774_v59 = vld [vmem:[%s4356_s26 + $0x82] sm:$0xff] }
  0x42   : > { %3831 = vmatprep.subr.bf16.mxu1 %v4248_v2  ;;  %3879 = vmatprep.subr.bf16.mxu0 %v4249_v3  ;;  %v4582_v8 = vpack.c.bf16 %v774_v59, %v773_v58  ;;  %v4646_v59 = vpack.c.bf16 %v782_v42, %v781_v41 }
  0x44   : > { %3800 = vmatmul.mubr.bf16.gmra.mxu0 %v4487_v5  ;;  %3816 = vmatmul.mubr.bf16.gmra.mxu1 %v4489_v6 }
  0x45   : > { %3832 = vmatpush3.bf16.msra.mxu1 %v4248_v2  ;;  %3880 = vmatpush3.bf16.msra.mxu0 %v4249_v3  ;;  %v776_v2 = vld [vmem:[%s4356_s26 + $0x9a] sm:$0xff] }
  0x46   : > { %3833 = vmatprep.subr.bf16.mxu1 %v4250_v11  ;;  %3881 = vmatprep.subr.bf16.mxu0 %v4251_v12  ;;  %v4260_v3 = vld [vmem:[%s5459_s1 + $0xd8] sm:$0xff]  }
  0x47   : > { %3835 = vmatprep.mubr.bf16.mxu1 %v248_v13  ;;  %3883 = vmatprep.mubr.bf16.mxu0 %v795_v14  ;;  %v230_v13 = vld [vmem:[%s4356_s26 + $0xa8] sm:$0xff]  ;;  %v231_v14 = vld [vmem:[%s4356_s26 + $0xb0] sm:$0xff] }
  0x48   : > { %v4612_v26 = vpack.c.bf16 %v231_v14, %v230_v13  ;;  %v787_v13 = vld [vmem:[%s4356_s26 + $0x122] sm:$0xff]  ;;  %v788_v14 = vld [vmem:[%s4356_s26 + $0x12a] sm:$0xff] }
  0x49   : > { %3834 = vmatpush3.bf16.msra.mxu1 %v4250_v11  ;;  %3882 = vmatpush3.bf16.msra.mxu0 %v4251_v12  ;;  %v4586_v11 = vpack.c.bf16 %v776_v2, %v775_v1  ;;  %v4262_v12 = vld [vmem:[%s5459_s1 + $0xd0] sm:$0xff]  }
  0x4a   : > { %3915 = vmatprep.subr.bf16.mxu1 %v4252_v19  ;;  %3963 = vmatprep.subr.bf16.mxu0 %v4253_v20  ;;  %v239_v1 = vld [vmem:[%s4356_s26 + $0x110] sm:$0xff] }
  0x4b   : > { %v785_v2 = vld [vmem:[%s4356_s26 + $0x10a] sm:$0xff] }
  0x4c   : > { %3836 = vmatmul.mubr.bf16.vlgmr.msra.gmra.mxu1 %v4516_v27  ;;  %3884 = vmatmul.mubr.bf16.vlgmr.msra.gmra.mxu0 %v4518_v30 }
  0x4d   : > { %3916 = vmatpush3.bf16.msra.mxu1 %v4252_v19  ;;  %3964 = vmatpush3.bf16.msra.mxu0 %v4253_v20  ;;  %v233_v19 = vld [vmem:[%s4356_s26 + $0xc8] sm:$0xff] }
  0x4e   : > { %3839 = vmatprep.mubr.bf16.mxu1 %v4520_v31  ;;  %3887 = vmatprep.mubr.bf16.mxu0 %v4522_v32  ;;  %v779_v20 = vld [vmem:[%s4356_s26 + $0xc2] sm:$0xff]  ;;  %v4616_v34 = vpack.c.bf16 %v233_v19, %v232_v18  ;;  %v4670_v18 = vpack.c.bf16 %v788_v14, %v787_v13  ;;  %v242_v19 = vld [vmem:[%s4356_s26 + $0x138] sm:$0xff] }
  0x4f   : > { %3917 = vmatprep.subr.bf16.mxu1 %v4254_v33  ;;  %3965 = vmatprep.subr.bf16.mxu0 %v4255_v37  ;;  %v4618_v35 = vpack.c.bf16 %v780_v21, %v779_v20  ;;  %v243_v20 = vld [vmem:[%s4356_s26 + $0x140] sm:$0xff]  ;;  %v4281_v13 = vld [vmem:[%s5459_s1 + $0x188] sm:$0xff]   ;;  %v4284_v14 = vld [vmem:[%s5459_s1 + $0x1f8] sm:$0xff]  }
  0x50   : > { %v789_v21 = vld [vmem:[%s4356_s26 + $0x13a] sm:$0xff]  ;;  %v4684_v41 = vpack.c.bf16 %v243_v20, %v242_v19 }
  0x51   : > { %3918 = vmatpush3.bf16.msra.mxu1 %v4254_v33  ;;  %3966 = vmatpush3.bf16.msra.mxu0 %v4255_v37  ;;  %v4614_v33 = vpack.c.bf16 %v778_v16, %v777_v15  ;;  %v234_v37 = vld [vmem:[%s4356_s26 + $0xd8] sm:$0xff]  ;;  %v4664_v15 = vpack.c.bf16 %v239_v1, %v238_v0 }
  0x52   : > { %3919 = vmatprep.subr.bf16.mxu1 %v4256_v47  ;;  %3967 = vmatprep.subr.bf16.mxu0 %v4257_v48  ;;  %v4644_v58 = vpack.c.bf16 %v235_v38, %v234_v37  ;;  %v791_v37 = vld [vmem:[%s4356_s26 + $0x152] sm:$0xff]  ;;  %v792_v38 = vld [vmem:[%s4356_s26 + $0x15a] sm:$0xff] }
  0x53   : > { %v794_v0 = vld [vmem:[%s4356_s26 + $0x172] sm:$0xff] }
  0x54   : > { %3840 = vmatmul.mubr.bf16.gmra.mxu1 %v4548_v49  ;;  %3888 = vmatmul.mubr.bf16.gmra.mxu0 %v4550_v50  ;;  %v4285_v19 = vld [vmem:[%s5459_s1 + $0x238] sm:$0xff]  }
  0x55   : > { %3843 = vmatprep.mubr.bf16.mxu1 %v4552_v51  ;;  %3891 = vmatprep.mubr.bf16.mxu0 %v4554_v52 }
  0x56   : > { %3920 = vmatpush3.bf16.msra.mxu1 %v4256_v47  ;;  %3968 = vmatpush3.bf16.msra.mxu0 %v4257_v48  ;;  %v237_v47 = vld [vmem:[%s4356_s26 + $0xf8] sm:$0xff] }
  0x57   : > { %3921 = vmatprep.subr.bf16.mxu1 %v4258_v53  ;;  %3969 = vmatprep.subr.bf16.mxu0 %v4259_v62  ;;  %v783_v48 = vld [vmem:[%s4356_s26 + $0xf2] sm:$0xff] }
  0x5a   : > { %3922 = vmatpush3.bf16.msra.mxu1 %v4258_v53  ;;  %3970 = vmatpush3.bf16.msra.mxu0 %v4259_v62  ;;  %v784_v53 = vld [vmem:[%s4356_s26 + $0xfa] sm:$0xff]  ;;  %v4648_v62 = vpack.c.bf16 %v237_v47, %v236_v46  ;;  %v4690_v46 = vpack.c.bf16 %v792_v38, %v791_v37  ;;  %v246_v47 = vld [vmem:[%s4356_s26 + $0x168] sm:$0xff] }
  0x5b   : > { %3923 = vmatprep.subr.bf16.mxu1 %v4260_v3  ;;  %3971 = vmatprep.subr.bf16.mxu0 %v4261_v4  ;;  %v4650_v63 = vpack.c.bf16 %v784_v53, %v783_v48  ;;  %v247_v48 = vld [vmem:[%s4356_s26 + $0x170] sm:$0xff] }
  0x5c   : > { %3844 = vmatmul.mubr.bf16.gmra.mxu1 %v4580_v7  ;;  %3892 = vmatmul.mubr.bf16.gmra.mxu0 %v4582_v8  ;;  %v793_v53 = vld [vmem:[%s4356_s26 + $0x16a] sm:$0xff]  ;;  %v4700_v1 = vpack.c.bf16 %v247_v48, %v246_v47  ;;  %v3415_v47 = vld [vmem:[%s4356_s26 + $0x1a0] sm:$0xff] }
  0x5d   : > { %3847 = vmatprep.mubr.bf16.mxu1 %v4584_v10  ;;  %3895 = vmatprep.mubr.bf16.mxu0 %v4586_v11  ;;  %v3440_v48 = vld [vmem:[%s4356_s26 + $0x31] sm:$0xff] }
  0x5e   : > { %3924 = vmatpush3.bf16.msra.mxu1 %v4260_v3  ;;  %3972 = vmatpush3.bf16.msra.mxu0 %v4261_v4  ;;  %v786_v3 = vld [vmem:[%s4356_s26 + $0x112] sm:$0xff]  ;;  %v240_v4 = vld [vmem:[%s4356_s26 + $0x120] sm:$0xff] }
  0x5f   : > { %3925 = vmatprep.subr.bf16.mxu1 %v4262_v12  ;;  %3973 = vmatprep.subr.bf16.mxu0 %v4263_v17  ;;  %v4666_v16 = vpack.c.bf16 %v786_v3, %v785_v2  ;;  %v4702_v2 = vpack.c.bf16 %v794_v0, %v793_v53  ;;  %v4270_v3 = vld [vmem:[%s5459_s1 + $0x170] sm:$0xff]  }
  0x62   : > { %3926 = vmatpush3.bf16.msra.mxu1 %v4262_v12  ;;  %3974 = vmatpush3.bf16.msra.mxu0 %v4263_v17  ;;  %v241_v12 = vld [vmem:[%s4356_s26 + $0x128] sm:$0xff] }
  0x63   : > { %3927 = vmatprep.subr.bf16.mxu1 %v4264_v24  ;;  %3975 = vmatprep.subr.bf16.mxu0 %v4265_v25  ;;  %v4668_v17 = vpack.c.bf16 %v241_v12, %v240_v4  ;;  %v4271_v4 = vld [vmem:[%s5459_s1 + $0x1b0] sm:$0xff]   ;;  %v4280_v12 = vld [vmem:[%s5459_s1 + $0x148] sm:$0xff]  }
  0x64   : > { %3848 = vmatmul.mubr.bf16.gmra.mxu1 %v4612_v26  ;;  %3896 = vmatmul.mubr.bf16.gmra.mxu0 %v4614_v33 }
  0x65   : > { %3851 = vmatprep.mubr.bf16.mxu1 %v4616_v34  ;;  %3899 = vmatprep.mubr.bf16.mxu0 %v4618_v35 }
  0x66   : > { %3928 = vmatpush3.bf16.msra.mxu1 %v4264_v24  ;;  %3976 = vmatpush3.bf16.msra.mxu0 %v4265_v25  ;;  %v790_v24 = vld [vmem:[%s4356_s26 + $0x142] sm:$0xff]  ;;  %v244_v25 = vld [vmem:[%s4356_s26 + $0x150] sm:$0xff] }
  0x67   : > { %3929 = vmatprep.subr.bf16.mxu1 %v4266_v36  ;;  %3977 = vmatprep.subr.bf16.mxu0 %v4267_v43  ;;  %v4686_v42 = vpack.c.bf16 %v790_v24, %v789_v21 }
  0x6a   : > { %3930 = vmatpush3.bf16.msra.mxu1 %v4266_v36  ;;  %3978 = vmatpush3.bf16.msra.mxu0 %v4267_v43  ;;  %v245_v36 = vld [vmem:[%s4356_s26 + $0x158] sm:$0xff] }
  0x6b   : > { %4011 = vmatprep.subr.bf16.mxu1 %v4268_v56  ;;  %4059 = vmatprep.subr.bf16.mxu0 %v4269_v57  ;;  %v4688_v43 = vpack.c.bf16 %v245_v36, %v244_v25 }
  0x6c   : > { %3852 = vmatmul.mubr.bf16.gmra.mxu1 %v4644_v58  ;;  %3900 = vmatmul.mubr.bf16.gmra.mxu0 %v4646_v59 }
  0x6d   : > { %3855 = vmatprep.mubr.bf16.mxu1 %v4648_v62  ;;  %3903 = vmatprep.mubr.bf16.mxu0 %v4650_v63 }
  0x74   : > { %3856 = vmatmul.mubr.bf16.gmra.mxu1 %v4664_v15  ;;  %3904 = vmatmul.mubr.bf16.gmra.mxu0 %v4666_v16 }
  0x75   : > { %3859 = vmatprep.mubr.bf16.mxu1 %v4668_v17  ;;  %3907 = vmatprep.mubr.bf16.mxu0 %v4670_v18 }
  0x7c   : > { %3860 = vmatmul.mubr.bf16.gmra.mxu1 %v4684_v41  ;;  %3908 = vmatmul.mubr.bf16.gmra.mxu0 %v4686_v42 }
  0x7d   : > { %3863 = vmatprep.mubr.bf16.mxu1 %v4688_v43  ;;  %3911 = vmatprep.mubr.bf16.mxu0 %v4690_v46 }
  0x84   : > { %3864 = vmatmul.mubr.bf16.gmra.mxu1 %v4700_v1  ;;  %3912 = vmatmul.mubr.bf16.gmra.mxu0 %v4702_v2 }
  0x85   : > { %3931 = vmatprep.mubr.bf16.mxu1 %v4516_v27  ;;  %3979 = vmatprep.mubr.bf16.mxu0 %v4392_v22  ;;  %v4272_v22 = vld [vmem:[%s5459_s1 + $0x168] sm:$0xff]  }
  0x86   : > { %v4273_v27 = vld [vmem:[%s5459_s1 + $0x1a8] sm:$0xff]  }
  0x8c   : > { %3932 = vmatmul.mubr.bf16.vlgmr.msra.gmra.mxu1 %v4520_v31  ;;  %3980 = vmatmul.mubr.bf16.vlgmr.msra.gmra.mxu0 %v4404_v28  ;;  %v4274_v28 = vld [vmem:[%s5459_s1 + $0x160] sm:$0xff]  }
  0x8d   : > { %4012 = vmatpush3.bf16.msra.mxu1 %v4268_v56  ;;  %4060 = vmatpush3.bf16.msra.mxu0 %v4269_v57  ;;  %v4276_v56 = vld [vmem:[%s5459_s1 + $0x158] sm:$0xff]  }
  0x8e   : > { %3935 = vmatprep.mubr.bf16.mxu1 %v4548_v49  ;;  %3983 = vmatprep.mubr.bf16.mxu0 %v4425_v39  ;;  %v4275_v39 = vld [vmem:[%s5459_s1 + $0x1a0] sm:$0xff]   ;;  %v4277_v57 = vld [vmem:[%s5459_s1 + $0x198] sm:$0xff]  }
  0x8f   : > { %4013 = vmatprep.subr.bf16.mxu1 %v4270_v3  ;;  %4061 = vmatprep.subr.bf16.mxu0 %v4271_v4 }
  0x91   : > { %4014 = vmatpush3.bf16.msra.mxu1 %v4270_v3  ;;  %4062 = vmatpush3.bf16.msra.mxu0 %v4271_v4  ;;  %v3441_v3 = vld [vmem:[%s4356_s26 + $0x39] sm:$0xff] }
  0x92   : > { %4015 = vmatprep.subr.bf16.mxu1 %v4272_v22  ;;  %4063 = vmatprep.subr.bf16.mxu0 %v4273_v27  ;;  %v3496_v4 = vld [vmem:[%s4356_s26 + $0x32] sm:$0xff] }
  0x94   : > { %3936 = vmatmul.mubr.bf16.gmra.mxu1 %v4552_v51  ;;  %3984 = vmatmul.mubr.bf16.gmra.mxu0 %v4436_v44  ;;  %v4278_v44 = vld [vmem:[%s5459_s1 + $0x150] sm:$0xff]  }
  0x95   : > { %3939 = vmatprep.mubr.bf16.mxu1 %v4580_v7  ;;  %3987 = vmatprep.mubr.bf16.mxu0 %v4456_v54  ;;  %v4279_v54 = vld [vmem:[%s5459_s1 + $0x190] sm:$0xff]  }
  0x96   : > { %4016 = vmatpush3.bf16.msra.mxu1 %v4272_v22  ;;  %4064 = vmatpush3.bf16.msra.mxu0 %v4273_v27 }
  0x97   : > { %4017 = vmatprep.subr.bf16.mxu1 %v4274_v28  ;;  %4065 = vmatprep.subr.bf16.mxu0 %v4275_v39 }
  0x9a   : > { %4018 = vmatpush3.bf16.msra.mxu1 %v4274_v28  ;;  %4066 = vmatpush3.bf16.msra.mxu0 %v4275_v39  ;;  %v2327_v28 = vpack.c.bf16 %v3441_v3, %v3440_v48  ;;  %v3504_v48 = vld [vmem:[%s4356_s26 + $0x92] sm:$0xff]  ;;  %v3505_v3 = vld [vmem:[%s4356_s26 + $0x9a] sm:$0xff] }
  0x9b   : > { %4019 = vmatprep.subr.bf16.mxu1 %v4276_v56  ;;  %4067 = vmatprep.subr.bf16.mxu0 %v4277_v57 }
  0x9c   : > { %3940 = vmatmul.mubr.bf16.gmra.mxu1 %v4584_v10  ;;  %3988 = vmatmul.mubr.bf16.gmra.mxu0 %v4468_v60  ;;  %v4282_v60 = vld [vmem:[%s5459_s1 + $0x140] sm:$0xff]  }
  0x9d   : > { %3943 = vmatprep.mubr.bf16.mxu1 %v4612_v26  ;;  %3991 = vmatprep.mubr.bf16.mxu0 %v4487_v5  ;;  %v4283_v5 = vld [vmem:[%s5459_s1 + $0x180] sm:$0xff]  }
  0x9e   : > { %4020 = vmatpush3.bf16.msra.mxu1 %v4276_v56  ;;  %4068 = vmatpush3.bf16.msra.mxu0 %v4277_v57 }
  0x9f   : > { %4021 = vmatprep.subr.bf16.mxu1 %v4278_v44  ;;  %4069 = vmatprep.subr.bf16.mxu0 %v4279_v54 }
  0xa2   : > { %4022 = vmatpush3.bf16.msra.mxu1 %v4278_v44  ;;  %4070 = vmatpush3.bf16.msra.mxu0 %v4279_v54 }
  0xa3   : > { %4023 = vmatprep.subr.bf16.mxu1 %v4280_v12  ;;  %4071 = vmatprep.subr.bf16.mxu0 %v4281_v13 }
  0xa4   : > { %3944 = vmatmul.mubr.bf16.gmra.mxu1 %v4616_v34  ;;  %3992 = vmatmul.mubr.bf16.gmra.mxu0 %v4365_v9  ;;  %v3246_v9 = vld [vmem:[%s4356_s26 + $0x180] sm:$0xff] }
  0xa5   : > { %3947 = vmatprep.mubr.bf16.mxu1 %v4644_v58  ;;  %3995 = vmatprep.mubr.bf16.mxu0 %v4394_v23  ;;  %v3247_v23 = vld [vmem:[%s4356_s26 + $0x188] sm:$0xff] }
  0xa6   : > { %4024 = vmatpush3.bf16.msra.mxu1 %v4280_v12  ;;  %4072 = vmatpush3.bf16.msra.mxu0 %v4281_v13  ;;  %v4788_v20 = vpack.c.bf16 %v3247_v23, %v3246_v9  ;;  %v3442_v12 = vld [vmem:[%s4356_s26 + $0x49] sm:$0xff]  ;;  %v3443_v13 = vld [vmem:[%s4356_s26 + $0x51] sm:$0xff] }
  0xa7   : > { %4025 = vmatprep.subr.bf16.mxu1 %v4282_v60  ;;  %4073 = vmatprep.subr.bf16.mxu0 %v4283_v5  ;;  %v3445_v23 = vld [vmem:[%s4356_s26 + $0x69] sm:$0xff] }
  0xaa   : > { %4026 = vmatpush3.bf16.msra.mxu1 %v4282_v60  ;;  %4074 = vmatpush3.bf16.msra.mxu0 %v4283_v5  ;;  %v3498_v60 = vld [vmem:[%s4356_s26 + $0x4a] sm:$0xff]  ;;  %v3499_v5 = vld [vmem:[%s4356_s26 + $0x52] sm:$0xff] }
  0xab   : > { %4107 = vmatprep.subr.bf16.mxu1 %v4284_v14  ;;  %4155 = vmatprep.subr.bf16.mxu0 %v4285_v19 }
  0xac   : > { %3948 = vmatmul.mubr.bf16.gmra.mxu1 %v4648_v62  ;;  %3996 = vmatmul.mubr.bf16.gmra.mxu0 %v4406_v29  ;;  %v3302_v29 = vld [vmem:[%s4356_s26 + $0x181] sm:$0xff] }
  0xad   : > { %3951 = vmatprep.mubr.bf16.mxu1 %v4664_v15  ;;  %3999 = vmatprep.mubr.bf16.mxu0 %v4427_v40  ;;  %v3303_v40 = vld [vmem:[%s4356_s26 + $0x189] sm:$0xff] }
  0xae   : > { %v4790_v21 = vpack.c.bf16 %v3303_v40, %v3302_v29  ;;  %v3500_v29 = vld [vmem:[%s4356_s26 + $0x62] sm:$0xff]  ;;  %v3501_v40 = vld [vmem:[%s4356_s26 + $0x6a] sm:$0xff] }
  0xb4   : > { %3952 = vmatmul.mubr.bf16.gmra.mxu1 %v4668_v17  ;;  %4000 = vmatmul.mubr.bf16.gmra.mxu0 %v4438_v45  ;;  %v4286_v45 = vld [vmem:[%s5459_s1 + $0x1f0] sm:$0xff]  }
  0xb5   : > { %3955 = vmatprep.mubr.bf16.mxu1 %v4684_v41  ;;  %4003 = vmatprep.mubr.bf16.mxu0 %v4458_v55  ;;  %v4287_v55 = vld [vmem:[%s5459_s1 + $0x230] sm:$0xff]  }
  0xbc   : > { %3956 = vmatmul.mubr.bf16.gmra.mxu1 %v4688_v43  ;;  %4004 = vmatmul.mubr.bf16.gmra.mxu0 %v4470_v61  ;;  %v4288_v61 = vld [vmem:[%s5459_s1 + $0x1e8] sm:$0xff]  }
  0xbd   : > { %3959 = vmatprep.mubr.bf16.mxu1 %v4700_v1  ;;  %4007 = vmatprep.mubr.bf16.mxu0 %v4489_v6  ;;  %v4289_v6 = vld [vmem:[%s5459_s1 + $0x228] sm:$0xff]  }
  0xc4   : > { %3960 = vmatmul.mubr.bf16.gmra.mxu1 %v4788_v20  ;;  %4008 = vmatmul.mubr.bf16.gmra.mxu0 %v4790_v21 }
  0xc5   : > { %4027 = vmatprep.mubr.bf16.mxu1 %v4518_v30  ;;  %4075 = vmatprep.mubr.bf16.mxu0 %v4520_v31  ;;  %v4290_v30 = vld [vmem:[%s5459_s1 + $0x1e0] sm:$0xff]  }
  0xc6   : > { %v4291_v31 = vld [vmem:[%s5459_s1 + $0x220] sm:$0xff]  }
  0xcc   : > { %4028 = vmatmul.mubr.bf16.vlgmr.msra.gmra.mxu1 %v4522_v32  ;;  %4076 = vmatmul.mubr.bf16.vlgmr.msra.gmra.mxu0 %v4548_v49  ;;  %v4292_v32 = vld [vmem:[%s5459_s1 + $0x1d8] sm:$0xff]  }
  0xcd   : > { %4108 = vmatpush3.bf16.msra.mxu1 %v4284_v14  ;;  %4156 = vmatpush3.bf16.msra.mxu0 %v4285_v19  ;;  %v4293_v49 = vld [vmem:[%s5459_s1 + $0x218] sm:$0xff]   ;;  %v3444_v14 = vld [vmem:[%s4356_s26 + $0x61] sm:$0xff] }
  0xce   : > { %4031 = vmatprep.mubr.bf16.mxu1 %v4550_v50  ;;  %4079 = vmatprep.mubr.bf16.mxu0 %v4552_v51  ;;  %v4294_v50 = vld [vmem:[%s5459_s1 + $0x1d0] sm:$0xff]  }
  0xcf   : > { %4109 = vmatprep.subr.bf16.mxu1 %v4286_v45  ;;  %4157 = vmatprep.subr.bf16.mxu0 %v4287_v55  ;;  %v4295_v51 = vld [vmem:[%s5459_s1 + $0x210] sm:$0xff]  }
  0xd1   : > { %4110 = vmatpush3.bf16.msra.mxu1 %v4286_v45  ;;  %4158 = vmatpush3.bf16.msra.mxu0 %v4287_v55  ;;  %v2328_v55 = vpack.c.bf16 %v3443_v13, %v3442_v12 }
  0xd2   : > { %4111 = vmatprep.subr.bf16.mxu1 %v4288_v61  ;;  %4159 = vmatprep.subr.bf16.mxu0 %v4289_v6 }
  0xd4   : > { %4032 = vmatmul.mubr.bf16.gmra.mxu1 %v4554_v52  ;;  %4080 = vmatmul.mubr.bf16.gmra.mxu0 %v4580_v7  ;;  %v4296_v52 = vld [vmem:[%s5459_s1 + $0x1c8] sm:$0xff]  }
  0xd5   : > { %4035 = vmatprep.mubr.bf16.mxu1 %v4582_v8  ;;  %4083 = vmatprep.mubr.bf16.mxu0 %v4584_v10  ;;  %v4297_v7 = vld [vmem:[%s5459_s1 + $0x208] sm:$0xff]   ;;  %v4298_v8 = vld [vmem:[%s5459_s1 + $0x1c0] sm:$0xff]  }
  0xd6   : > { %4112 = vmatpush3.bf16.msra.mxu1 %v4288_v61  ;;  %4160 = vmatpush3.bf16.msra.mxu0 %v4289_v6  ;;  %v4299_v10 = vld [vmem:[%s5459_s1 + $0x200] sm:$0xff]   ;;  %v2634_v61 = vpack.c.bf16 %v3499_v5, %v3498_v60  ;;  %v2329_v6 = vpack.c.bf16 %v3445_v23, %v3444_v14  ;;  %v2637_v5 = vpack.c.bf16 %v3505_v3, %v3504_v48 }
  0xd7   : > { %4113 = vmatprep.subr.bf16.mxu1 %v4290_v30  ;;  %4161 = vmatprep.subr.bf16.mxu0 %v4291_v31 }
  0xda   : > { %4114 = vmatpush3.bf16.msra.mxu1 %v4290_v30  ;;  %4162 = vmatpush3.bf16.msra.mxu0 %v4291_v31  ;;  %v2635_v30 = vpack.c.bf16 %v3501_v40, %v3500_v29 }
  0xdb   : > { %4115 = vmatprep.subr.bf16.mxu1 %v4292_v32  ;;  %4163 = vmatprep.subr.bf16.mxu0 %v4293_v49 }
  0xdc   : > { %4036 = vmatmul.mubr.bf16.gmra.mxu1 %v4586_v11  ;;  %4084 = vmatmul.mubr.bf16.gmra.mxu0 %v4612_v26 }
  0xdd   : > { %4039 = vmatprep.mubr.bf16.mxu1 %v4614_v33  ;;  %4087 = vmatprep.mubr.bf16.mxu0 %v4616_v34 }
  0xde   : > { %4116 = vmatpush3.bf16.msra.mxu1 %v4292_v32  ;;  %4164 = vmatpush3.bf16.msra.mxu0 %v4293_v49 }
  0xdf   : > { %4117 = vmatprep.subr.bf16.mxu1 %v4294_v50  ;;  %4165 = vmatprep.subr.bf16.mxu0 %v4295_v51 }
  0xe2   : > { %4118 = vmatpush3.bf16.msra.mxu1 %v4294_v50  ;;  %4166 = vmatpush3.bf16.msra.mxu0 %v4295_v51  ;;  %v3446_v51 = vld [vmem:[%s4356_s26 + $0x79] sm:$0xff] }
  0xe3   : > { %4119 = vmatprep.subr.bf16.mxu1 %v4296_v52  ;;  %4167 = vmatprep.subr.bf16.mxu0 %v4297_v7 }
  0xe4   : > { %4040 = vmatmul.mubr.bf16.gmra.mxu1 %v4618_v35  ;;  %4088 = vmatmul.mubr.bf16.gmra.mxu0 %v4644_v58 }
  0xe5   : > { %4043 = vmatprep.mubr.bf16.mxu1 %v4646_v59  ;;  %4091 = vmatprep.mubr.bf16.mxu0 %v4648_v62 }
  0xe6   : > { %4120 = vmatpush3.bf16.msra.mxu1 %v4296_v52  ;;  %4168 = vmatpush3.bf16.msra.mxu0 %v4297_v7  ;;  %v3447_v52 = vld [vmem:[%s4356_s26 + $0x81] sm:$0xff] }
  0xe7   : > { %4121 = vmatprep.subr.bf16.mxu1 %v4298_v8  ;;  %4169 = vmatprep.subr.bf16.mxu0 %v4299_v10 }
  0xea   : > { %4122 = vmatpush3.bf16.msra.mxu1 %v4298_v8  ;;  %4170 = vmatpush3.bf16.msra.mxu0 %v4299_v10  ;;  %v3502_v8 = vld [vmem:[%s4356_s26 + $0x7a] sm:$0xff]  ;;  %v3503_v10 = vld [vmem:[%s4356_s26 + $0x82] sm:$0xff] }
  0xec   : > { %v4854_v11 = vpop.f32.mrf.mxu0  ;;  %v4856_v26 = vpop.f32.mrf.mxu1  ;;  %4044 = vmatmul.mubr.bf16.gmra.mxu1 %v4650_v63  ;;  %4092 = vmatmul.mubr.bf16.gmra.mxu0 %v4664_v15 }
  0xed   : > { %4047 = vmatprep.mubr.bf16.mxu1 %v4666_v16  ;;  %4095 = vmatprep.mubr.bf16.mxu0 %v4668_v17 }
  0xee   : > { %v4862_v33 = vpop.f32.mrf.mxu0  ;;  %v4864_v34 = vpop.f32.mrf.mxu1 }
  0xf0   : > { %v4866_v35 = vpop.f32.mrf.mxu0  ;;  %v4868_v58 = vpop.f32.mrf.mxu1 }
  0xf2   : > { %v4870_v59 = vpop.f32.mrf.mxu0  ;;  %v4872_v62 = vpop.f32.mrf.mxu1 }
  0xf4   : > { %v4874_v24 = vpop.f32.mrf.mxu0  ;;  %v4876_v63 = vpop.f32.mrf.mxu1  ;;  %4048 = vmatmul.mubr.bf16.gmra.mxu1 %v4670_v18  ;;  %4096 = vmatmul.mubr.bf16.gmra.mxu0 %v4684_v41  ;;  %v3358_v41 = vld [vmem:[%s4356_s26 + $0x182] sm:$0xff] }
  0xf5   : > { %4051 = vmatprep.mubr.bf16.mxu1 %v4686_v42  ;;  %4099 = vmatprep.mubr.bf16.mxu0 %v4688_v43  ;;  %v3359_v42 = vld [vmem:[%s4356_s26 + $0x18a] sm:$0xff]  ;;  %v3414_v43 = vld [vmem:[%s4356_s26 + $0x198] sm:$0xff] }
  0xf6   : > { %v4882_v15 = vpop.f32.mrf.mxu0  ;;  %v4884_v16 = vpop.f32.mrf.mxu1  ;;  %v2036_v27 = vpack.c.bf16 %v3415_v47, %v3414_v43  ;;  %v3449_v47 = vld [vmem:[%s4356_s26 + $0x99] sm:$0xff] }
  0xf8   : > { %v4886_v17 = vpop.f32.mrf.mxu0  ;;  %v4888_v25 = vpop.f32.mrf.mxu1 }
  0xfa   : > { %v4890_v36 = vpop.f32.mrf.mxu0  ;;  %v4892_v18 = vpop.f32.mrf.mxu1 }
  0xfc   : > { %v4894_v37 = vpop.f32.mrf.mxu0  ;;  %v4896_v38 = vpop.f32.mrf.mxu1  ;;  %4052 = vmatmul.mubr.bf16.gmra.mxu1 %v4690_v46  ;;  %4100 = vmatmul.mubr.bf16.gmra.mxu0 %v4700_v1  ;;  %v3497_v46 = vld [vmem:[%s4356_s26 + $0x3a] sm:$0xff] }
  0xfd   : > { %4055 = vmatprep.mubr.bf16.mxu1 %v4702_v2  ;;  %4103 = vmatprep.mubr.bf16.mxu0 %v4788_v20  ;;  %v4918_v2 = vpack.c.bf16 %v3359_v42, %v3358_v41  ;;  %v2633_v39 = vpack.c.bf16 %v3497_v46, %v3496_v4  ;;  %v3448_v41 = vld [vmem:[%s4356_s26 + $0x91] sm:$0xff] }
  0xfe   : > { %v4907_v53 = vpop.f32.mrf.mxu0  ;;  %v4909_v0 = vpop.f32.mrf.mxu1  ;;  %v2331_v60 = vpack.c.bf16 %v3449_v47, %v3448_v41 }
 0x100   : > { %v4914_v22 = vpop.f32.mrf.mxu0  ;;  %v4916_v1 = vpop.f32.mrf.mxu1 }
 0x102   : > { %v4920_v56 = vpop.f32.mrf.mxu0  ;;  %v4922_v57 = vpop.f32.mrf.mxu1 }
 0x104   : > { %v4924_v44 = vpop.f32.mrf.mxu0  ;;  %v4926_v54 = vpop.f32.mrf.mxu1  ;;  %4056 = vmatmul.mubr.bf16.gmra.mxu1 %v4918_v2  ;;  %4104 = vmatmul.mubr.bf16.gmra.mxu0 %v2036_v27 }
 0x105   : > { %4123 = vmatprep.mubr.bf16.mxu1 %v2327_v28  ;;  %4171 = vmatprep.mubr.bf16.mxu0 %v2633_v39  ;;  %v2330_v39 = vpack.c.bf16 %v3447_v52, %v3446_v51  ;;  %v3452_v51 = vld [vmem:[%s4356_s26 + $0xc1] sm:$0xff] }
 0x106   : > { %v4934_v19 = vpop.f32.mrf.mxu0  ;;  %v4936_v9 = vpop.f32.mrf.mxu1 }
 0x108   : > { %v4941_v20 = vpop.f32.mrf.mxu0  ;;  %v4943_v45 = vpop.f32.mrf.mxu1 }
 0x10a   : > { %v4945_v31 = vpop.f32.mrf.mxu0  ;;  %v4947_v32 = vpop.f32.mrf.mxu1 }
 0x10c   : > { %v3837_v49 = vpop.f32.mrf.mxu1  ;;  %v3885_v50 = vpop.f32.mrf.mxu0  ;;  %4124 = vmatmul.mubr.bf16.vlgmr.msra.gmra.mxu1 %v2328_v55  ;;  %4172 = vmatmul.mubr.bf16.vlgmr.msra.gmra.mxu0 %v2634_v61  ;;  %v3450_v61 = vld [vmem:[%s4356_s26 + $0xa9] sm:$0xff] }
 0x10d   : > { %v645_v7 = vadd.f32 %v3837_v49, %v4854_v11  ;;  %4127 = vmatprep.mubr.bf16.mxu1 %v2329_v6  ;;  %4175 = vmatprep.mubr.bf16.mxu0 %v2635_v30  ;;  %v2636_v11 = vpack.c.bf16 %v3503_v10, %v3502_v8  ;;  %v3506_v49 = vld [vmem:[%s4356_s26 + $0xaa] sm:$0xff]  ;;  %v3508_v8 = vld [vmem:[%s4356_s26 + $0xc2] sm:$0xff] }
 0x10e   : > { %v636_v42 = vpop.f32.mrf.mxu1  ;;  %v910_v43 = vpop.f32.mrf.mxu0  ;;  %v3509_v10 = vld [vmem:[%s4356_s26 + $0xca] sm:$0xff] }
 0x10f   : > { %v4958_v4 = vadd.f32 %v3885_v50, %v645_v7  ;;  %v637_v46 = vadd.f32 %v636_v42, %v4862_v33  ;;  %v3507_v50 = vld [vmem:[%s4356_s26 + $0xb2] sm:$0xff]  ;;  %v3453_v7 = vld [vmem:[%s4356_s26 + $0xc9] sm:$0xff] }
 0x110   : > { %v3838_v27 = vpop.f32.mrf.mxu1  ;;  %v3886_v28 = vpop.f32.mrf.mxu0 }
 0x111   : > { %v4961_v12 = vadd.f32 %v910_v43, %v637_v46  ;;  %v648_v13 = vadd.f32 %v3838_v27, %v4866_v35  ;;  %v3451_v35 = vld [vmem:[%s4356_s26 + $0xb1] sm:$0xff]  ;;  %v2333_v27 = vpack.c.bf16 %v3453_v7, %v3452_v51 }
 0x112   : > { %v639_v14 = vpop.f32.mrf.mxu1  ;;  %v913_v23 = vpop.f32.mrf.mxu0  ;;  %v2332_v48 = vpack.c.bf16 %v3451_v35, %v3450_v61  ;;  %v3456_v61 = vld [vmem:[%s4356_s26 + $0xf1] sm:$0xff] }
 0x113   : > { %v4964_v29 = vadd.f32 %v3886_v28, %v648_v13  ;;  %v640_v33 = vadd.f32 %v639_v14, %v4870_v59  ;;  %v2639_v28 = vpack.c.bf16 %v3509_v10, %v3508_v8  ;;  %v3454_v14 = vld [vmem:[%s4356_s26 + $0xd9] sm:$0xff] }
 0x114   : > { %v3841_v40 = vpop.f32.mrf.mxu1  ;;  %v3889_v55 = vpop.f32.mrf.mxu0  ;;  %4128 = vmatmul.mubr.bf16.gmra.mxu1 %v2330_v39  ;;  %4176 = vmatmul.mubr.bf16.gmra.mxu0 %v2636_v11 }
 0x115   : > { %v4969_v6 = vadd.f32 %v913_v23, %v640_v33  ;;  %v661_v30 = vadd.f32 %v3841_v40, %v4874_v24  ;;  %4131 = vmatprep.mubr.bf16.mxu1 %v2331_v60  ;;  %4179 = vmatprep.mubr.bf16.mxu0 %v2637_v5  ;;  %v2638_v24 = vpack.c.bf16 %v3507_v50, %v3506_v49  ;;  %v3510_v40 = vld [vmem:[%s4356_s26 + $0xda] sm:$0xff]  ;;  %v3512_v49 = vld [vmem:[%s4356_s26 + $0xf2] sm:$0xff] }
 0x116   : > { %v652_v52 = vpop.f32.mrf.mxu1  ;;  %v926_v59 = vpop.f32.mrf.mxu0  ;;  %v3513_v50 = vld [vmem:[%s4356_s26 + $0xfa] sm:$0xff] }
 0x117   : > { %v4978_v41 = vadd.f32 %v3889_v55, %v661_v30  ;;  %v653_v42 = vadd.f32 %v652_v52, %v4882_v15  ;;  %v3511_v55 = vld [vmem:[%s4356_s26 + $0xe2] sm:$0xff]  ;;  %v3457_v30 = vld [vmem:[%s4356_s26 + $0xf9] sm:$0xff] }
 0x118   : > { %v3842_v43 = vpop.f32.mrf.mxu1  ;;  %v3890_v47 = vpop.f32.mrf.mxu0 }
 0x119   : > { %v4981_v3 = vadd.f32 %v926_v59, %v653_v42  ;;  %v664_v46 = vadd.f32 %v3842_v43, %v4886_v17  ;;  %v3455_v17 = vld [vmem:[%s4356_s26 + $0xe1] sm:$0xff]  ;;  %v2335_v43 = vpack.c.bf16 %v3457_v30, %v3456_v61 }
 0x11a   : > { %v655_v39 = vpop.f32.mrf.mxu1  ;;  %v929_v11 = vpop.f32.mrf.mxu0  ;;  %v2334_v8 = vpack.c.bf16 %v3455_v17, %v3454_v14  ;;  %v3460_v14 = vld [vmem:[%s4356_s26 + $0x121] sm:$0xff] }
 0x11b   : > { %v4984_v13 = vadd.f32 %v3890_v47, %v664_v46  ;;  %v656_v15 = vadd.f32 %v655_v39, %v4890_v36  ;;  %v2641_v47 = vpack.c.bf16 %v3513_v50, %v3512_v49  ;;  %v3458_v39 = vld [vmem:[%s4356_s26 + $0x109] sm:$0xff] }
 0x11c   : > { %v3845_v60 = vpop.f32.mrf.mxu1  ;;  %v3893_v5 = vpop.f32.mrf.mxu0  ;;  %4132 = vmatmul.mubr.bf16.gmra.mxu1 %v2332_v48  ;;  %4180 = vmatmul.mubr.bf16.gmra.mxu0 %v2638_v24 }
 0x11d   : > { %v4989_v23 = vadd.f32 %v929_v11, %v656_v15  ;;  %v677_v33 = vadd.f32 %v3845_v60, %v4894_v37  ;;  %4135 = vmatprep.mubr.bf16.mxu1 %v2333_v27  ;;  %4183 = vmatprep.mubr.bf16.mxu0 %v2639_v28  ;;  %v2640_v37 = vpack.c.bf16 %v3511_v55, %v3510_v40  ;;  %v3514_v60 = vld [vmem:[%s4356_s26 + $0x10a] sm:$0xff]  ;;  %v3516_v40 = vld [vmem:[%s4356_s26 + $0x122] sm:$0xff] }
 0x11e   : > { %v668_v35 = vpop.f32.mrf.mxu1  ;;  %v942_v36 = vpop.f32.mrf.mxu0  ;;  %v3517_v55 = vld [vmem:[%s4356_s26 + $0x12a] sm:$0xff] }
 0x11f   : > { %v4998_v51 = vadd.f32 %v3893_v5, %v677_v33  ;;  %v669_v52 = vadd.f32 %v668_v35, %v4907_v53  ;;  %v3515_v5 = vld [vmem:[%s4356_s26 + $0x112] sm:$0xff]  ;;  %v3461_v33 = vld [vmem:[%s4356_s26 + $0x129] sm:$0xff] }
 0x120   : > { %v3846_v59 = vpop.f32.mrf.mxu1  ;;  %v3894_v7 = vpop.f32.mrf.mxu0 }
 0x121   : > { %v5001_v10 = vadd.f32 %v942_v36, %v669_v52  ;;  %v680_v42 = vadd.f32 %v3846_v59, %v4914_v22  ;;  %v3459_v22 = vld [vmem:[%s4356_s26 + $0x111] sm:$0xff]  ;;  %v2337_v59 = vpack.c.bf16 %v3461_v33, %v3460_v14 }
 0x122   : > { %v671_v48 = vpop.f32.mrf.mxu1  ;;  %v945_v24 = vpop.f32.mrf.mxu0  ;;  %v2336_v49 = vpack.c.bf16 %v3459_v22, %v3458_v39  ;;  %v3464_v39 = vld [vmem:[%s4356_s26 + $0x151] sm:$0xff] }
 0x123   : > { %v5004_v46 = vadd.f32 %v3894_v7, %v680_v42  ;;  %v672_v53 = vadd.f32 %v671_v48, %v4920_v56  ;;  %v2643_v7 = vpack.c.bf16 %v3517_v55, %v3516_v40  ;;  %v3462_v48 = vld [vmem:[%s4356_s26 + $0x139] sm:$0xff] }
 0x124   : > { %v3849_v27 = vpop.f32.mrf.mxu1  ;;  %v3897_v28 = vpop.f32.mrf.mxu0  ;;  %4136 = vmatmul.mubr.bf16.gmra.mxu1 %v2334_v8  ;;  %4184 = vmatmul.mubr.bf16.gmra.mxu0 %v2640_v37 }
 0x125   : > { %v5009_v11 = vadd.f32 %v945_v24, %v672_v53  ;;  %v693_v15 = vadd.f32 %v3849_v27, %v4924_v44  ;;  %4139 = vmatprep.mubr.bf16.mxu1 %v2335_v43  ;;  %4187 = vmatprep.mubr.bf16.mxu0 %v2641_v47  ;;  %v2642_v44 = vpack.c.bf16 %v3515_v5, %v3514_v60  ;;  %v3518_v27 = vld [vmem:[%s4356_s26 + $0x13a] sm:$0xff]  ;;  %v3520_v60 = vld [vmem:[%s4356_s26 + $0x152] sm:$0xff] }
 0x126   : > { %v684_v17 = vpop.f32.mrf.mxu1  ;;  %v958_v56 = vpop.f32.mrf.mxu0  ;;  %v3521_v5 = vld [vmem:[%s4356_s26 + $0x15a] sm:$0xff] }
 0x127   : > { %v5018_v61 = vadd.f32 %v3897_v28, %v693_v15  ;;  %v685_v35 = vadd.f32 %v684_v17, %v4934_v19  ;;  %v3519_v28 = vld [vmem:[%s4356_s26 + $0x142] sm:$0xff]  ;;  %v3465_v15 = vld [vmem:[%s4356_s26 + $0x159] sm:$0xff] }
 0x128   : > { %v3850_v36 = vpop.f32.mrf.mxu1  ;;  %v3898_v30 = vpop.f32.mrf.mxu0  ;;  %v2644_v55 = vpack.c.bf16 %v3519_v28, %v3518_v27 }
 0x129   : > { %v5021_v50 = vadd.f32 %v958_v56, %v685_v35  ;;  %v696_v52 = vadd.f32 %v3850_v36, %v4941_v20  ;;  %v3463_v20 = vld [vmem:[%s4356_s26 + $0x141] sm:$0xff]  ;;  %v2339_v36 = vpack.c.bf16 %v3465_v15, %v3464_v39 }
 0x12a   : > { %v687_v8 = vpop.f32.mrf.mxu1  ;;  %v961_v37 = vpop.f32.mrf.mxu0  ;;  %v2338_v40 = vpack.c.bf16 %v3463_v20, %v3462_v48 }
 0x12b   : > { %v5024_v42 = vadd.f32 %v3898_v30, %v696_v52  ;;  %v688_v19 = vadd.f32 %v687_v8, %v4945_v31  ;;  %v2645_v30 = vpack.c.bf16 %v3521_v5, %v3520_v60  ;;  %v3466_v8 = vld [vmem:[%s4356_s26 + $0x169] sm:$0xff] }
 0x12c   : > { %v3853_v43 = vpop.f32.mrf.mxu1  ;;  %v3901_v47 = vpop.f32.mrf.mxu0  ;;  %4140 = vmatmul.mubr.bf16.gmra.mxu1 %v2336_v49  ;;  %4188 = vmatmul.mubr.bf16.gmra.mxu0 %v2642_v44 }
 0x12d   : > { %v5029_v24 = vadd.f32 %v961_v37, %v688_v19  ;;  %v709_v53 = vadd.f32 %v3853_v43, %v4856_v26  ;;  %4143 = vmatprep.mubr.bf16.mxu1 %v2337_v59  ;;  %4191 = vmatprep.mubr.bf16.mxu0 %v2643_v7  ;;  %v3467_v19 = vld [vmem:[%s4356_s26 + $0x171] sm:$0xff] }
 0x12e   : > { %v700_v22 = vpop.f32.mrf.mxu1  ;;  %v974_v31 = vpop.f32.mrf.mxu0  ;;  %v3522_v43 = vld [vmem:[%s4356_s26 + $0x16a] sm:$0xff]  ;;  %v2340_v39 = vpack.c.bf16 %v3467_v19, %v3466_v8 }
 0x12f   : > { %v5038_v14 = vadd.f32 %v3901_v47, %v709_v53  ;;  %v701_v17 = vadd.f32 %v700_v22, %v4864_v34  ;;  %v3523_v47 = vld [vmem:[%s4356_s26 + $0x172] sm:$0xff] }
 0x130   : > { %v3854_v56 = vpop.f32.mrf.mxu1  ;;  %v3902_v33 = vpop.f32.mrf.mxu0  ;;  %v2646_v22 = vpack.c.bf16 %v3523_v47, %v3522_v43 }
 0x131   : > { %v5041_v26 = vadd.f32 %v974_v31, %v701_v17  ;;  %v712_v35 = vadd.f32 %v3854_v56, %v4868_v58 }
 0x132   : > { %v703_v49 = vpop.f32.mrf.mxu1  ;;  %v977_v44 = vpop.f32.mrf.mxu0 }
 0x133   : > { %v5044_v52 = vadd.f32 %v3902_v33, %v712_v35  ;;  %v704_v34 = vadd.f32 %v703_v49, %v4872_v62  ;;  %v3526_v35 = vld [vmem:[%s4356_s26 + $0x19a] sm:$0xff] }
 0x134   : > { %v3857_v59 = vpop.f32.mrf.mxu1  ;;  %v3905_v7 = vpop.f32.mrf.mxu0  ;;  %4144 = vmatmul.mubr.bf16.gmra.mxu1 %v2338_v40  ;;  %4192 = vmatmul.mubr.bf16.gmra.mxu0 %v2644_v55 }
 0x135   : > { %v5048_v37 = vadd.f32 %v977_v44, %v704_v34  ;;  %v725_v58 = vadd.f32 %v3857_v59, %v4876_v63  ;;  %4147 = vmatprep.mubr.bf16.mxu1 %v2339_v36  ;;  %4195 = vmatprep.mubr.bf16.mxu0 %v2645_v30  ;;  %v3527_v36 = vld [vmem:[%s4356_s26 + $0x1a2] sm:$0xff] }
 0x136   : > { %v716_v48 = vpop.f32.mrf.mxu1  ;;  %v990_v20 = vpop.f32.mrf.mxu0  ;;  %v2648_v8 = vpack.c.bf16 %v3527_v36, %v3526_v35 }
 0x137   : > { %v5054_v53 = vadd.f32 %v3905_v7, %v725_v58  ;;  %v717_v62 = vadd.f32 %v716_v48, %v4884_v16  ;;  %v3470_v16 = vld [vmem:[%s4356_s26 + $0x199] sm:$0xff] }
 0x138   : > { %v3858_v27 = vpop.f32.mrf.mxu1  ;;  %v3906_v28 = vpop.f32.mrf.mxu0 }
 0x139   : > { %v5057_v31 = vadd.f32 %v990_v20, %v717_v62  ;;  %v728_v63 = vadd.f32 %v3858_v27, %v4888_v25  ;;  %v3471_v25 = vld [vmem:[%s4356_s26 + $0x1a1] sm:$0xff]  ;;  %s3554_s26 = sshll.u32 %s5546_s16, 8 }
 0x13a   : > { %v719_v15 = vpop.f32.mrf.mxu1  ;;  %v993_v60 = vpop.f32.mrf.mxu0  ;;  %v2342_v7 = vpack.c.bf16 %v3471_v25, %v3470_v16  ;;  %s5327_s29 = scalar_lea.vmem %s5460_s2, %s3554_s26 }
 0x13b   : > { %v5060_v5 = vadd.f32 %v3906_v28, %v728_v63  ;;  %v720_v17 = vadd.f32 %v719_v15, %v4892_v18 }
 0x13c   : > { %v3861_v56 = vpop.f32.mrf.mxu1  ;;  %v3909_v33 = vpop.f32.mrf.mxu0  ;;  %4148 = vmatmul.mubr.bf16.gmra.mxu1 %v2340_v39  ;;  %4196 = vmatmul.mubr.bf16.gmra.mxu0 %v2646_v22 }
 0x13d   : > { %v5064_v40 = vadd.f32 %v993_v60, %v720_v17  ;;  %v741_v55 = vadd.f32 %v3861_v56, %v4896_v38  ;;  %4151 = vmatprep.mubr.bf16.mxu1 %v4790_v21  ;;  %4199 = vmatprep.mubr.bf16.mxu0 %v4918_v2 }
 0x13e   : > { %v732_v30 = vpop.f32.mrf.mxu1  ;;  %v1006_v49 = vpop.f32.mrf.mxu0 }
 0x13f   : > { %v5072_v44 = vadd.f32 %v3909_v33, %v741_v55  ;;  %v733_v18 = vadd.f32 %v732_v30, %v4909_v0 }
 0x140   : > { %v3862_v34 = vpop.f32.mrf.mxu1  ;;  %v3910_v59 = vpop.f32.mrf.mxu0 }
 0x141   : > { %v5075_v58 = vadd.f32 %v1006_v49, %v733_v18  ;;  %v744_v38 = vadd.f32 %v3862_v34, %v4916_v1 }
 0x142   : > { %v735_v21 = vpop.f32.mrf.mxu1  ;;  %v1009_v19 = vpop.f32.mrf.mxu0 }
 0x143   : > { %v5078_v2 = vadd.f32 %v3910_v59, %v744_v38  ;;  %v736_v43 = vadd.f32 %v735_v21, %v4922_v57 }
 0x144   : > { %v3865_v47 = vpop.f32.mrf.mxu1  ;;  %v3913_v48 = vpop.f32.mrf.mxu0  ;;  %4152 = vmatmul.mubr.bf16.gmra.mxu1 %v2342_v7  ;;  %4200 = vmatmul.mubr.bf16.gmra.mxu0 %v2648_v8 }
 0x145   : > { %v5081_v20 = vadd.f32 %v1009_v19, %v736_v43  ;;  %v757_v0 = vadd.f32 %v3865_v47, %v4926_v54 }
 0x146   : > { %v748_v62 = vpop.f32.mrf.mxu1  ;;  %v1022_v27 = vpop.f32.mrf.mxu0 }
 0x147   : > { %v5084_v28 = vadd.f32 %v3913_v48, %v757_v0  ;;  %v749_v1 = vadd.f32 %v748_v62, %v4936_v9 }
 0x148   : > { %v3866_v39 = vpop.f32.mrf.mxu1  ;;  %v3914_v22 = vpop.f32.mrf.mxu0 }
 0x149   : > { %v5087_v63 = vadd.f32 %v1022_v27, %v749_v1  ;;  %v760_v57 = vadd.f32 %v3866_v39, %v4943_v45 }
 0x14a   : > { %v751_v15 = vpop.f32.mrf.mxu1  ;;  %v1025_v60 = vpop.f32.mrf.mxu0 }
 0x14b   : > { %v5090_v17 = vadd.f32 %v3914_v22, %v760_v57  ;;  %v752_v56 = vadd.f32 %v751_v15, %v4947_v32 }
 0x14c   : > { %v3933_v33 = vpop.f32.mrf.mxu1  ;;  %v3981_v54 = vpop.f32.mrf.mxu0 }
 0x14d   : > { %v5093_v16 = vadd.f32 %v1025_v60, %v752_v56  ;;  %v1346_v55 = vadd.f32 %v3933_v33, %v4958_v4 }
 0x14e   : > { %v1217_v25 = vpop.f32.mrf.mxu1  ;;  %v1523_v9 = vpop.f32.mrf.mxu0 }
 0x14f   : > { %v5096_v35 = vadd.f32 %v3981_v54, %v1346_v55  ;;  %v1344_v36 = vadd.f32 %v1217_v25, %v4961_v12 }
 0x150   : > { %v3934_v30 = vpop.f32.mrf.mxu1  ;;  %v3982_v45 = vpop.f32.mrf.mxu0 }
 0x151   : > { %v5099_v49 = vadd.f32 %v1523_v9, %v1344_v36  ;;  %v1347_v18 = vadd.f32 %v3934_v30, %v4964_v29 }
 0x152   : > { %v1220_v34 = vpop.f32.mrf.mxu1  ;;  %v1526_v32 = vpop.f32.mrf.mxu0 }
 0x153   : > { %v5102_v59 = vadd.f32 %v3982_v45, %v1347_v18  ;;  %v1345_v7 = vadd.f32 %v1220_v34, %v4969_v6 }
 0x154   : > { %v3937_v8 = vpop.f32.mrf.mxu1  ;;  %v3985_v4 = vpop.f32.mrf.mxu0 }
 0x155   : > { %v5105_v38 = vadd.f32 %v1526_v32, %v1345_v7  ;;  %v1350_v21 = vadd.f32 %v3937_v8, %v4978_v41 }
 0x156   : > { %v1233_v19 = vpop.f32.mrf.mxu1  ;;  %v1539_v12 = vpop.f32.mrf.mxu0 }
 0x157   : > { %v5108_v43 = vadd.f32 %v3985_v4, %v1350_v21  ;;  %v1348_v47 = vadd.f32 %v1233_v19, %v4981_v3 }
 0x158   : > { %v3938_v48 = vpop.f32.mrf.mxu1  ;;  %v3986_v29 = vpop.f32.mrf.mxu0 }
 0x159   : > { %v5111_v0 = vadd.f32 %v1539_v12, %v1348_v47  ;;  %v1351_v62 = vadd.f32 %v3938_v48, %v4984_v13 }
 0x15a   : > { %v1236_v27 = vpop.f32.mrf.mxu1  ;;  %v1542_v6 = vpop.f32.mrf.mxu0 }
 0x15b   : > { %v5114_v1 = vadd.f32 %v3986_v29, %v1351_v62  ;;  %v1349_v39 = vadd.f32 %v1236_v27, %v4989_v23 }
 0x15c   : > { %v3941_v22 = vpop.f32.mrf.mxu1  ;;  %v3989_v41 = vpop.f32.mrf.mxu0 }
 0x15d   : > { %v5117_v57 = vadd.f32 %v1542_v6, %v1349_v39  ;;  %v1354_v15 = vadd.f32 %v3941_v22, %v4998_v51 }
 0x15e   : > { %v1249_v60 = vpop.f32.mrf.mxu1  ;;  %v1555_v3 = vpop.f32.mrf.mxu0 }
 0x15f   : > { %v5120_v56 = vadd.f32 %v3989_v41, %v1354_v15  ;;  %v1352_v33 = vadd.f32 %v1249_v60, %v5001_v10 }
 0x160   : > { %v3942_v54 = vpop.f32.mrf.mxu1  ;;  %v3990_v13 = vpop.f32.mrf.mxu0 }
 0x161   : > { %v5123_v55 = vadd.f32 %v1555_v3, %v1352_v33  ;;  %v1355_v25 = vadd.f32 %v3942_v54, %v5004_v46 }
 0x162   : > { %v1252_v9 = vpop.f32.mrf.mxu1  ;;  %v1558_v23 = vpop.f32.mrf.mxu0 }
 0x163   : > { %v5126_v36 = vadd.f32 %v3990_v13, %v1355_v25  ;;  %v1353_v30 = vadd.f32 %v1252_v9, %v5009_v11 }
 0x164   : > { %v3945_v45 = vpop.f32.mrf.mxu1  ;;  %v3993_v51 = vpop.f32.mrf.mxu0 }
 0x165   : > { %v5129_v18 = vadd.f32 %v1558_v23, %v1353_v30  ;;  %v1358_v34 = vadd.f32 %v3945_v45, %v5018_v61 }
 0x166   : > { %v1265_v32 = vpop.f32.mrf.mxu1  ;;  %v1571_v10 = vpop.f32.mrf.mxu0 }
 0x167   : > { %v5132_v7 = vadd.f32 %v3993_v51, %v1358_v34  ;;  %v1356_v8 = vadd.f32 %v1265_v32, %v5021_v50 }
 0x168   : > { %v3946_v4 = vpop.f32.mrf.mxu1  ;;  %v3994_v46 = vpop.f32.mrf.mxu0 }
 0x169   : > { %v5135_v21 = vadd.f32 %v1571_v10, %v1356_v8  ;;  %v1359_v19 = vadd.f32 %v3946_v4, %v5024_v42 }
 0x16a   : > { %v1268_v12 = vpop.f32.mrf.mxu1  ;;  %v1574_v11 = vpop.f32.mrf.mxu0 }
 0x16b   : > { %v5138_v47 = vadd.f32 %v3994_v46, %v1359_v19  ;;  %v1357_v48 = vadd.f32 %v1268_v12, %v5029_v24 }
 0x16c   : > { %v3949_v29 = vpop.f32.mrf.mxu1  ;;  %v3997_v61 = vpop.f32.mrf.mxu0 }
 0x16d   : > { %v5141_v62 = vadd.f32 %v1574_v11, %v1357_v48  ;;  %v1362_v27 = vadd.f32 %v3949_v29, %v5038_v14 }
 0x16e   : > { %v1281_v6 = vpop.f32.mrf.mxu1  ;;  %v1587_v50 = vpop.f32.mrf.mxu0 }
 0x16f   : > { %v5144_v39 = vadd.f32 %v3997_v61, %v1362_v27  ;;  %v1360_v22 = vadd.f32 %v1281_v6, %v5041_v26 }
 0x170   : > { %v3950_v41 = vpop.f32.mrf.mxu1  ;;  %v3998_v42 = vpop.f32.mrf.mxu0 }
 0x171   : > { %v5147_v15 = vadd.f32 %v1587_v50, %v1360_v22  ;;  %v1363_v60 = vadd.f32 %v3950_v41, %v5044_v52 }
 0x172   : > { %v1284_v3 = vpop.f32.mrf.mxu1  ;;  %v1590_v24 = vpop.f32.mrf.mxu0 }
 0x173   : > { %v5150_v33 = vadd.f32 %v3998_v42, %v1363_v60  ;;  %v1361_v54 = vadd.f32 %v1284_v3, %v5048_v37 }
 0x174   : > { %v3953_v13 = vpop.f32.mrf.mxu1  ;;  %v4001_v14 = vpop.f32.mrf.mxu0 }
 0x175   : > { %5463 = vst [vmem:[#allocation2_spill] sm:$0xff] %v5150_v33  ;;  %v5153_v25 = vadd.f32 %v1590_v24, %v1361_v54  ;;  %v1366_v9 = vadd.f32 %v3953_v13, %v5054_v53 }
 0x176   : > { %v1297_v23 = vpop.f32.mrf.mxu1  ;;  %v1603_v26 = vpop.f32.mrf.mxu0 }
 0x177   : > { %5464 = vst [vmem:[#allocation3_spill] sm:$0xff] %v5153_v25  ;;  %v5156_v30 = vadd.f32 %v4001_v14, %v1366_v9  ;;  %v1364_v45 = vadd.f32 %v1297_v23, %v5057_v31 }
 0x178   : > { %v3954_v51 = vpop.f32.mrf.mxu1  ;;  %v4002_v52 = vpop.f32.mrf.mxu0 }
 0x179   : > { %5465 = vst [vmem:[#allocation4_spill] sm:$0xff] %v5156_v30  ;;  %v5159_v34 = vadd.f32 %v1603_v26, %v1364_v45  ;;  %v1367_v32 = vadd.f32 %v3954_v51, %v5060_v5 }
 0x17a   : > { %v1300_v10 = vpop.f32.mrf.mxu1  ;;  %v1606_v37 = vpop.f32.mrf.mxu0 }
 0x17b   : > { %5466 = vst [vmem:[#allocation5_spill] sm:$0xff] %v5159_v34  ;;  %v5162_v8 = vadd.f32 %v4002_v52, %v1367_v32  ;;  %v1365_v4 = vadd.f32 %v1300_v10, %v5064_v40 }
 0x17c   : > { %v3957_v46 = vpop.f32.mrf.mxu1  ;;  %v4005_v53 = vpop.f32.mrf.mxu0 }
 0x17d   : > { %5467 = vst [vmem:[#allocation6_spill] sm:$0xff] %v5162_v8  ;;  %v5165_v19 = vadd.f32 %v1606_v37, %v1365_v4  ;;  %v1370_v12 = vadd.f32 %v3957_v46, %v5072_v44 }
 0x17e   : > { %v1313_v11 = vpop.f32.mrf.mxu1  ;;  %v1619_v31 = vpop.f32.mrf.mxu0 }
 0x17f   : > { %5468 = vst [vmem:[#allocation7_spill] sm:$0xff] %v5165_v19  ;;  %v5168_v48 = vadd.f32 %v4005_v53, %v1370_v12  ;;  %v1368_v29 = vadd.f32 %v1313_v11, %v5075_v58 }
 0x180   : > { %v3958_v61 = vpop.f32.mrf.mxu1  ;;  %v4006_v5 = vpop.f32.mrf.mxu0 }
 0x181   : > { %5469 = vst [vmem:[#allocation8_spill] sm:$0xff] %v5168_v48  ;;  %v5171_v27 = vadd.f32 %v1619_v31, %v1368_v29  ;;  %v1371_v6 = vadd.f32 %v3958_v61, %v5078_v2 }
 0x182   : > { %v1316_v50 = vpop.f32.mrf.mxu1  ;;  %v1622_v40 = vpop.f32.mrf.mxu0 }
 0x183   : > { %5470 = vst [vmem:[#allocation9_spill] sm:$0xff] %v5171_v27  ;;  %v5174_v22 = vadd.f32 %v4006_v5, %v1371_v6  ;;  %v1369_v41 = vadd.f32 %v1316_v50, %v5081_v20 }
 0x184   : > { %v3961_v42 = vpop.f32.mrf.mxu1  ;;  %v4009_v44 = vpop.f32.mrf.mxu0 }
 0x185   : > { %5471 = vst [vmem:[#allocation10_spill] sm:$0xff] %v5174_v22  ;;  %v5177_v60 = vadd.f32 %v1622_v40, %v1369_v41  ;;  %v1374_v3 = vadd.f32 %v3961_v42, %v5084_v28 }
 0x186   : > { %v1329_v24 = vpop.f32.mrf.mxu1  ;;  %v1635_v58 = vpop.f32.mrf.mxu0 }
 0x187   : > { %5472 = vst [vmem:[#allocation11_spill] sm:$0xff] %v5177_v60  ;;  %v5180_v54 = vadd.f32 %v4009_v44, %v1374_v3  ;;  %v1372_v13 = vadd.f32 %v1329_v24, %v5087_v63 }
 0x188   : > { %v3962_v14 = vpop.f32.mrf.mxu1  ;;  %v4010_v2 = vpop.f32.mrf.mxu0 }
 0x189   : > { %5473 = vst [vmem:[#allocation12_spill] sm:$0xff] %v5180_v54  ;;  %v5183_v9 = vadd.f32 %v1635_v58, %v1372_v13  ;;  %v1375_v23 = vadd.f32 %v3962_v14, %v5090_v17 }
 0x18a   : > { %v1332_v26 = vpop.f32.mrf.mxu1  ;;  %v1638_v20 = vpop.f32.mrf.mxu0 }
 0x18b   : > { %5474 = vst [vmem:[#allocation13_spill] sm:$0xff] %v5183_v9  ;;  %v5186_v45 = vadd.f32 %v4010_v2, %v1375_v23  ;;  %v1373_v51 = vadd.f32 %v1332_v26, %v5093_v16 }
 0x18c   : > { %v4029_v52 = vpop.f32.mrf.mxu1  ;;  %v5189_v28 = vpop.f32.mrf.mxu0 }
 0x18d   : > { %5475 = vst [vmem:[#allocation14_spill] sm:$0xff] %v5186_v45  ;;  %v5191_v32 = vadd.f32 %v1638_v20, %v1373_v51 }
 0x18e   : > { %v1829_v10 = vpop.f32.mrf.mxu1  ;;  %v5193_v37 = vpop.f32.mrf.mxu0 }
 0x18f   : > { %5476 = vst [vmem:[#allocation15_spill] sm:$0xff] %v5191_v32 }
 0x190   : > { %v5195_v63 = vpop.f32.mrf.mxu1  ;;  %v5197_v4 = vpop.f32.mrf.mxu0 }
 0x192   : > { %v5199_v46 = vpop.f32.mrf.mxu1  ;;  %v5201_v17 = vpop.f32.mrf.mxu0 }
 0x194   : > { %v5203_v53 = vpop.f32.mrf.mxu1  ;;  %v5205_v12 = vpop.f32.mrf.mxu0 }
 0x196   : > { %v5207_v16 = vpop.f32.mrf.mxu1  ;;  %v5209_v11 = vpop.f32.mrf.mxu0 }
 0x198   : > { %v5211_v31 = vpop.f32.mrf.mxu1  ;;  %v5213_v29 = vpop.f32.mrf.mxu0 }
 0x19a   : > { %v5215_v61 = vpop.f32.mrf.mxu1  ;;  %v5217_v5 = vpop.f32.mrf.mxu0 }
 0x19c   : > { %v5219_v6 = vpop.f32.mrf.mxu1  ;;  %v5221_v50 = vpop.f32.mrf.mxu0 }
 0x19e   : > { %v5223_v40 = vpop.f32.mrf.mxu1  ;;  %v5225_v41 = vpop.f32.mrf.mxu0 }
 0x1a0   : > { %v5227_v42 = vpop.f32.mrf.mxu1  ;;  %v5229_v44 = vpop.f32.mrf.mxu0 }
 0x1a2   : > { %v5231_v3 = vpop.f32.mrf.mxu1  ;;  %v5233_v24 = vpop.f32.mrf.mxu0 }
 0x1a4   : > { %v5235_v58 = vpop.f32.mrf.mxu1  ;;  %v5237_v13 = vpop.f32.mrf.mxu0 }
 0x1a6   : > { %v5239_v14 = vpop.f32.mrf.mxu1  ;;  %v5241_v2 = vpop.f32.mrf.mxu0 }
 0x1a8   : > { %v5243_v23 = vpop.f32.mrf.mxu1  ;;  %v5245_v26 = vpop.f32.mrf.mxu0 }
 0x1aa   : > { %v5247_v20 = vpop.f32.mrf.mxu1  ;;  %v5249_v51 = vpop.f32.mrf.mxu0 }
 0x1ac   : > { %v5251_v32 = vpop.f32.mrf.mxu1  ;;  %v5253_v45 = vpop.f32.mrf.mxu0 }
 0x1ae   : > { %v5255_v9 = vpop.f32.mrf.mxu1  ;;  %v5257_v54 = vpop.f32.mrf.mxu0 }
 0x1af   : > { %5477 = vst [vmem:[#allocation16_spill] sm:$0xff] %v5257_v54 }
 0x1b0   : > { %v5259_v60 = vpop.f32.mrf.mxu1  ;;  %v5261_v22 = vpop.f32.mrf.mxu0 }
 0x1b1   : > { %5478 = vst [vmem:[#allocation17_spill] sm:$0xff] %v5259_v60  ;;  %5479 = vst [vmem:[#allocation18_spill] sm:$0xff] %v5261_v22 }
 0x1b2   : > { %v5263_v27 = vpop.f32.mrf.mxu1  ;;  %v5265_v48 = vpop.f32.mrf.mxu0 }
 0x1b3   : > { %5480 = vst [vmem:[#allocation19_spill] sm:$0xff] %v5263_v27  ;;  %5481 = vst [vmem:[#allocation20_spill] sm:$0xff] %v5265_v48 }
 0x1b4   : > { %v5267_v19 = vpop.f32.mrf.mxu1  ;;  %v5269_v8 = vpop.f32.mrf.mxu0 }
 0x1b5   : > { %5482 = vst [vmem:[#allocation21_spill] sm:$0xff] %v5267_v19  ;;  %5483 = vst [vmem:[#allocation22_spill] sm:$0xff] %v5269_v8 }
 0x1b6   : > { %v5271_v34 = vpop.f32.mrf.mxu1  ;;  %v5273_v30 = vpop.f32.mrf.mxu0 }
 0x1b7   : > { %5484 = vst [vmem:[#allocation23_spill] sm:$0xff] %v5271_v34  ;;  %5485 = vst [vmem:[#allocation24_spill] sm:$0xff] %v5273_v30 }
 0x1b8   : > { %v5275_v25 = vpop.f32.mrf.mxu1  ;;  %v5277_v33 = vpop.f32.mrf.mxu0 }
 0x1b9   : > { %5486 = vst [vmem:[#allocation25_spill] sm:$0xff] %v5275_v25  ;;  %5487 = vst [vmem:[#allocation26_spill] sm:$0xff] %v5277_v33 }
 0x1ba   : > { %v5279_v54 = vpop.f32.mrf.mxu1  ;;  %v5281_v60 = vpop.f32.mrf.mxu0 }
 0x1bb   : > { %5488 = vst [vmem:[#allocation27_spill] sm:$0xff] %v5279_v54  ;;  %5489 = vst [vmem:[#allocation28_spill] sm:$0xff] %v5281_v60 }
 0x1bc   : > { %v5283_v22 = vpop.f32.mrf.mxu1  ;;  %v5285_v27 = vpop.f32.mrf.mxu0 }
 0x1bd   : > { %5490 = vst [vmem:[#allocation29_spill] sm:$0xff] %v5283_v22  ;;  %5491 = vst [vmem:[#allocation30_spill] sm:$0xff] %v5285_v27 }
 0x1be   : > { %v5287_v48 = vpop.f32.mrf.mxu1  ;;  %v5289_v19 = vpop.f32.mrf.mxu0 }
 0x1bf   : > { %5492 = vst [vmem:[#allocation31_spill] sm:$0xff] %v5287_v48  ;;  %5493 = vst [vmem:[#allocation32_spill] sm:$0xff] %v5289_v19  ;;  %v1958_v48 = vadd.f32 %v4029_v52, %v5096_v35  ;;  %v1957_v52 = vadd.f32 %v5199_v46, %v5105_v38 }
 0x1c0   : > { %v5291_v8 = vpop.f32.mrf.mxu1  ;;  %v5293_v30 = vpop.f32.mrf.mxu0 }
 0x1c1   : > { %5494 = vst [vmem:[#allocation33_spill] sm:$0xff] %v5291_v8  ;;  %5495 = vst [vmem:[#allocation34_spill] sm:$0xff] %v5293_v30  ;;  %v1956_v30 = vadd.f32 %v1829_v10, %v5099_v49  ;;  %v2264_v38 = vadd.f32 %v5201_v17, %v1957_v52 }
 0x1c2   : > { %v5295_v25 = vpop.f32.mrf.mxu1  ;;  %v5297_v33 = vpop.f32.mrf.mxu0 }
 0x1c3   : > { %5496 = vst [vmem:[#allocation35_spill] sm:$0xff] %v5295_v25  ;;  %5497 = vst [vmem:[#allocation36_spill] sm:$0xff] %v5297_v33  ;;  %v2265_v33 = vadd.f32 %v5189_v28, %v1958_v48  ;;  %v2263_v35 = vadd.f32 %v5193_v37, %v1956_v30  ;;  %v1962_v28 = vadd.f32 %v5203_v53, %v5108_v43 }
 0x1c4   : > { %v5299_v54 = vpop.f32.mrf.mxu1  ;;  %v5301_v60 = vpop.f32.mrf.mxu0 }
 0x1c5   : > { %5498 = vst [vmem:[#allocation37_spill] sm:$0xff] %v5301_v60  ;;  %v1959_v60 = vadd.f32 %v5195_v63, %v5102_v59 }
 0x1c6   : > { %v5303_v22 = vpop.f32.mrf.mxu1  ;;  %v5305_v27 = vpop.f32.mrf.mxu0 }
 0x1c7   : > { %5499 = vst [vmem:[#allocation38_spill] sm:$0xff] %v5303_v22  ;;  %5500 = vst [vmem:[#allocation39_spill] sm:$0xff] %v5305_v27  ;;  %v2266_v59 = vadd.f32 %v5197_v4, %v1959_v60  ;;  %v2269_v60 = vadd.f32 %v5205_v12, %v1962_v28  ;;  %v1961_v4 = vadd.f32 %v5215_v61, %v5117_v57 }
 0x1c8   : > { %v5308_v19 = vpop.f32.mrf.mxu1  ;;  %v5310_v8 = vpop.f32.mrf.mxu0  ;;  %v1966_v12 = vadd.f32 %v5219_v6, %v5120_v56 }
 0x1c9   : > { %5501 = vst [vmem:[#allocation40_spill] sm:$0xff] %v5310_v8  ;;  %v2268_v61 = vadd.f32 %v5217_v5, %v1961_v4 }
 0x1ca   : > { %v5313_v34 = vpop.f32.mrf.mxu1  ;;  %v5315_v25 = vpop.f32.mrf.mxu0  ;;  %v2273_v6 = vadd.f32 %v5221_v50, %v1966_v12 }
 0x1cb   : > { %5502 = vst [vmem:[#allocation41_spill] sm:$0xff] %v5313_v34  ;;  %5503 = vst [vmem:[#allocation42_spill] sm:$0xff] %v5315_v25 }
 0x1cc   : > { %v4125_v22 = vpop.f32.mrf.mxu1  ;;  %v4173_v27 = vpop.f32.mrf.mxu0 }
 0x1cd   : > { %v2571_v8 = vadd.f32 %v4125_v22, %v2265_v33  ;;  %v1960_v33 = vadd.f32 %v5207_v16, %v5111_v0 }
 0x1ce   : > { %v2442_v49 = vpop.f32.mrf.mxu1  ;;  %v2748_v48 = vpop.f32.mrf.mxu0 }
 0x1cf   : > { %v2877_v10 = vadd.f32 %v4173_v27, %v2571_v8  ;;  %v2569_v30 = vadd.f32 %v2442_v49, %v2263_v35  ;;  %v1963_v27 = vadd.f32 %v5211_v31, %v5114_v1  ;;  %v2267_v0 = vadd.f32 %v5209_v11, %v1960_v33 }
 0x1d0   : > { %v4126_v37 = vpop.f32.mrf.mxu1  ;;  %v4174_v63 = vpop.f32.mrf.mxu0 }
 0x1d1   : > { %2909 = vst [vmem:[%s5327_s29 + $0x10] sm:$0xff] %v2877_v10  ;;  %v2875_v22 = vadd.f32 %v2748_v48, %v2569_v30  ;;  %v2572_v46 = vadd.f32 %v4126_v37, %v2266_v59  ;;  %v2270_v57 = vadd.f32 %v5213_v29, %v1963_v27  ;;  %v2979_v28 = vmul.f32 %v2877_v10, %v2877_v10 }
 0x1d2   : > { %v2445_v25 = vpop.f32.mrf.mxu1  ;;  %v2751_v34 = vpop.f32.mrf.mxu0 }
 0x1d3   : > { %2907 = vst [vmem:[%s5327_s29] sm:$0xff] %v2875_v22  ;;  %v2878_v43 = vadd.f32 %v4174_v63, %v2572_v46  ;;  %v2570_v8 = vadd.f32 %v2445_v25, %v2264_v38  ;;  %v2977_v52 = vmul.f32 %v2875_v22, %v2875_v22  ;;  %v1964_v63 = vadd.f32 %v5223_v40, %v5123_v55 }
 0x1d4   : > { %v4129_v17 = vpop.f32.mrf.mxu1  ;;  %v4177_v53 = vpop.f32.mrf.mxu0  ;;  %v1967_v38 = vadd.f32 %v5227_v42, %v5126_v36 }
 0x1d5   : > { %2910 = vst [vmem:[%s5327_s29 + $0x18] sm:$0xff] %v2878_v43  ;;  %v2876_v16 = vadd.f32 %v2751_v34, %v2570_v8  ;;  %v2575_v35 = vadd.f32 %v4129_v17, %v2269_v60  ;;  %v2980_v5 = vmul.f32 %v2878_v43, %v2878_v43  ;;  %v1965_v8 = vadd.f32 %v5231_v3, %v5129_v18 }
 0x1d6   : > { %v2458_v49 = vpop.f32.mrf.mxu1  ;;  %v2764_v25 = vpop.f32.mrf.mxu0 }
 0x1d7   : > { %2908 = vst [vmem:[%s5327_s29 + $0x8] sm:$0xff] %v2876_v16  ;;  %v2939_v48 = vadd.f32 %v2876_v16, %v2875_v22  ;;  %v2978_v1 = vmul.f32 %v2876_v16, %v2876_v16  ;;  %v2881_v31 = vadd.f32 %v4177_v53, %v2575_v35  ;;  %v2573_v59 = vadd.f32 %v2458_v49, %v2267_v0 }
 0x1d8   : > { %v4130_v11 = vpop.f32.mrf.mxu1  ;;  %v4178_v34 = vpop.f32.mrf.mxu0  ;;  %v2271_v53 = vadd.f32 %v5225_v41, %v1964_v63  ;;  %v2274_v0 = vadd.f32 %v5229_v44, %v1967_v38  ;;  %v1970_v49 = vadd.f32 %v5235_v58, %v5132_v7 }
 0x1d9   : > { %v2940_v30 = vadd.f32 %v2939_v48, %v2877_v10  ;;  %v3009_v37 = vadd.f32 %v2978_v1, %v2977_v52  ;;  %2913 = vst [vmem:[%s5327_s29 + $0x30] sm:$0xff] %v2881_v31  ;;  %v2879_v56 = vadd.f32 %v2764_v25, %v2573_v59  ;;  %v2576_v33 = vadd.f32 %v4130_v11, %v2270_v57 }
 0x1da   : > { %v2461_v29 = vpop.f32.mrf.mxu1  ;;  %v2767_v22 = vpop.f32.mrf.mxu0  ;;  %v2272_v52 = vadd.f32 %v5233_v24, %v1965_v8  ;;  %v1968_v25 = vadd.f32 %v5239_v14, %v5135_v21  ;;  %v2983_v1 = vmul.f32 %v2881_v31, %v2881_v31  ;;  %v1971_v11 = vadd.f32 %v5243_v23, %v5138_v47 }
 0x1db   : > { %v3010_v46 = vadd.f32 %v3009_v37, %v2979_v28  ;;  %2911 = vst [vmem:[%s5327_s29 + $0x20] sm:$0xff] %v2879_v56  ;;  %v2941_v60 = vadd.f32 %v2940_v30, %v2878_v43  ;;  %v2574_v10 = vadd.f32 %v2461_v29, %v2268_v61  ;;  %v2981_v50 = vmul.f32 %v2879_v56, %v2879_v56 }
 0x1dc   : > { %v2882_v27 = vadd.f32 %v4178_v34, %v2576_v33  ;;  %v4133_v4 = vpop.f32.mrf.mxu1  ;;  %v4181_v55 = vpop.f32.mrf.mxu0  ;;  %v2277_v37 = vadd.f32 %v5237_v13, %v1970_v49  ;;  %v2278_v33 = vadd.f32 %v5245_v26, %v1971_v11  ;;  %v1969_v29 = vadd.f32 %v5247_v20, %v5141_v62 }
 0x1dd   : > { %v2942_v40 = vadd.f32 %v2941_v60, %v2879_v56  ;;  %v3011_v17 = vadd.f32 %v3010_v46, %v2980_v5  ;;  %v2880_v36 = vadd.f32 %v2767_v22, %v2574_v10  ;;  %v2579_v42 = vadd.f32 %v4133_v4, %v2273_v6 }
 0x1de   : > { %2914 = vst [vmem:[%s5327_s29 + $0x38] sm:$0xff] %v2882_v27  ;;  %v2474_v16 = vpop.f32.mrf.mxu1  ;;  %v2780_v43 = vpop.f32.mrf.mxu0  ;;  %v2984_v34 = vmul.f32 %v2882_v27, %v2882_v27  ;;  %v2275_v56 = vadd.f32 %v5241_v2, %v1968_v25  ;;  %v1974_v22 = vadd.f32 %v5251_v32, %v5144_v39 }
 0x1df   : > { %v3012_v35 = vadd.f32 %v3011_v17, %v2981_v50  ;;  %2912 = vst [vmem:[%s5327_s29 + $0x28] sm:$0xff] %v2880_v36  ;;  %v2943_v12 = vadd.f32 %v2942_v40, %v2880_v36  ;;  %v2982_v18 = vmul.f32 %v2880_v36, %v2880_v36  ;;  %v2885_v3 = vadd.f32 %v4181_v55, %v2579_v42  ;;  %v5504_v36 = vld [vmem:[#allocation2_spill] sm:$0xff]  ;;  %v5505_v42 = vld [vmem:[#allocation17_spill] sm:$0xff] }
 0x1e0   : > { %v2577_v41 = vadd.f32 %v2474_v16, %v2271_v53  ;;  %v4134_v48 = vpop.f32.mrf.mxu1  ;;  %v4182_v44 = vpop.f32.mrf.mxu0  ;;  %v1972_v50 = vadd.f32 %v5255_v9, %v5147_v15  ;;  %v2276_v40 = vadd.f32 %v5249_v51, %v1969_v29  ;;  %v2281_v17 = vadd.f32 %v5253_v45, %v1974_v22  ;;  %v5515_v22 = vld [vmem:[#allocation6_spill] sm:$0xff] }
 0x1e1   : > { %v2944_v59 = vadd.f32 %v2943_v12, %v2881_v31  ;;  %v3013_v57 = vadd.f32 %v3012_v35, %v2982_v18  ;;  %2917 = vst [vmem:[%s5327_s29 + $0x50] sm:$0xff] %v2885_v3  ;;  %v2580_v61 = vadd.f32 %v4134_v48, %v2274_v0  ;;  %v1975_v53 = vadd.f32 %v5505_v42, %v5504_v36  ;;  %v5506_v12 = vld [vmem:[#allocation16_spill] sm:$0xff]  ;;  %v5519_v42 = vld [vmem:[#allocation7_spill] sm:$0xff] }
 0x1e2   : > { %v2883_v24 = vadd.f32 %v2780_v43, %v2577_v41  ;;  %v2477_v28 = vpop.f32.mrf.mxu1  ;;  %v2783_v7 = vpop.f32.mrf.mxu0  ;;  %v2279_v18 = vadd.f32 %v5506_v12, %v1972_v50  ;;  %v5517_v50 = vld [vmem:[#allocation22_spill] sm:$0xff] }
 0x1e3   : > { %v3014_v58 = vadd.f32 %v3013_v57, %v2983_v1  ;;  %v2945_v30 = vadd.f32 %v2944_v59, %v2882_v27  ;;  %v2886_v21 = vadd.f32 %v4182_v44, %v2580_v61  ;;  %v2578_v14 = vadd.f32 %v2477_v28, %v2272_v52  ;;  %v5508_v52 = vld [vmem:[#allocation19_spill] sm:$0xff]  ;;  %v5509_v59 = vld [vmem:[#allocation18_spill] sm:$0xff]  ;;  %v5511_v28 = vld [vmem:[#allocation21_spill] sm:$0xff] }
 0x1e4   : > { %2915 = vst [vmem:[%s5327_s29 + $0x40] sm:$0xff] %v2883_v24  ;;  %v4137_v31 = vpop.f32.mrf.mxu1  ;;  %v4185_v6 = vpop.f32.mrf.mxu0  ;;  %v2985_v38 = vmul.f32 %v2883_v24, %v2883_v24  ;;  %v2987_v27 = vmul.f32 %v2885_v3, %v2885_v3  ;;  %v2282_v57 = vadd.f32 %v5509_v59, %v1975_v53  ;;  %v5520_v53 = vld [vmem:[#allocation27_spill] sm:$0xff] }
 0x1e5   : > { %v2946_v63 = vadd.f32 %v2945_v30, %v2883_v24  ;;  %v3015_v47 = vadd.f32 %v3014_v58, %v2984_v34  ;;  %2918 = vst [vmem:[%s5327_s29 + $0x58] sm:$0xff] %v2886_v21  ;;  %v2884_v23 = vadd.f32 %v2783_v7, %v2578_v14  ;;  %v2583_v13 = vadd.f32 %v4137_v31, %v2277_v37  ;;  %v5510_v24 = vld [vmem:[#allocation4_spill] sm:$0xff] }
 0x1e6   : > { %v2490_v5 = vpop.f32.mrf.mxu1  ;;  %v2796_v2 = vpop.f32.mrf.mxu0  ;;  %v2988_v9 = vmul.f32 %v2886_v21, %v2886_v21  ;;  %v1978_v7 = vadd.f32 %v5511_v28, %v5510_v24 }
 0x1e7   : > { %v3016_v46 = vadd.f32 %v3015_v47, %v2985_v38  ;;  %2916 = vst [vmem:[%s5327_s29 + $0x48] sm:$0xff] %v2884_v23  ;;  %v2947_v60 = vadd.f32 %v2946_v63, %v2884_v23  ;;  %v2986_v10 = vmul.f32 %v2884_v23, %v2884_v23  ;;  %v2581_v8 = vadd.f32 %v2490_v5, %v2275_v56  ;;  %v5513_v38 = vld [vmem:[#allocation5_spill] sm:$0xff]  ;;  %v5514_v47 = vld [vmem:[#allocation23_spill] sm:$0xff] }
 0x1e8   : > { %v2889_v26 = vadd.f32 %v4185_v6, %v2583_v13  ;;  %v4138_v4 = vpop.f32.mrf.mxu1  ;;  %v4186_v62 = vpop.f32.mrf.mxu0  ;;  %v5512_v6 = vld [vmem:[#allocation20_spill] sm:$0xff]  ;;  %v1976_v23 = vadd.f32 %v5514_v47, %v5513_v38  ;;  %v5516_v13 = vld [vmem:[#allocation25_spill] sm:$0xff]  ;;  %v5529_v38 = vld [vmem:[#allocation30_spill] sm:$0xff] }
 0x1e9   : > { %v2948_v20 = vadd.f32 %v2947_v60, %v2885_v3  ;;  %v3017_v55 = vadd.f32 %v3016_v46, %v2986_v10  ;;  %v2887_v39 = vadd.f32 %v2796_v2, %v2581_v8  ;;  %v2584_v32 = vadd.f32 %v4138_v4, %v2278_v33  ;;  %v5507_v3 = vld [vmem:[#allocation3_spill] sm:$0xff] }
 0x1ea   : > { %2921 = vst [vmem:[%s5327_s29 + $0x70] sm:$0xff] %v2889_v26  ;;  %v2493_v0 = vpop.f32.mrf.mxu1  ;;  %v2799_v15 = vpop.f32.mrf.mxu0  ;;  %v1973_v49 = vadd.f32 %v5508_v52, %v5507_v3  ;;  %v1979_v5 = vadd.f32 %v5516_v13, %v5515_v22  ;;  %v2991_v2 = vmul.f32 %v2889_v26, %v2889_v26 }
 0x1eb   : > { %v3018_v16 = vadd.f32 %v3017_v55, %v2987_v27  ;;  %2919 = vst [vmem:[%s5327_s29 + $0x60] sm:$0xff] %v2887_v39  ;;  %v2949_v43 = vadd.f32 %v2948_v20, %v2886_v21  ;;  %v2890_v35 = vadd.f32 %v4186_v62, %v2584_v32  ;;  %v2582_v51 = vadd.f32 %v2493_v0, %v2276_v40 }
 0x1ec   : > { %v4141_v45 = vpop.f32.mrf.mxu1  ;;  %v4189_v25 = vpop.f32.mrf.mxu0  ;;  %v2989_v48 = vmul.f32 %v2887_v39, %v2887_v39  ;;  %v2280_v63 = vadd.f32 %v5512_v6, %v1973_v49  ;;  %v2285_v27 = vadd.f32 %v5517_v50, %v1978_v7  ;;  %v1977_v0 = vadd.f32 %v5520_v53, %v5519_v42  ;;  %v5522_v49 = vld [vmem:[#allocation8_spill] sm:$0xff] }
 0x1ed   : > { %v2950_v41 = vadd.f32 %v2949_v43, %v2887_v39  ;;  %v3019_v44 = vadd.f32 %v3018_v16, %v2988_v9  ;;  %2922 = vst [vmem:[%s5327_s29 + $0x78] sm:$0xff] %v2890_v35  ;;  %v2587_v1 = vadd.f32 %v4141_v45, %v2281_v17  ;;  %v2888_v61 = vadd.f32 %v2799_v15, %v2582_v51  ;;  %v5518_v17 = vld [vmem:[#allocation24_spill] sm:$0xff]  ;;  %v5521_v9 = vld [vmem:[#allocation26_spill] sm:$0xff] }
 0x1ee   : > { %v2506_v11 = vpop.f32.mrf.mxu1  ;;  %v2812_v34 = vpop.f32.mrf.mxu0  ;;  %v2992_v20 = vmul.f32 %v2890_v35, %v2890_v35  ;;  %v2283_v36 = vadd.f32 %v5518_v17, %v1976_v23  ;;  %v2286_v16 = vadd.f32 %v5521_v9, %v1979_v5 }
 0x1ef   : > { %v3020_v58 = vadd.f32 %v3019_v44, %v2989_v48  ;;  %v2893_v30 = vadd.f32 %v4189_v25, %v2587_v1  ;;  %v2585_v21 = vadd.f32 %v2506_v11, %v2279_v18  ;;  %2920 = vst [vmem:[%s5327_s29 + $0x68] sm:$0xff] %v2888_v61  ;;  %v2951_v14 = vadd.f32 %v2950_v41, %v2888_v61  ;;  %v5525_v11 = vld [vmem:[#allocation9_spill] sm:$0xff] }
 0x1f0   : > { %v2990_v37 = vmul.f32 %v2888_v61, %v2888_v61  ;;  %v4142_v56 = vpop.f32.mrf.mxu1  ;;  %v4190_v31 = vpop.f32.mrf.mxu0 }
 0x1f1   : > { %2925 = vst [vmem:[%s5327_s29 + $0x90] sm:$0xff] %v2893_v30  ;;  %v2891_v33 = vadd.f32 %v2812_v34, %v2585_v21  ;;  %v2588_v29 = vadd.f32 %v4142_v56, %v2282_v57  ;;  %v2952_v46 = vadd.f32 %v2951_v14, %v2889_v26  ;;  %v5524_v57 = vld [vmem:[#allocation28_spill] sm:$0xff]  ;;  %v5526_v34 = vld [vmem:[#allocation31_spill] sm:$0xff]  ;;  %v5528_v21 = vld [vmem:[#allocation33_spill] sm:$0xff] }
 0x1f2   : > { %v3021_v60 = vadd.f32 %v3020_v58, %v2990_v37  ;;  %v2509_v10 = vpop.f32.mrf.mxu1  ;;  %v2815_v8 = vpop.f32.mrf.mxu0  ;;  %v2284_v61 = vadd.f32 %v5524_v57, %v1977_v0  ;;  %v1980_v24 = vadd.f32 %v5526_v34, %v5525_v11  ;;  %v5527_v58 = vld [vmem:[#allocation10_spill] sm:$0xff]  ;;  %v2995_v37 = vmul.f32 %v2893_v30, %v2893_v30 }
 0x1f3   : > { %2923 = vst [vmem:[%s5327_s29 + $0x80] sm:$0xff] %v2891_v33  ;;  %v2894_v4 = vadd.f32 %v4190_v31, %v2588_v29  ;;  %v2586_v62 = vadd.f32 %v2509_v10, %v2280_v63  ;;  %v2953_v39 = vadd.f32 %v2952_v46, %v2890_v35  ;;  %v2993_v12 = vmul.f32 %v2891_v33, %v2891_v33  ;;  %v5523_v35 = vld [vmem:[#allocation29_spill] sm:$0xff]  ;;  %v5530_v46 = vld [vmem:[#allocation32_spill] sm:$0xff]  ;;  %v5531_v10 = vld [vmem:[#allocation11_spill] sm:$0xff] }
 0x1f4   : > { %v3022_v55 = vadd.f32 %v3021_v60, %v2991_v2  ;;  %v4145_v32 = vpop.f32.mrf.mxu1  ;;  %v4193_v40 = vpop.f32.mrf.mxu0  ;;  %v1982_v51 = vadd.f32 %v5523_v35, %v5522_v49  ;;  %v1983_v14 = vadd.f32 %v5528_v21, %v5527_v58  ;;  %v2287_v60 = vadd.f32 %v5530_v46, %v1980_v24  ;;  %v5540_v21 = vld [vmem:[#allocation39_spill] sm:$0xff] }
 0x1f5   : > { %2926 = vst [vmem:[%s5327_s29 + $0x98] sm:$0xff] %v2894_v4  ;;  %v2892_v26 = vadd.f32 %v2815_v8, %v2586_v62  ;;  %v2591_v15 = vadd.f32 %v4145_v32, %v2285_v27  ;;  %v2954_v43 = vadd.f32 %v2953_v39, %v2891_v33  ;;  %v2996_v29 = vmul.f32 %v2894_v4, %v2894_v4  ;;  %v5532_v8 = vld [vmem:[#allocation35_spill] sm:$0xff]  ;;  %v5533_v62 = vld [vmem:[#allocation34_spill] sm:$0xff] }
 0x1f6   : > { %v3023_v18 = vadd.f32 %v3022_v55, %v2992_v20  ;;  %v2522_v3 = vpop.f32.mrf.mxu1  ;;  %v2828_v52 = vpop.f32.mrf.mxu0  ;;  %v2289_v47 = vadd.f32 %v5529_v38, %v1982_v51  ;;  %v1981_v50 = vadd.f32 %v5532_v8, %v5531_v10  ;;  %v2290_v20 = vadd.f32 %v5533_v62, %v1983_v14  ;;  %v5541_v14 = vld [vmem:[#allocation15_spill] sm:$0xff]  ;;  %v5544_v8 = vld [vmem:[#allocation42_spill] sm:$0xff] }
 0x1f7   : > { %2924 = vst [vmem:[%s5327_s29 + $0x88] sm:$0xff] %v2892_v26  ;;  %v2994_v45 = vmul.f32 %v2892_v26, %v2892_v26  ;;  %v2897_v25 = vadd.f32 %v4193_v40, %v2591_v15  ;;  %v2589_v41 = vadd.f32 %v2522_v3, %v2283_v36  ;;  %v2955_v44 = vadd.f32 %v2954_v43, %v2892_v26  ;;  %v5534_v36 = vld [vmem:[#allocation12_spill] sm:$0xff]  ;;  %v5537_v3 = vld [vmem:[#allocation38_spill] sm:$0xff] }
 0x1f8   : > { %v3024_v48 = vadd.f32 %v3023_v18, %v2993_v12  ;;  %v4146_v1 = vpop.f32.mrf.mxu1  ;;  %v4194_v59 = vpop.f32.mrf.mxu0  ;;  %v5535_v43 = vld [vmem:[#allocation36_spill] sm:$0xff]  ;;  %v5536_v18 = vld [vmem:[#allocation13_spill] sm:$0xff] }
 0x1f9   : > { %2929 = vst [vmem:[%s5327_s29 + $0xb0] sm:$0xff] %v2897_v25  ;;  %v2895_v28 = vadd.f32 %v2828_v52, %v2589_v41  ;;  %v2592_v7 = vadd.f32 %v4146_v1, %v2286_v16  ;;  %v2956_v56 = vadd.f32 %v2955_v44, %v2893_v30  ;;  %v2288_v12 = vadd.f32 %v5535_v43, %v1981_v50  ;;  %v5538_v44 = vld [vmem:[#allocation37_spill] sm:$0xff] }
 0x1fa   : > { %v3025_v31 = vadd.f32 %v3024_v48, %v2994_v45  ;;  %v2525_v6 = vpop.f32.mrf.mxu1  ;;  %v2831_v63 = vpop.f32.mrf.mxu0  ;;  %v1984_v52 = vadd.f32 %v5537_v3, %v5536_v18  ;;  %v2999_v51 = vmul.f32 %v2897_v25, %v2897_v25 }
 0x1fb   : > { %2927 = vst [vmem:[%s5327_s29 + $0xa0] sm:$0xff] %v2895_v28  ;;  %v2898_v23 = vadd.f32 %v4194_v59, %v2592_v7  ;;  %v2590_v33 = vadd.f32 %v2525_v6, %v2284_v61  ;;  %v2957_v13 = vadd.f32 %v2956_v56, %v2894_v4  ;;  %v2997_v39 = vmul.f32 %v2895_v28, %v2895_v28  ;;  %v5539_v59 = vld [vmem:[#allocation14_spill] sm:$0xff] }
 0x1fc   : > { %v3026_v22 = vadd.f32 %v3025_v31, %v2995_v37  ;;  %v4149_v5 = vpop.f32.mrf.mxu1  ;;  %v4197_v2 = vpop.f32.mrf.mxu0  ;;  %v1986_v4 = vadd.f32 %v5299_v54, %v5534_v36  ;;  %v1987_v57 = vadd.f32 %v5308_v19, %v5539_v59  ;;  %v5542_v37 = vld [vmem:[#allocation41_spill] sm:$0xff] }
 0x1fd   : > { %2930 = vst [vmem:[%s5327_s29 + $0xb8] sm:$0xff] %v2898_v23  ;;  %v2896_v30 = vadd.f32 %v2831_v63, %v2590_v33  ;;  %v2595_v27 = vadd.f32 %v4149_v5, %v2289_v47  ;;  %v2958_v55 = vadd.f32 %v2957_v13, %v2895_v28  ;;  %v3000_v34 = vmul.f32 %v2898_v23, %v2898_v23 }
 0x1fe   : > { %v3027_v32 = vadd.f32 %v3026_v22, %v2996_v29  ;;  %v2538_v40 = vpop.f32.mrf.mxu1  ;;  %v2844_v17 = vpop.f32.mrf.mxu0  ;;  %v2293_v1 = vadd.f32 %v5538_v44, %v1986_v4  ;;  %v1985_v56 = vadd.f32 %v5542_v37, %v5541_v14  ;;  %v5543_v29 = vld [vmem:[#allocation40_spill] sm:$0xff] }
 0x1ff   : > { %2928 = vst [vmem:[%s5327_s29 + $0xa8] sm:$0xff] %v2896_v30  ;;  %v2998_v42 = vmul.f32 %v2896_v30, %v2896_v30  ;;  %v2901_v53 = vadd.f32 %v4197_v2, %v2595_v27  ;;  %v2593_v0 = vadd.f32 %v2538_v40, %v2287_v60  ;;  %v2959_v15 = vadd.f32 %v2958_v55, %v2896_v30 }
 0x200   : > { %v3028_v26 = vadd.f32 %v3027_v32, %v2997_v39  ;;  %v4150_v9 = vpop.f32.mrf.mxu1  ;;  %v4198_v16 = vpop.f32.mrf.mxu0  ;;  %v2294_v22 = vadd.f32 %v5543_v29, %v1987_v57  ;;  %v2292_v50 = vadd.f32 %v5544_v8, %v1985_v56 }
 0x201   : > { %2933 = vst [vmem:[%s5327_s29 + $0xd0] sm:$0xff] %v2901_v53  ;;  %v2899_v49 = vadd.f32 %v2844_v17, %v2593_v0  ;;  %v2596_v35 = vadd.f32 %v4150_v9, %v2290_v20  ;;  %v2960_v45 = vadd.f32 %v2959_v15, %v2897_v25  ;;  %v2291_v25 = vadd.f32 %v5540_v21, %v1984_v52 }
 0x202   : > { %v3029_v54 = vadd.f32 %v3028_v26, %v2998_v42  ;;  %v2541_v41 = vpop.f32.mrf.mxu1  ;;  %v2847_v48 = vpop.f32.mrf.mxu0  ;;  %v3003_v62 = vmul.f32 %v2901_v53, %v2901_v53 }
 0x203   : > { %2931 = vst [vmem:[%s5327_s29 + $0xc0] sm:$0xff] %v2899_v49  ;;  %v2902_v61 = vadd.f32 %v4198_v16, %v2596_v35  ;;  %v2594_v11 = vadd.f32 %v2541_v41, %v2288_v12  ;;  %v2961_v28 = vadd.f32 %v2960_v45, %v2898_v23  ;;  %v3001_v19 = vmul.f32 %v2899_v49, %v2899_v49 }
 0x204   : > { %v3030_v24 = vadd.f32 %v3029_v54, %v2999_v51  ;;  %v4153_v7 = vpop.f32.mrf.mxu1  ;;  %v4201_v58 = vpop.f32.mrf.mxu0 }
 0x205   : > { %2934 = vst [vmem:[%s5327_s29 + $0xd8] sm:$0xff] %v2902_v61  ;;  %v2900_v31 = vadd.f32 %v2847_v48, %v2594_v11  ;;  %v2599_v6 = vadd.f32 %v4153_v7, %v2293_v1  ;;  %v2962_v63 = vadd.f32 %v2961_v28, %v2899_v49  ;;  %v3004_v17 = vmul.f32 %v2902_v61, %v2902_v61 }
 0x206   : > { %v3031_v38 = vadd.f32 %v3030_v24, %v3000_v34  ;;  %v2554_v47 = vpop.f32.mrf.mxu1  ;;  %v2860_v33 = vpop.f32.mrf.mxu0 }
 0x207   : > { %2932 = vst [vmem:[%s5327_s29 + $0xc8] sm:$0xff] %v2900_v31  ;;  %v3002_v23 = vmul.f32 %v2900_v31, %v2900_v31  ;;  %v2905_v13 = vadd.f32 %v4201_v58, %v2599_v6  ;;  %v2597_v5 = vadd.f32 %v2554_v47, %v2291_v25  ;;  %v2963_v46 = vadd.f32 %v2962_v63, %v2900_v31 }
 0x208   : > { %v3032_v2 = vadd.f32 %v3031_v38, %v3001_v19  ;;  %v4154_v60 = vpop.f32.mrf.mxu1  ;;  %v4202_v10 = vpop.f32.mrf.mxu0 }
 0x209   : > { %2937 = vst [vmem:[%s5327_s29 + $0xf0] sm:$0xff] %v2905_v13  ;;  %v2903_v30 = vadd.f32 %v2860_v33, %v2597_v5  ;;  %v2600_v27 = vadd.f32 %v4154_v60, %v2294_v22  ;;  %v2964_v20 = vadd.f32 %v2963_v46, %v2901_v53  ;;  %v3007_v18 = vmul.f32 %v2905_v13, %v2905_v13 }
 0x20a   : > { %v3033_v55 = vadd.f32 %v3032_v2, %v3002_v23  ;;  %v2557_v39 = vpop.f32.mrf.mxu1  ;;  %v2863_v42 = vpop.f32.mrf.mxu0 }
 0x20b   : > { %2935 = vst [vmem:[%s5327_s29 + $0xe0] sm:$0xff] %v2903_v30  ;;  %v2906_v32 = vadd.f32 %v4202_v10, %v2600_v27  ;;  %v2598_v40 = vadd.f32 %v2557_v39, %v2292_v50  ;;  %v2965_v4 = vadd.f32 %v2964_v20, %v2902_v61  ;;  %v3005_v15 = vmul.f32 %v2903_v30, %v2903_v30 }
 0x20c   : > { %v3034_v36 = vadd.f32 %v3033_v55, %v3003_v62 }
 0x20d   : > { %2938 = vst [vmem:[%s5327_s29 + $0xf8] sm:$0xff] %v2906_v32  ;;  %v2904_v0 = vadd.f32 %v2863_v42, %v2598_v40  ;;  %v2966_v26 = vadd.f32 %v2965_v4, %v2903_v30  ;;  %v3008_v52 = vmul.f32 %v2906_v32, %v2906_v32 }
 0x20e   : > { %v3035_v9 = vadd.f32 %v3034_v36, %v3004_v17 }
 0x20f   : > { %2936 = vst [vmem:[%s5327_s29 + $0xe8] sm:$0xff] %v2904_v0  ;;  %v3006_v16 = vmul.f32 %v2904_v0, %v2904_v0  ;;  %v2967_v12 = vadd.f32 %v2966_v26, %v2904_v0 }
 0x210   : > { %v3036_v43 = vadd.f32 %v3035_v9, %v3005_v15 }
 0x211   : > { %v2968_v53 = vadd.f32 %v2967_v12, %v2905_v13 }
 0x212   : > { %v3037_v3 = vadd.f32 %v3036_v43, %v3006_v16 }
 0x213   : > { %v2969_v49 = vadd.f32 %v2968_v53, %v2906_v32 }
 0x214   : > { %v3038_v35 = vadd.f32 %v3037_v3, %v3007_v18 }
 0x215   : > { %v2970_v51 = vrot.slane %v2969_v49, 4 }
 0x216   : > { %v3039_v45 = vadd.f32 %v3038_v35, %v3008_v52 }
 0x217   : > { %v2971_v54 = vadd.f32 %v2970_v51, %v2969_v49 }
 0x218   : > { %v3040_v41 = vrot.slane %v3039_v45, 4 }
 0x219   : > { %v2972_v48 = vrot.slane %v2971_v54, 2 }
 0x21a   : > { %v3041_v44 = vadd.f32 %v3040_v41, %v3039_v45 }
 0x21b   : > { %v2973_v1 = vadd.f32 %v2972_v48, %v2971_v54 }
 0x21c   : > { %v3042_v59 = vrot.slane %v3041_v44, 2 }
 0x21d   : > { %v2974_v57 = vrot.slane %v2973_v1, 1 }
 0x21e   : > { %v3043_v61 = vadd.f32 %v3042_v59, %v3041_v44 }
 0x21f   : > { %v2975_v11 = vadd.f32 %v2974_v57, %v2973_v1 }
 0x220   : > { %v3044_v34 = vrot.slane %v3043_v61, 1 }
 0x221   : > { %2976 = vst [vmem:[%s211_s6] sm:$0x1] %v2975_v11 }
 0x222   : > { %v3045_v24 = vadd.f32 %v3044_v34, %v3043_v61 }
 0x224   : > { %3046 = vst [vmem:[%s214_s9] sm:$0x1] %v3045_v24 }
 0x225 PF: > { %s15_s15 = sadd.s32 1, %s4306_s15  }
 0x226   : > { %p12_p4 = scmp.ge.s32.totalorder %s15_s15, 4  }
 0x228   :  { %14 = sbr.rel (!%p12_p4) target bundleno = 1 (0x1), region = 92 }

// kernel: residual_block_forward.4
= control target key start
LH: loop header
LB: loop body
LE: loop exit
PB: predicated region body
PF: predicated region fallthrough
CT: control target
= control target key end

     0   :  { %s4404_s18 = smov 0   ;;  %s5650_s0 = inlined_call_operand.vmem [shape: f32[2,16,16,128], index: 0, kind: input, shape index: {}]   ;;  %s5651_s1 = inlined_call_operand.vmem [shape: f32[8,128], index: 1, kind: input, shape index: {}]   ;;  %s5652_s2 = inlined_call_operand.vmem [shape: bf16[9,128,128], index: 2, kind: input, shape index: {}]   ;;  %s5653_s3 = inlined_call_operand.vmem [shape: f32[2,16,16,128], index: 3, kind: output, shape index: {0}]   ;;  %s5654_s4 = inlined_call_operand.vmem [shape: f32[2,1,128], index: 4, kind: output, shape index: {1}]   ;;  %s5655_s5 = inlined_call_operand.vmem [shape: f32[2,1,128], index: 5, kind: output, shape index: {2}]  }
   0x1 LB: > { %s3403_s19 = sadd.s32 4294967295, %s4370_s18   ;;  %p3407_p0 = scmp.ge.s32.totalorder %s4370_s18, 1  ;;  %s4370_s18 = sphi %s4404_s18, %s16_s18  }
   0x2   : > { %p192_p1 = scmp.lt.s32.totalorder %s4370_s18, 3 }
   0x4   : > { %p193_p2 = pnand %p3407_p0, %p192_p1 }
   0x6   : > { %196 = sbr.rel (%p193_p2) target bundleno = 549 (0x225), region = 32 }
   0xb   : > { %v4291_v0 = vld [vmem:[%s5652_s2 + $0x78] sm:$0xff]   ;;  %v4418_v1 = vld [vmem:[%s5652_s2 + $0x70] sm:$0xff]   ;;  %v4372_v2 = vmov 0.0   ;;  %p226_p3 = scmp.lt.s32.totalorder %s3403_s19, 1  ;;  %v4293_v3 = vld [vmem:[%s5652_s2 + $0x68] sm:$0xff]  }
   0xc   : > { %381 = vst [vmem:[#allocation2] sm:$0xff] %v4372_v2  ;;  %382 = vst [vmem:[#allocation2 + $0x8] sm:$0xff] %v4372_v2  ;;  %3834 = vmatprep.subr.bf16.mxu0 %v4291_v0  ;;  %4266 = vmatprep.subr.bf16.mxu1 %v4291_v0  ;;  %v4294_v4 = vld [vmem:[%s5652_s2 + $0x60] sm:$0xff]   ;;  %v4295_v21 = vld [vmem:[%s5652_s2 + $0x58] sm:$0xff]  }
   0xd   : > { %383 = vst [vmem:[#allocation2 + $0x10] sm:$0x3] %v4372_v2  ;;  %384 = vst [vmem:[#allocation2 + $0x18] sm:$0xff] %v4372_v2  ;;  %3835 = vmatpush3.bf16.msra.mxu0 %v4291_v0  ;;  %4274 = vmatpush3.bf16.msra.mxu1 %v4291_v0  ;;  %s5739_s19 = smov (!%p226_p3, %s3403_s19), 1  ;;  %v4447_v7 = vld [vmem:[%s5651_s1] ss:$0 sm:$0xff] }
   0xe   : > { %385 = vst [vmem:[#allocation2 + $0x20] sm:$0xff] %v4372_v2  ;;  %386 = vst [vmem:[#allocation2 + $0x28] sm:$0x3] %v4372_v2  ;;  %3836 = vmatprep.subr.bf16.mxu0 %v4418_v1  ;;  %4267 = vmatprep.subr.bf16.mxu1 %v4418_v1  ;;  %s3616_s26 = sshll.u32 %s5739_s19, 8  ;;  %v4452_v9 = vld [vmem:[%s5651_s1 + $0x1] ss:$0 sm:$0xff]  ;;  %s241_s27 = scalar_lea.vmem %s5655_s5, %s5739_s19 }
   0xf   : > { %387 = vst [vmem:[#allocation2 + $0x30] sm:$0xff] %v4372_v2  ;;  %388 = vst [vmem:[#allocation2 + $0x38] sm:$0xff] %v4372_v2  ;;  %s4437_s29 = scalar_lea.vmem %s5650_s0, %s3616_s26  ;;  %v4296_v28 = vld [vmem:[%s5652_s2 + $0x50] sm:$0xff]   ;;  %v4297_v55 = vld [vmem:[%s5652_s2 + $0x48] sm:$0xff]   ;;  %s5519_s22 = scalar_lea.vmem %s5653_s3, %s3616_s26 }
  0x10   : > { %389 = vst [vmem:[#allocation2 + $0x40] sm:$0x3] %v4372_v2  ;;  %390 = vst [vmem:[#allocation2 + $0x48] sm:$0xff] %v4372_v2  ;;  %v259_v10 = vld [vmem:[%s4437_s29 + $0x70] sm:$0xff]  ;;  %v260_v11 = vld [vmem:[%s4437_s29 + $0x78] sm:$0xff] }
  0x11   : > { %391 = vst [vmem:[#allocation2 + $0x50] sm:$0xff] %v4372_v2  ;;  %392 = vst [vmem:[#allocation2 + $0x58] sm:$0x3] %v4372_v2  ;;  %3837 = vmatpush3.bf16.msra.mxu0 %v4418_v1  ;;  %4275 = vmatpush3.bf16.msra.mxu1 %v4418_v1  ;;  %v295_v12 = vmul.f32 %v4447_v7, %v259_v10  ;;  %v296_v13 = vmul.f32 %v4447_v7, %v260_v11  ;;  %v245_v14 = vld [vmem:[%s4437_s29] sm:$0xff]  ;;  %v246_v15 = vld [vmem:[%s4437_s29 + $0x8] sm:$0xff] }
  0x12   : > { %393 = vst [vmem:[#allocation2 + $0x60] sm:$0xff] %v4372_v2  ;;  %394 = vst [vmem:[#allocation2 + $0x68] sm:$0xff] %v4372_v2  ;;  %3838 = vmatprep.subr.bf16.mxu0 %v4293_v3  ;;  %4268 = vmatprep.subr.bf16.mxu1 %v4293_v3  ;;  %v261_v16 = vld [vmem:[%s4437_s29 + $0x80] sm:$0xff]  ;;  %v281_v17 = vmul.f32 %v4447_v7, %v245_v14  ;;  %v282_v18 = vmul.f32 %v4447_v7, %v246_v15  ;;  %v262_v19 = vld [vmem:[%s4437_s29 + $0x88] sm:$0xff] }
  0x13   : > { %395 = vst [vmem:[#allocation2 + $0x70] sm:$0x3] %v4372_v2  ;;  %396 = vst [vmem:[#allocation2 + $0x78] sm:$0xff] %v4372_v2  ;;  %v532_v5 = vld [vmem:[#allocation2 + $0x1] sm:$0xff]  ;;  %v297_v20 = vmul.f32 %v4447_v7, %v261_v16  ;;  %v331_v22 = vadd.f32 %v4452_v9, %v295_v12  ;;  %v332_v23 = vadd.f32 %v4452_v9, %v296_v13  ;;  %v247_v35 = vld [vmem:[%s4437_s29 + $0x10] sm:$0xff] }
  0x14   : > { %397 = vst [vmem:[#allocation2 + $0x80] sm:$0xff] %v4372_v2  ;;  %398 = vst [vmem:[#allocation2 + $0x88] sm:$0x3] %v4372_v2  ;;  %v533_v6 = vld [vmem:[#allocation2 + $0x9] sm:$0xff]  ;;  %v298_v24 = vmul.f32 %v4447_v7, %v262_v19  ;;  %v4472_v25 = vadd.f32 %v4452_v9, %v281_v17  ;;  %v4475_v26 = vadd.f32 %v4452_v9, %v282_v18  ;;  %v248_v38 = vld [vmem:[%s4437_s29 + $0x18] sm:$0xff] }
  0x15   : > { %399 = vst [vmem:[#allocation2 + $0x90] sm:$0xff] %v4372_v2  ;;  %400 = vst [vmem:[#allocation2 + $0x98] sm:$0xff] %v4372_v2  ;;  %v564_v8 = vpack.c.bf16 %v533_v6, %v532_v5  ;;  %3839 = vmatpush3.bf16.msra.mxu0 %v4293_v3  ;;  %4276 = vmatpush3.bf16.msra.mxu1 %v4293_v3  ;;  %v4478_v27 = vadd.f32 %v4452_v9, %v297_v20  ;;  %v363_v29 = vmax.f32 %v331_v22, 0.0  ;;  %v263_v40 = vld [vmem:[%s4437_s29 + $0x90] sm:$0xff]  ;;  %v264_v41 = vld [vmem:[%s4437_s29 + $0x98] sm:$0xff] }
  0x16   : > { %401 = vst [vmem:[#allocation2 + $0xa0] sm:$0x3] %v4372_v2  ;;  %402 = vst [vmem:[#allocation2 + $0xa8] sm:$0xff] %v4372_v2  ;;  %3840 = vmatprep.subr.bf16.mxu0 %v4294_v4  ;;  %4269 = vmatprep.subr.bf16.mxu1 %v4294_v4  ;;  %v364_v30 = vmax.f32 %v332_v23, 0.0  ;;  %v4484_v31 = vadd.f32 %v4452_v9, %v298_v24  ;;  %v349_v32 = vmax.f32 %v4472_v25, 0.0  ;;  %v350_v33 = vmax.f32 %v4475_v26, 0.0 }
  0x17   : > { %403 = vst [vmem:[#allocation2 + $0xb0] sm:$0xff] %v4372_v2  ;;  %404 = vst [vmem:[#allocation2 + $0xb8] sm:$0x3] %v4372_v2  ;;  %3850 = vmatprep.mubr.bf16.mxu0 %v564_v8  ;;  %v365_v34 = vmax.f32 %v4478_v27, 0.0  ;;  %v283_v39 = vmul.f32 %v4447_v7, %v247_v35  ;;  %v284_v42 = vmul.f32 %v4447_v7, %v248_v38  ;;  %v249_v45 = vld [vmem:[%s4437_s29 + $0x20] sm:$0xff]  ;;  %v250_v46 = vld [vmem:[%s4437_s29 + $0x28] sm:$0xff] }
  0x18   : > { %405 = vst [vmem:[#allocation2 + $0xc0] sm:$0xff] %v4372_v2  ;;  %406 = vst [vmem:[#allocation2 + $0xc8] sm:$0xff] %v4372_v2  ;;  %v572_v36 = vpack.c.bf16 %v364_v30, %v363_v29  ;;  %v366_v37 = vmax.f32 %v4484_v31, 0.0  ;;  %v299_v43 = vmul.f32 %v4447_v7, %v263_v40  ;;  %v300_v44 = vmul.f32 %v4447_v7, %v264_v41  ;;  %v265_v47 = vld [vmem:[%s4437_s29 + $0xa0] sm:$0xff]  ;;  %v266_v51 = vld [vmem:[%s4437_s29 + $0xa8] sm:$0xff] }
  0x19   : > { %407 = vst [vmem:[#allocation2 + $0xd0] sm:$0x3] %v4372_v2  ;;  %408 = vst [vmem:[#allocation2 + $0xd8] sm:$0xff] %v4372_v2  ;;  %3841 = vmatpush3.bf16.msra.mxu0 %v4294_v4  ;;  %4277 = vmatpush3.bf16.msra.mxu1 %v4294_v4  ;;  %v4510_v48 = vadd.f32 %v4452_v9, %v283_v39  ;;  %v285_v49 = vmul.f32 %v4447_v7, %v249_v45  ;;  %v4542_v0 = vld [vmem:[%s5652_s2 + $0x40] sm:$0xff]   ;;  %v251_v4 = vld [vmem:[%s4437_s29 + $0x30] sm:$0xff] }
  0x1a   : > { %409 = vst [vmem:[#allocation2 + $0xe0] sm:$0xff] %v4372_v2  ;;  %410 = vst [vmem:[#allocation2 + $0xe8] sm:$0x3] %v4372_v2  ;;  %3842 = vmatprep.subr.bf16.mxu0 %v4295_v21  ;;  %4270 = vmatprep.subr.bf16.mxu1 %v4295_v21  ;;  %v286_v50 = vmul.f32 %v4447_v7, %v250_v46  ;;  %v4516_v52 = vadd.f32 %v4452_v9, %v284_v42  ;;  %v252_v6 = vld [vmem:[%s4437_s29 + $0x38] sm:$0xff]  ;;  %v267_v8 = vld [vmem:[%s4437_s29 + $0xb0] sm:$0xff] }
  0x1b   : > { %411 = vst [vmem:[#allocation2 + $0xf0] sm:$0xff] %v4372_v2  ;;  %412 = vst [vmem:[#allocation2 + $0xf8] sm:$0xff] %v4372_v2  ;;  %3866 = vmatprep.mubr.bf16.mxu1 %v572_v36  ;;  %v4519_v53 = vadd.f32 %v4452_v9, %v299_v43  ;;  %v4522_v54 = vadd.f32 %v4452_v9, %v300_v44  ;;  %v351_v56 = vmax.f32 %v4510_v48, 0.0  ;;  %v268_v10 = vld [vmem:[%s4437_s29 + $0xb8] sm:$0xff]  ;;  %v253_v14 = vld [vmem:[%s4437_s29 + $0x40] sm:$0xff] }
  0x1c   : > { %413 = vst [vmem:[#allocation2 + $0x100] sm:$0x3] %v4372_v2  ;;  %414 = vst [vmem:[#allocation2 + $0x108] sm:$0xff] %v4372_v2  ;;  %v4529_v57 = vadd.f32 %v4452_v9, %v285_v49  ;;  %v4532_v58 = vadd.f32 %v4452_v9, %v286_v50  ;;  %v301_v59 = vmul.f32 %v4447_v7, %v265_v47  ;;  %v352_v60 = vmax.f32 %v4516_v52, 0.0  ;;  %v254_v15 = vld [vmem:[%s4437_s29 + $0x48] sm:$0xff]  ;;  %v269_v16 = vld [vmem:[%s4437_s29 + $0xc0] sm:$0xff] }
  0x1d   : > { %415 = vst [vmem:[#allocation2 + $0x110] sm:$0xff] %v4372_v2  ;;  %416 = vst [vmem:[#allocation2 + $0x118] sm:$0x3] %v4372_v2  ;;  %3843 = vmatpush3.bf16.msra.mxu0 %v4295_v21  ;;  %4278 = vmatpush3.bf16.msra.mxu1 %v4295_v21  ;;  %v367_v61 = vmax.f32 %v4519_v53, 0.0  ;;  %v368_v62 = vmax.f32 %v4522_v54, 0.0  ;;  %v302_v63 = vmul.f32 %v4447_v7, %v266_v51  ;;  %v270_v24 = vld [vmem:[%s4437_s29 + $0xc8] sm:$0xff] }
  0x1e   : > { %417 = vst [vmem:[#allocation2 + $0x120] sm:$0xff] %v4372_v2  ;;  %418 = vst [vmem:[#allocation2 + $0x128] sm:$0xff] %v4372_v2  ;;  %3844 = vmatprep.subr.bf16.mxu0 %v4296_v28  ;;  %4271 = vmatprep.subr.bf16.mxu1 %v4296_v28  ;;  %v353_v1 = vmax.f32 %v4529_v57, 0.0  ;;  %v4549_v3 = vadd.f32 %v4452_v9, %v301_v59  ;;  %v287_v12 = vmul.f32 %v4447_v7, %v251_v4  ;;  %v4299_v25 = vld [vmem:[%s5652_s2 + $0x38] sm:$0xff]   ;;  %v255_v43 = vld [vmem:[%s4437_s29 + $0x50] sm:$0xff] }
  0x1f   : > { %419 = vst [vmem:[#allocation2 + $0x130] sm:$0x3] %v4372_v2  ;;  %420 = vst [vmem:[#allocation2 + $0x138] sm:$0xff] %v4372_v2  ;;  %v4559_v5 = vadd.f32 %v4452_v9, %v302_v63  ;;  %v288_v13 = vmul.f32 %v4447_v7, %v252_v6  ;;  %v303_v18 = vmul.f32 %v4447_v7, %v267_v8  ;;  %v4300_v26 = vld [vmem:[%s5652_s2 + $0xb8] sm:$0xff]   ;;  %v271_v50 = vld [vmem:[%s4437_s29 + $0xd0] sm:$0xff] }
  0x20   : > { %421 = vst [vmem:[#allocation2 + $0x140] sm:$0xff] %v4372_v2  ;;  %422 = vst [vmem:[#allocation2 + $0x148] sm:$0x3] %v4372_v2  ;;  %v369_v11 = vmax.f32 %v4549_v3, 0.0  ;;  %v304_v19 = vmul.f32 %v4447_v7, %v268_v10  ;;  %v289_v20 = vmul.f32 %v4447_v7, %v253_v14  ;;  %v4581_v21 = vadd.f32 %v4452_v9, %v287_v12  ;;  %v256_v44 = vld [vmem:[%s4437_s29 + $0x58] sm:$0xff]  ;;  %v257_v27 = vld [vmem:[%s4437_s29 + $0x60] sm:$0xff] }
  0x21   : > { %423 = vst [vmem:[#allocation2 + $0x150] sm:$0xff] %v4372_v2  ;;  %424 = vst [vmem:[#allocation2 + $0x158] sm:$0xff] %v4372_v2  ;;  %3845 = vmatpush3.bf16.msra.mxu0 %v4296_v28  ;;  %4279 = vmatpush3.bf16.msra.mxu1 %v4296_v28  ;;  %v370_v17 = vmax.f32 %v4559_v5, 0.0  ;;  %v4584_v22 = vadd.f32 %v4452_v9, %v288_v13  ;;  %v290_v23 = vmul.f32 %v4447_v7, %v254_v15  ;;  %v272_v51 = vld [vmem:[%s4437_s29 + $0xd8] sm:$0xff]  ;;  %v4301_v31 = vld [vmem:[%s5652_s2 + $0x30] sm:$0xff]  }
  0x22   : > { %425 = vst [vmem:[#allocation2 + $0x160] sm:$0x3] %v4372_v2  ;;  %426 = vst [vmem:[#allocation2 + $0x168] sm:$0xff] %v4372_v2  ;;  %3846 = vmatprep.subr.bf16.mxu0 %v4297_v55  ;;  %4272 = vmatprep.subr.bf16.mxu1 %v4297_v55  ;;  %v305_v28 = vmul.f32 %v4447_v7, %v269_v16  ;;  %v4601_v35 = vadd.f32 %v4452_v9, %v304_v19  ;;  %v258_v63 = vld [vmem:[%s4437_s29 + $0x68] sm:$0xff]  ;;  %v273_v48 = vld [vmem:[%s4437_s29 + $0xe0] sm:$0xff] }
  0x23   : > { %427 = vst [vmem:[#allocation2 + $0x170] sm:$0xff] %v4372_v2  ;;  %428 = vst [vmem:[#allocation2 + $0x178] sm:$0x3] %v4372_v2  ;;  %v4614_v36 = vadd.f32 %v4452_v9, %v289_v20  ;;  %v4617_v38 = vadd.f32 %v4452_v9, %v290_v23  ;;  %v306_v41 = vmul.f32 %v4447_v7, %v270_v24  ;;  %v4302_v52 = vld [vmem:[%s5652_s2 + $0xb0] sm:$0xff]   ;;  %v4303_v16 = vld [vmem:[%s5652_s2 + $0x28] sm:$0xff]  }
  0x24   : > { %429 = vst [vmem:[#allocation2 + $0x180] sm:$0xff] %v4372_v2  ;;  %430 = vst [vmem:[#allocation2 + $0x188] sm:$0xff] %v4372_v2  ;;  %v372_v40 = vmax.f32 %v4601_v35, 0.0  ;;  %v4623_v42 = vadd.f32 %v4452_v9, %v305_v28  ;;  %v573_v45 = vpack.c.bf16 %v366_v37, %v365_v34  ;;  %v291_v49 = vmul.f32 %v4447_v7, %v255_v43  ;;  %v4305_v57 = vld [vmem:[%s5652_s2 + $0x20] sm:$0xff]   ;;  %v4307_v5 = vld [vmem:[%s5652_s2 + $0x18] sm:$0xff]  }
  0x25   : > { %431 = vst [vmem:[#allocation2 + $0x190] sm:$0x3] %v4372_v2  ;;  %432 = vst [vmem:[#allocation2 + $0x198] sm:$0xff] %v4372_v2  ;;  %3847 = vmatpush3.bf16.msra.mxu0 %v4297_v55  ;;  %4280 = vmatpush3.bf16.msra.mxu1 %v4297_v55  ;;  %v357_v46 = vmax.f32 %v4614_v36, 0.0  ;;  %v358_v47 = vmax.f32 %v4617_v38, 0.0  ;;  %v292_v59 = vmul.f32 %v4447_v7, %v256_v44  ;;  %v4312_v36 = vld [vmem:[%s5652_s2 + $0x88] sm:$0xff]  }
  0x26   : > { %433 = vst [vmem:[#allocation2 + $0x1a0] sm:$0xff] %v4372_v2  ;;  %434 = vst [vmem:[#allocation2 + $0x1a8] sm:$0x3] %v4372_v2  ;;  %v354_v2 = vmax.f32 %v4532_v58, 0.0  ;;  %3848 = vmatprep.subr.bf16.mxu0 %v4542_v0  ;;  %4273 = vmatprep.subr.bf16.mxu1 %v4542_v0  ;;  %v373_v55 = vmax.f32 %v4623_v42, 0.0  ;;  %v308_v54 = vmul.f32 %v4447_v7, %v272_v51  ;;  %v4306_v58 = vld [vmem:[%s5652_s2 + $0xa0] sm:$0xff]  }
  0x27   : > { %450 = vst [vmem:[#allocation2 + $0xc1] sm:$0xff] %v363_v29  ;;  %451 = vst [vmem:[#allocation2 + $0xc9] sm:$0xff] %v364_v30  ;;  %v4593_v29 = vpack.c.bf16 %v350_v33, %v349_v32  ;;  %v4598_v30 = vadd.f32 %v4452_v9, %v303_v18  ;;  %v4682_v53 = vadd.f32 %v4452_v9, %v292_v59  ;;  %v4304_v18 = vld [vmem:[%s5652_s2 + $0xa8] sm:$0xff]  }
  0x28   : > { %436 = vst [vmem:[#allocation2 + $0x19] sm:$0xff] %v349_v32  ;;  %437 = vst [vmem:[#allocation2 + $0x21] sm:$0xff] %v350_v33  ;;  %v355_v32 = vmax.f32 %v4581_v21, 0.0  ;;  %v356_v33 = vmax.f32 %v4584_v22, 0.0  ;;  %v294_v10 = vmul.f32 %v4447_v7, %v258_v63  ;;  %v309_v12 = vmul.f32 %v4447_v7, %v273_v48  ;;  %v4309_v22 = vld [vmem:[%s5652_s2 + $0x10] sm:$0xff]  }
  0x29   : > { %452 = vst [vmem:[#allocation2 + $0xd9] sm:$0xff] %v365_v34  ;;  %453 = vst [vmem:[#allocation2 + $0xe1] sm:$0xff] %v366_v37  ;;  %v371_v39 = vmax.f32 %v4598_v30, 0.0  ;;  %3849 = vmatpush3.bf16.msra.mxu0 %v4542_v0  ;;  %4281 = vmatpush3.bf16.msra.mxu1 %v4542_v0  ;;  %v4650_v34 = vpack.c.bf16 %v352_v60, %v351_v56  ;;  %v4657_v37 = vadd.f32 %v4452_v9, %v306_v41  ;;  %v4310_v30 = vld [vmem:[%s5652_s2 + $0x90] sm:$0xff]   ;;  %v4373_v48 = vmov 0.0|0.0  }
  0x2a   : > { %438 = vst [vmem:[#allocation2 + $0x31] sm:$0xff] %v351_v56  ;;  %439 = vst [vmem:[#allocation2 + $0x39] sm:$0xff] %v352_v60  ;;  %3882 = vmatprep.subr.bf16.mxu1 %v4299_v25  ;;  %3930 = vmatprep.subr.bf16.mxu0 %v4300_v26  ;;  %v574_v56 = vpack.c.bf16 %v368_v62, %v367_v61  ;;  %v4675_v60 = vadd.f32 %v4452_v9, %v291_v49  ;;  %v360_v13 = vmax.f32 %v4682_v53, 0.0  ;;  %v1016_v42 = vld [vmem:[#allocation2 + $0xa] sm:$0xff] }
  0x2b   : > { %454 = vst [vmem:[#allocation2 + $0xf1] sm:$0xff] %v367_v61  ;;  %455 = vst [vmem:[#allocation2 + $0xf9] sm:$0xff] %v368_v62  ;;  %v307_v0 = vmul.f32 %v4447_v7, %v271_v50  ;;  %v374_v4 = vmax.f32 %v4657_v37, 0.0  ;;  %v293_v61 = vmul.f32 %v4447_v7, %v257_v27  ;;  %v274_v62 = vld [vmem:[%s4437_s29 + $0xe8] sm:$0xff]  ;;  %v344_v14 = vadd.f32 %v4452_v9, %v308_v54  ;;  %v4315_v37 = vld [vmem:[%s5652_s2 + $0xf8] sm:$0xff]  }
  0x2c   : > { %440 = vst [vmem:[#allocation2 + $0x49] sm:$0xff] %v353_v1  ;;  %441 = vst [vmem:[#allocation2 + $0x51] sm:$0xff] %v354_v2  ;;  %3851 = vmatmul.mubr.bf16.vlgmr.msra.gmra.mxu0 %v4593_v29  ;;  %3867 = vmatmul.mubr.bf16.vlgmr.msra.gmra.mxu1 %v573_v45  ;;  %v359_v6 = vmax.f32 %v4675_v60, 0.0  ;;  %v330_v20 = vadd.f32 %v4452_v9, %v294_v10  ;;  %v310_v23 = vmul.f32 %v4447_v7, %v274_v62  ;;  %v4318_v10 = vld [vmem:[%s5652_s2 + $0x130] sm:$0xff]  }
  0x2d   : > { %456 = vst [vmem:[#allocation2 + $0x109] sm:$0xff] %v369_v11  ;;  %457 = vst [vmem:[#allocation2 + $0x111] sm:$0xff] %v370_v17  ;;  %v4690_v8 = vadd.f32 %v4452_v9, %v307_v0  ;;  %3883 = vmatpush3.bf16.msra.mxu1 %v4299_v25  ;;  %3931 = vmatpush3.bf16.msra.mxu0 %v4300_v26  ;;  %v4699_v15 = vadd.f32 %v4452_v9, %v293_v61  ;;  %v376_v25 = vmax.f32 %v344_v14, 0.0 }
  0x2e   : > { %442 = vst [vmem:[#allocation2 + $0x61] sm:$0xff] %v355_v32  ;;  %443 = vst [vmem:[#allocation2 + $0x69] sm:$0xff] %v356_v33  ;;  %3884 = vmatprep.subr.bf16.mxu1 %v4301_v31  ;;  %3932 = vmatprep.subr.bf16.mxu0 %v4302_v52  ;;  %v345_v24 = vadd.f32 %v4452_v9, %v309_v12  ;;  %v4716_v28 = vpack.c.bf16 %v354_v2, %v353_v1  ;;  %v362_v43 = vmax.f32 %v330_v20, 0.0 }
  0x2f   : > { %458 = vst [vmem:[#allocation2 + $0x121] sm:$0xff] %v371_v39  ;;  %459 = vst [vmem:[#allocation2 + $0x129] sm:$0xff] %v372_v40  ;;  %v375_v19 = vmax.f32 %v4690_v8, 0.0  ;;  %3854 = vmatprep.mubr.bf16.mxu0 %v4650_v34  ;;  %3870 = vmatprep.mubr.bf16.mxu1 %v574_v56  ;;  %v361_v26 = vmax.f32 %v4699_v15, 0.0  ;;  %v575_v41 = vpack.c.bf16 %v370_v17, %v369_v11  ;;  %v4308_v11 = vld [vmem:[%s5652_s2 + $0x98] sm:$0xff]   ;;  %v471_v51 = vld [vmem:[#allocation2 + $0x20] sm:$0xff] }
  0x30   : > { %444 = vst [vmem:[#allocation2 + $0x79] sm:$0xff] %v357_v46  ;;  %445 = vst [vmem:[#allocation2 + $0x81] sm:$0xff] %v358_v47  ;;  %v346_v44 = vadd.f32 %v4452_v9, %v310_v23  ;;  %v377_v45 = vmax.f32 %v345_v24, 0.0  ;;  %v4734_v2 = vpack.c.bf16 %v356_v33, %v355_v32  ;;  %v4740_v3 = vpack.c.bf16 %v372_v40, %v371_v39  ;;  %v4311_v33 = vld [vmem:[%s5652_s2 + $0x8] sm:$0xff]   ;;  %v470_v50 = vld [vmem:[#allocation2 + $0x18] sm:$0xff] }
  0x31   : > { %460 = vst [vmem:[#allocation2 + $0x139] sm:$0xff] %v373_v55  ;;  %461 = vst [vmem:[#allocation2 + $0x141] sm:$0xff] %v374_v4  ;;  %3885 = vmatpush3.bf16.msra.mxu1 %v4301_v31  ;;  %3933 = vmatpush3.bf16.msra.mxu0 %v4302_v52  ;;  %v4755_v17 = vpack.c.bf16 %v358_v47, %v357_v46  ;;  %v4761_v21 = vpack.c.bf16 %v374_v4, %v373_v55  ;;  %v1015_v40 = vld [vmem:[#allocation2 + $0x2] sm:$0xff]  ;;  %v1017_v27 = vld [vmem:[#allocation2 + $0x1a] sm:$0xff] }
  0x32   : > { %446 = vst [vmem:[#allocation2 + $0x91] sm:$0xff] %v359_v6  ;;  %447 = vst [vmem:[#allocation2 + $0x99] sm:$0xff] %v360_v13  ;;  %3886 = vmatprep.subr.bf16.mxu1 %v4303_v16  ;;  %3934 = vmatprep.subr.bf16.mxu0 %v4304_v18  ;;  %v378_v1 = vmax.f32 %v346_v44, 0.0  ;;  %v4769_v35 = vpack.c.bf16 %v360_v13, %v359_v6  ;;  %v4771_v32 = vpack.c.bf16 %v376_v25, %v375_v19  ;;  %v4313_v46 = vld [vmem:[%s5652_s2] sm:$0xff]   ;;  %v4316_v55 = vld [vmem:[%s5652_s2 + $0x138] sm:$0xff]  }
  0x33   : > { %462 = vst [vmem:[#allocation2 + $0x151] sm:$0xff] %v375_v19  ;;  %463 = vst [vmem:[#allocation2 + $0x159] sm:$0xff] %v376_v25  ;;  %v4783_v38 = vpack.c.bf16 %v362_v43, %v361_v26  ;;  %v4314_v47 = vld [vmem:[%s5652_s2 + $0x80] sm:$0xff]   ;;  %v1047_v49 = vpack.c.bf16 %v1016_v42, %v1015_v40  ;;  %v472_v59 = vld [vmem:[#allocation2 + $0x30] sm:$0xff]  ;;  %v4801_v60 = vpack.c.bf16 %v471_v51, %v470_v50 }
  0x34   : > { %448 = vst [vmem:[#allocation2 + $0xa9] sm:$0xff] %v361_v26  ;;  %449 = vst [vmem:[#allocation2 + $0xb1] sm:$0xff] %v362_v43  ;;  %3855 = vmatmul.mubr.bf16.gmra.mxu0 %v4716_v28  ;;  %3871 = vmatmul.mubr.bf16.gmra.mxu1 %v575_v41  ;;  %v4785_v39 = vpack.c.bf16 %v378_v1, %v377_v45  ;;  %v1018_v31 = vld [vmem:[#allocation2 + $0x22] sm:$0xff]  ;;  %v473_v63 = vld [vmem:[#allocation2 + $0x38] sm:$0xff] }
  0x35   : > { %464 = vst [vmem:[#allocation2 + $0x169] sm:$0xff] %v377_v45  ;;  %465 = vst [vmem:[#allocation2 + $0x171] sm:$0xff] %v378_v1  ;;  %3887 = vmatpush3.bf16.msra.mxu1 %v4303_v16  ;;  %3935 = vmatpush3.bf16.msra.mxu0 %v4304_v18  ;;  %v1019_v52 = vld [vmem:[#allocation2 + $0x32] sm:$0xff]  ;;  %v1020_v56 = vld [vmem:[#allocation2 + $0x3a] sm:$0xff]  ;;  %v4803_v0 = vpack.c.bf16 %v1018_v31, %v1017_v27  ;;  %v4805_v4 = vpack.c.bf16 %v473_v63, %v472_v59 }
  0x36   : > { %3888 = vmatprep.subr.bf16.mxu1 %v4305_v57  ;;  %3936 = vmatprep.subr.bf16.mxu0 %v4306_v58  ;;  %v4807_v53 = vpack.c.bf16 %v1020_v56, %v1019_v52  ;;  %v474_v54 = vld [vmem:[#allocation2 + $0x48] sm:$0xff]  ;;  %v475_v61 = vld [vmem:[#allocation2 + $0x50] sm:$0xff]  ;;  %v476_v12 = vld [vmem:[#allocation2 + $0x60] sm:$0xff] }
  0x37   : > { %3858 = vmatprep.mubr.bf16.mxu0 %v4734_v2  ;;  %3874 = vmatprep.mubr.bf16.mxu1 %v4740_v3  ;;  %v1021_v62 = vld [vmem:[#allocation2 + $0x4a] sm:$0xff]  ;;  %v1022_v6 = vld [vmem:[#allocation2 + $0x52] sm:$0xff]  ;;  %v1023_v14 = vld [vmem:[#allocation2 + $0x62] sm:$0xff]  ;;  %v4825_v19 = vpack.c.bf16 %v475_v61, %v474_v54 }
  0x38   : > { %v4317_v8 = vld [vmem:[%s5652_s2 + $0xf0] sm:$0xff]   ;;  %v477_v13 = vld [vmem:[#allocation2 + $0x68] sm:$0xff]  ;;  %v4827_v20 = vpack.c.bf16 %v1022_v6, %v1021_v62  ;;  %v4321_v25 = vld [vmem:[%s5652_s2 + $0xe0] sm:$0xff]  }
  0x39   : > { %3889 = vmatpush3.bf16.msra.mxu1 %v4305_v57  ;;  %3937 = vmatpush3.bf16.msra.mxu0 %v4306_v58  ;;  %v1024_v15 = vld [vmem:[#allocation2 + $0x6a] sm:$0xff]  ;;  %v4829_v23 = vpack.c.bf16 %v477_v13, %v476_v12  ;;  %v478_v26 = vld [vmem:[#allocation2 + $0x78] sm:$0xff]  ;;  %v479_v41 = vld [vmem:[#allocation2 + $0x80] sm:$0xff] }
  0x3a   : > { %3890 = vmatprep.subr.bf16.mxu1 %v4307_v5  ;;  %3938 = vmatprep.subr.bf16.mxu0 %v4308_v11  ;;  %v4319_v16 = vld [vmem:[%s5652_s2 + $0xe8] sm:$0xff]   ;;  %v4831_v24 = vpack.c.bf16 %v1024_v15, %v1023_v14  ;;  %v1025_v43 = vld [vmem:[#allocation2 + $0x7a] sm:$0xff]  ;;  %v480_v57 = vld [vmem:[#allocation2 + $0x90] sm:$0xff] }
  0x3b   : > { %v4320_v18 = vld [vmem:[%s5652_s2 + $0x128] sm:$0xff]   ;;  %v4322_v45 = vld [vmem:[%s5652_s2 + $0x120] sm:$0xff]   ;;  %v481_v58 = vld [vmem:[#allocation2 + $0x98] sm:$0xff] }
  0x3c   : > { %3859 = vmatmul.mubr.bf16.gmra.mxu0 %v4755_v17  ;;  %3875 = vmatmul.mubr.bf16.gmra.mxu1 %v4761_v21  ;;  %v1026_v44 = vld [vmem:[#allocation2 + $0x82] sm:$0xff]  ;;  %v1027_v1 = vld [vmem:[#allocation2 + $0x92] sm:$0xff] }
  0x3d   : > { %3891 = vmatpush3.bf16.msra.mxu1 %v4307_v5  ;;  %3939 = vmatpush3.bf16.msra.mxu0 %v4308_v11  ;;  %v1028_v5 = vld [vmem:[#allocation2 + $0x9a] sm:$0xff]  ;;  %v482_v42 = vld [vmem:[#allocation2 + $0xa8] sm:$0xff]  ;;  %v4326_v50 = vld [vmem:[%s5652_s2 + $0x110] sm:$0xff]  }
  0x3e   : > { %3892 = vmatprep.subr.bf16.mxu1 %v4309_v22  ;;  %3940 = vmatprep.subr.bf16.mxu0 %v4310_v30  ;;  %v4323_v11 = vld [vmem:[%s5652_s2 + $0xd8] sm:$0xff]   ;;  %v4855_v40 = vpack.c.bf16 %v1028_v5, %v1027_v1  ;;  %v484_v27 = vld [vmem:[#allocation2 + $0xc0] sm:$0xff]  ;;  %v485_v31 = vld [vmem:[#allocation2 + $0xc8] sm:$0xff] }
  0x3f   : > { %3862 = vmatprep.mubr.bf16.mxu0 %v4769_v35  ;;  %3878 = vmatprep.mubr.bf16.mxu1 %v4771_v32  ;;  %v1030_v51 = vld [vmem:[#allocation2 + $0xb2] sm:$0xff]  ;;  %v4327_v59 = vld [vmem:[%s5652_s2 + $0xc8] sm:$0xff]   ;;  %v4877_v56 = vpack.c.bf16 %v485_v31, %v484_v27  ;;  %v4329_v61 = vld [vmem:[%s5652_s2 + $0xc0] sm:$0xff]  }
  0x40   : > { %v4328_v63 = vld [vmem:[%s5652_s2 + $0x108] sm:$0xff]   ;;  %v486_v62 = vld [vmem:[#allocation2 + $0xd8] sm:$0xff]  ;;  %v487_v6 = vld [vmem:[#allocation2 + $0xe0] sm:$0xff] }
  0x41   : > { %3893 = vmatpush3.bf16.msra.mxu1 %v4309_v22  ;;  %3941 = vmatpush3.bf16.msra.mxu0 %v4310_v30  ;;  %v4324_v22 = vld [vmem:[%s5652_s2 + $0x118] sm:$0xff]   ;;  %v4849_v30 = vpack.c.bf16 %v479_v41, %v478_v26  ;;  %v4330_v12 = vld [vmem:[%s5652_s2 + $0x100] sm:$0xff]   ;;  %v275_v13 = vld [vmem:[%s4437_s29 + $0xf0] sm:$0xff] }
  0x42   : > { %3894 = vmatprep.subr.bf16.mxu1 %v4311_v33  ;;  %3942 = vmatprep.subr.bf16.mxu0 %v4312_v36  ;;  %v488_v14 = vld [vmem:[#allocation2 + $0xf0] sm:$0xff]  ;;  %v489_v15 = vld [vmem:[#allocation2 + $0xf8] sm:$0xff]  ;;  %v1039_v27 = vld [vmem:[#allocation2 + $0x122] sm:$0xff] }
  0x43   : > { %v1036_v26 = vld [vmem:[#allocation2 + $0xfa] sm:$0xff]  ;;  %v4911_v5 = vpack.c.bf16 %v489_v15, %v488_v14  ;;  %v1040_v31 = vld [vmem:[#allocation2 + $0x12a] sm:$0xff] }
  0x44   : > { %3863 = vmatmul.mubr.bf16.gmra.mxu0 %v4783_v38  ;;  %3879 = vmatmul.mubr.bf16.gmra.mxu1 %v4785_v39  ;;  %v1044_v14 = vld [vmem:[#allocation2 + $0x15a] sm:$0xff] }
  0x45   : > { %3895 = vmatpush3.bf16.msra.mxu1 %v4311_v33  ;;  %3943 = vmatpush3.bf16.msra.mxu0 %v4312_v36  ;;  %v4851_v33 = vpack.c.bf16 %v1026_v44, %v1025_v43  ;;  %v4853_v36 = vpack.c.bf16 %v481_v58, %v480_v57  ;;  %v4898_v43 = vld [vmem:[%s5652_s2 + $0x178] sm:$0xff]   ;;  %v4907_v58 = vpack.c.bf16 %v487_v6, %v486_v62  ;;  %v495_v62 = vld [vmem:[#allocation2 + $0x140] sm:$0xff] }
  0x46   : > { %3896 = vmatprep.subr.bf16.mxu1 %v4313_v46  ;;  %3944 = vmatprep.subr.bf16.mxu0 %v4314_v47  ;;  %v1041_v6 = vld [vmem:[#allocation2 + $0x13a] sm:$0xff] }
  0x47   : > { %3898 = vmatprep.mubr.bf16.mxu1 %v4373_v48  ;;  %3946 = vmatprep.mubr.bf16.mxu0 %v1047_v49  ;;  %v4325_v49 = vld [vmem:[%s5652_s2 + $0xd0] sm:$0xff]  }
  0x49   : > { %3897 = vmatpush3.bf16.msra.mxu1 %v4313_v46  ;;  %3945 = vmatpush3.bf16.msra.mxu0 %v4314_v47  ;;  %v483_v46 = vld [vmem:[#allocation2 + $0xb0] sm:$0xff] }
  0x4a   : > { %3978 = vmatprep.subr.bf16.mxu1 %v4315_v37  ;;  %4026 = vmatprep.subr.bf16.mxu0 %v4316_v55  ;;  %v1029_v47 = vld [vmem:[#allocation2 + $0xaa] sm:$0xff]  ;;  %v4873_v48 = vpack.c.bf16 %v483_v46, %v482_v42 }
  0x4b   : > { %v4875_v52 = vpack.c.bf16 %v1030_v51, %v1029_v47  ;;  %v490_v42 = vld [vmem:[#allocation2 + $0x108] sm:$0xff]  ;;  %v491_v46 = vld [vmem:[#allocation2 + $0x110] sm:$0xff] }
  0x4c   : > { %3899 = vmatmul.mubr.bf16.vlgmr.msra.gmra.mxu1 %v4801_v60  ;;  %3947 = vmatmul.mubr.bf16.vlgmr.msra.gmra.mxu0 %v4803_v0  ;;  %v1037_v47 = vld [vmem:[#allocation2 + $0x10a] sm:$0xff] }
  0x4d   : > { %3979 = vmatpush3.bf16.msra.mxu1 %v4315_v37  ;;  %4027 = vmatpush3.bf16.msra.mxu0 %v4316_v55  ;;  %v1031_v37 = vld [vmem:[#allocation2 + $0xc2] sm:$0xff]  ;;  %v1032_v55 = vld [vmem:[#allocation2 + $0xca] sm:$0xff] }
  0x4e   : > { %3902 = vmatprep.mubr.bf16.mxu1 %v4805_v4  ;;  %3950 = vmatprep.mubr.bf16.mxu0 %v4807_v53  ;;  %v4879_v54 = vpack.c.bf16 %v1032_v55, %v1031_v37  ;;  %v493_v51 = vld [vmem:[#allocation2 + $0x128] sm:$0xff]  ;;  %v4923_v37 = vpack.c.bf16 %v491_v46, %v490_v42  ;;  %v4333_v42 = vld [vmem:[%s5652_s2 + $0x170] sm:$0xff]  }
  0x4f   : > { %3980 = vmatprep.subr.bf16.mxu1 %v4317_v8  ;;  %4028 = vmatprep.subr.bf16.mxu0 %v4318_v10  ;;  %v4334_v46 = vld [vmem:[%s5652_s2 + $0x1b0] sm:$0xff]  }
  0x51   : > { %3981 = vmatpush3.bf16.msra.mxu1 %v4317_v8  ;;  %4029 = vmatpush3.bf16.msra.mxu0 %v4318_v10  ;;  %v1033_v8 = vld [vmem:[#allocation2 + $0xda] sm:$0xff]  ;;  %v1034_v10 = vld [vmem:[#allocation2 + $0xe2] sm:$0xff] }
  0x52   : > { %3982 = vmatprep.subr.bf16.mxu1 %v4319_v16  ;;  %4030 = vmatprep.subr.bf16.mxu0 %v4320_v18 }
  0x54   : > { %3903 = vmatmul.mubr.bf16.gmra.mxu1 %v4825_v19  ;;  %3951 = vmatmul.mubr.bf16.gmra.mxu0 %v4827_v20 }
  0x55   : > { %3906 = vmatprep.mubr.bf16.mxu1 %v4829_v23  ;;  %3954 = vmatprep.mubr.bf16.mxu0 %v4831_v24 }
  0x56   : > { %3983 = vmatpush3.bf16.msra.mxu1 %v4319_v16  ;;  %4031 = vmatpush3.bf16.msra.mxu0 %v4320_v18  ;;  %v1035_v16 = vld [vmem:[#allocation2 + $0xf2] sm:$0xff] }
  0x57   : > { %3984 = vmatprep.subr.bf16.mxu1 %v4321_v25  ;;  %4032 = vmatprep.subr.bf16.mxu0 %v4322_v45  ;;  %v276_v18 = vld [vmem:[%s4437_s29 + $0xf8] sm:$0xff]  ;;  %s238_s29 = scalar_lea.vmem %s5654_s4, %s5739_s19 }
  0x58   : > { %v312_v41 = vmul.f32 %v4447_v7, %v276_v18 }
  0x5a   : > { %3985 = vmatpush3.bf16.msra.mxu1 %v4321_v25  ;;  %4033 = vmatpush3.bf16.msra.mxu0 %v4322_v45  ;;  %v311_v25 = vmul.f32 %v4447_v7, %v275_v13  ;;  %v4904_v45 = vld [vmem:[%s5652_s2 + $0x1b8] sm:$0xff]   ;;  %v348_v57 = vadd.f32 %v4452_v9, %v312_v41  ;;  %v4909_v7 = vpack.c.bf16 %v1034_v10, %v1033_v8  ;;  %v1042_v8 = vld [vmem:[#allocation2 + $0x142] sm:$0xff]  ;;  %v496_v10 = vld [vmem:[#allocation2 + $0x150] sm:$0xff] }
  0x5b   : > { %3986 = vmatprep.subr.bf16.mxu1 %v4323_v11  ;;  %4034 = vmatprep.subr.bf16.mxu0 %v4324_v22  ;;  %v1043_v13 = vld [vmem:[#allocation2 + $0x152] sm:$0xff] }
  0x5c   : > { %3907 = vmatmul.mubr.bf16.gmra.mxu1 %v4849_v30  ;;  %3955 = vmatmul.mubr.bf16.gmra.mxu0 %v4851_v33  ;;  %v347_v44 = vadd.f32 %v4452_v9, %v311_v25  ;;  %v4941_v25 = vpack.c.bf16 %v1044_v14, %v1043_v13  ;;  %v499_v41 = vld [vmem:[#allocation2 + $0x170] sm:$0xff]  ;;  %v4347_v13 = vld [vmem:[%s5652_s2 + $0x1f8] sm:$0xff]  }
  0x5d   : > { %3910 = vmatprep.mubr.bf16.mxu1 %v4853_v36  ;;  %3958 = vmatprep.mubr.bf16.mxu0 %v4855_v40  ;;  %v4348_v14 = vld [vmem:[%s5652_s2 + $0x238] sm:$0xff]  }
  0x5e   : > { %3987 = vmatpush3.bf16.msra.mxu1 %v4323_v11  ;;  %4035 = vmatpush3.bf16.msra.mxu0 %v4324_v22  ;;  %v379_v1 = vmax.f32 %v347_v44, 0.0  ;;  %v4913_v11 = vpack.c.bf16 %v1036_v26, %v1035_v16  ;;  %v380_v22 = vmax.f32 %v348_v57, 0.0  ;;  %v4937_v16 = vpack.c.bf16 %v1042_v8, %v1041_v6  ;;  %v498_v26 = vld [vmem:[#allocation2 + $0x168] sm:$0xff]  ;;  %v1046_v57 = vld [vmem:[#allocation2 + $0x172] sm:$0xff] }
  0x5f   : > { %3988 = vmatprep.subr.bf16.mxu1 %v4325_v49  ;;  %4036 = vmatprep.subr.bf16.mxu0 %v4326_v50  ;;  %v1045_v44 = vld [vmem:[#allocation2 + $0x16a] sm:$0xff]  ;;  %v1646_v8 = vld [vmem:[#allocation2 + $0xf9] sm:$0xff] }
  0x60   : > { %466 = vst [vmem:[#allocation2 + $0x181] sm:$0xff] %v379_v1  ;;  %467 = vst [vmem:[#allocation2 + $0x189] sm:$0xff] %v380_v22  ;;  %v4917_v9 = vpack.c.bf16 %v380_v22, %v379_v1  ;;  %v4947_v1 = vpack.c.bf16 %v499_v41, %v498_v26  ;;  %v4949_v22 = vpack.c.bf16 %v1046_v57, %v1045_v44  ;;  %v1645_v6 = vld [vmem:[#allocation2 + $0xf1] sm:$0xff] }
  0x61   : > { %v5025_v26 = vpack.c.bf16 %v1646_v8, %v1645_v6  ;;  %v2548_v8 = vld [vmem:[#allocation2 + $0x49] sm:$0xff] }
  0x62   : > { %3989 = vmatpush3.bf16.msra.mxu1 %v4325_v49  ;;  %4037 = vmatpush3.bf16.msra.mxu0 %v4326_v50  ;;  %v1038_v49 = vld [vmem:[#allocation2 + $0x112] sm:$0xff]  ;;  %v492_v50 = vld [vmem:[#allocation2 + $0x120] sm:$0xff] }
  0x63   : > { %3990 = vmatprep.subr.bf16.mxu1 %v4327_v59  ;;  %4038 = vmatprep.subr.bf16.mxu0 %v4328_v63  ;;  %v4925_v55 = vpack.c.bf16 %v1038_v49, %v1037_v47  ;;  %v1641_v47 = vld [vmem:[#allocation2 + $0xc1] sm:$0xff]  ;;  %v1642_v49 = vld [vmem:[#allocation2 + $0xc9] sm:$0xff] }
  0x64   : > { %3911 = vmatmul.mubr.bf16.gmra.mxu1 %v4873_v48  ;;  %3959 = vmatmul.mubr.bf16.gmra.mxu0 %v4875_v52 }
  0x65   : > { %3914 = vmatprep.mubr.bf16.mxu1 %v4877_v56  ;;  %3962 = vmatprep.mubr.bf16.mxu0 %v4879_v54 }
  0x66   : > { %3991 = vmatpush3.bf16.msra.mxu1 %v4327_v59  ;;  %4039 = vmatpush3.bf16.msra.mxu0 %v4328_v63  ;;  %v4927_v59 = vpack.c.bf16 %v493_v51, %v492_v50  ;;  %v4929_v63 = vpack.c.bf16 %v1040_v31, %v1039_v27  ;;  %v1643_v50 = vld [vmem:[#allocation2 + $0xd9] sm:$0xff]  ;;  %v1644_v51 = vld [vmem:[#allocation2 + $0xe1] sm:$0xff]  ;;  %v5005_v31 = vpack.c.bf16 %v1642_v49, %v1641_v47 }
  0x67   : > { %3992 = vmatprep.subr.bf16.mxu1 %v4329_v61  ;;  %4040 = vmatprep.subr.bf16.mxu0 %v4330_v12  ;;  %v4343_v27 = vld [vmem:[%s5652_s2 + $0x148] sm:$0xff]   ;;  %v1351_v44 = vld [vmem:[#allocation2 + $0x180] sm:$0xff] }
  0x68   : > { %v1352_v57 = vld [vmem:[#allocation2 + $0x188] sm:$0xff]  ;;  %v2853_v47 = vld [vmem:[#allocation2 + $0x3a] sm:$0xff] }
  0x6a   : > { %3993 = vmatpush3.bf16.msra.mxu1 %v4329_v61  ;;  %4041 = vmatpush3.bf16.msra.mxu0 %v4330_v12  ;;  %v494_v61 = vld [vmem:[#allocation2 + $0x138] sm:$0xff] }
  0x6b   : > { %4074 = vmatprep.subr.bf16.mxu1 %v4898_v43  ;;  %4122 = vmatprep.subr.bf16.mxu0 %v4904_v45  ;;  %v497_v12 = vld [vmem:[#allocation2 + $0x158] sm:$0xff]  ;;  %v4935_v15 = vpack.c.bf16 %v495_v62, %v494_v61  ;;  %v5007_v61 = vpack.c.bf16 %v1644_v51, %v1643_v50  ;;  %v4346_v62 = vld [vmem:[%s5652_s2 + $0x180] sm:$0xff]  }
  0x6c   : > { %3915 = vmatmul.mubr.bf16.gmra.mxu1 %v4907_v58  ;;  %3963 = vmatmul.mubr.bf16.gmra.mxu0 %v4909_v7  ;;  %v4939_v18 = vpack.c.bf16 %v497_v12, %v496_v10  ;;  %v1647_v10 = vld [vmem:[#allocation2 + $0x109] sm:$0xff]  ;;  %v1648_v12 = vld [vmem:[#allocation2 + $0x111] sm:$0xff] }
  0x6d   : > { %3918 = vmatprep.mubr.bf16.mxu1 %v4911_v5  ;;  %3966 = vmatprep.mubr.bf16.mxu0 %v4913_v11  ;;  %v5027_v41 = vpack.c.bf16 %v1648_v12, %v1647_v10  ;;  %v2549_v10 = vld [vmem:[#allocation2 + $0x51] sm:$0xff] }
  0x6e   : > { %v2854_v12 = vld [vmem:[#allocation2 + $0x4a] sm:$0xff] }
  0x74   : > { %3919 = vmatmul.mubr.bf16.gmra.mxu1 %v4923_v37  ;;  %3967 = vmatmul.mubr.bf16.gmra.mxu0 %v4925_v55 }
  0x75   : > { %3922 = vmatprep.mubr.bf16.mxu1 %v4927_v59  ;;  %3970 = vmatprep.mubr.bf16.mxu0 %v4929_v63 }
  0x7c   : > { %3923 = vmatmul.mubr.bf16.gmra.mxu1 %v4935_v15  ;;  %3971 = vmatmul.mubr.bf16.gmra.mxu0 %v4937_v16 }
  0x7d   : > { %3926 = vmatprep.mubr.bf16.mxu1 %v4939_v18  ;;  %3974 = vmatprep.mubr.bf16.mxu0 %v4941_v25 }
  0x84   : > { %3927 = vmatmul.mubr.bf16.gmra.mxu1 %v4947_v1  ;;  %3975 = vmatmul.mubr.bf16.gmra.mxu0 %v4949_v22 }
  0x85   : > { %3994 = vmatprep.mubr.bf16.mxu1 %v4801_v60  ;;  %4042 = vmatprep.mubr.bf16.mxu0 %v4593_v29  ;;  %v4335_v29 = vld [vmem:[%s5652_s2 + $0x168] sm:$0xff]  }
  0x86   : > { %v4336_v60 = vld [vmem:[%s5652_s2 + $0x1a8] sm:$0xff]  }
  0x8c   : > { %3995 = vmatmul.mubr.bf16.vlgmr.msra.gmra.mxu1 %v4805_v4  ;;  %4043 = vmatmul.mubr.bf16.vlgmr.msra.gmra.mxu0 %v4650_v34  ;;  %v4337_v34 = vld [vmem:[%s5652_s2 + $0x160] sm:$0xff]  }
  0x8d   : > { %4075 = vmatpush3.bf16.msra.mxu1 %v4898_v43  ;;  %4123 = vmatpush3.bf16.msra.mxu0 %v4904_v45  ;;  %v4339_v43 = vld [vmem:[%s5652_s2 + $0x158] sm:$0xff]  }
  0x8e   : > { %3998 = vmatprep.mubr.bf16.mxu1 %v4825_v19  ;;  %4046 = vmatprep.mubr.bf16.mxu0 %v4716_v28  ;;  %v4338_v28 = vld [vmem:[%s5652_s2 + $0x1a0] sm:$0xff]   ;;  %v4340_v45 = vld [vmem:[%s5652_s2 + $0x198] sm:$0xff]  }
  0x8f   : > { %4076 = vmatprep.subr.bf16.mxu1 %v4333_v42  ;;  %4124 = vmatprep.subr.bf16.mxu0 %v4334_v46 }
  0x91   : > { %4077 = vmatpush3.bf16.msra.mxu1 %v4333_v42  ;;  %4125 = vmatpush3.bf16.msra.mxu0 %v4334_v46  ;;  %v5041_v42 = vpack.c.bf16 %v1352_v57, %v1351_v44 }
  0x92   : > { %4078 = vmatprep.subr.bf16.mxu1 %v4335_v29  ;;  %4126 = vmatprep.subr.bf16.mxu0 %v4336_v60 }
  0x94   : > { %3999 = vmatmul.mubr.bf16.gmra.mxu1 %v4829_v23  ;;  %4047 = vmatmul.mubr.bf16.gmra.mxu0 %v4734_v2  ;;  %v4341_v2 = vld [vmem:[%s5652_s2 + $0x150] sm:$0xff]  }
  0x95   : > { %4002 = vmatprep.mubr.bf16.mxu1 %v4849_v30  ;;  %4050 = vmatprep.mubr.bf16.mxu0 %v4755_v17  ;;  %v4342_v17 = vld [vmem:[%s5652_s2 + $0x190] sm:$0xff]  }
  0x96   : > { %4079 = vmatpush3.bf16.msra.mxu1 %v4335_v29  ;;  %4127 = vmatpush3.bf16.msra.mxu0 %v4336_v60 }
  0x97   : > { %4080 = vmatprep.subr.bf16.mxu1 %v4337_v34  ;;  %4128 = vmatprep.subr.bf16.mxu0 %v4338_v28 }
  0x9a   : > { %4081 = vmatpush3.bf16.msra.mxu1 %v4337_v34  ;;  %4129 = vmatpush3.bf16.msra.mxu0 %v4338_v28 }
  0x9b   : > { %4082 = vmatprep.subr.bf16.mxu1 %v4339_v43  ;;  %4130 = vmatprep.subr.bf16.mxu0 %v4340_v45 }
  0x9c   : > { %4003 = vmatmul.mubr.bf16.gmra.mxu1 %v4853_v36  ;;  %4051 = vmatmul.mubr.bf16.gmra.mxu0 %v4769_v35  ;;  %v4344_v35 = vld [vmem:[%s5652_s2 + $0x188] sm:$0xff]  }
  0x9d   : > { %4006 = vmatprep.mubr.bf16.mxu1 %v4873_v48  ;;  %4054 = vmatprep.mubr.bf16.mxu0 %v4783_v38  ;;  %v4345_v38 = vld [vmem:[%s5652_s2 + $0x140] sm:$0xff]  }
  0x9e   : > { %4083 = vmatpush3.bf16.msra.mxu1 %v4339_v43  ;;  %4131 = vmatpush3.bf16.msra.mxu0 %v4340_v45 }
  0x9f   : > { %4084 = vmatprep.subr.bf16.mxu1 %v4341_v2  ;;  %4132 = vmatprep.subr.bf16.mxu0 %v4342_v17 }
  0xa2   : > { %4085 = vmatpush3.bf16.msra.mxu1 %v4341_v2  ;;  %4133 = vmatpush3.bf16.msra.mxu0 %v4342_v17  ;;  %v2547_v2 = vld [vmem:[#allocation2 + $0x39] sm:$0xff] }
  0xa3   : > { %4086 = vmatprep.subr.bf16.mxu1 %v4343_v27  ;;  %4134 = vmatprep.subr.bf16.mxu0 %v4344_v35  ;;  %v2852_v17 = vld [vmem:[#allocation2 + $0x32] sm:$0xff] }
  0xa4   : > { %4007 = vmatmul.mubr.bf16.gmra.mxu1 %v4877_v56  ;;  %4055 = vmatmul.mubr.bf16.gmra.mxu0 %v5005_v31 }
  0xa5   : > { %4010 = vmatprep.mubr.bf16.mxu1 %v4907_v58  ;;  %4058 = vmatprep.mubr.bf16.mxu0 %v5007_v61 }
  0xa6   : > { %4087 = vmatpush3.bf16.msra.mxu1 %v4343_v27  ;;  %4135 = vmatpush3.bf16.msra.mxu0 %v4344_v35  ;;  %v2884_v27 = vpack.c.bf16 %v2853_v47, %v2852_v17 }
  0xa7   : > { %4088 = vmatprep.subr.bf16.mxu1 %v4345_v38  ;;  %4136 = vmatprep.subr.bf16.mxu0 %v4346_v62 }
  0xaa   : > { %4089 = vmatpush3.bf16.msra.mxu1 %v4345_v38  ;;  %4137 = vmatpush3.bf16.msra.mxu0 %v4346_v62 }
  0xab   : > { %4170 = vmatprep.subr.bf16.mxu1 %v4347_v13  ;;  %4218 = vmatprep.subr.bf16.mxu0 %v4348_v14 }
  0xac   : > { %4011 = vmatmul.mubr.bf16.gmra.mxu1 %v4911_v5  ;;  %4059 = vmatmul.mubr.bf16.gmra.mxu0 %v5025_v26 }
  0xad   : > { %4014 = vmatprep.mubr.bf16.mxu1 %v4923_v37  ;;  %4062 = vmatprep.mubr.bf16.mxu0 %v5027_v41 }
  0xb4   : > { %4015 = vmatmul.mubr.bf16.gmra.mxu1 %v4927_v59  ;;  %4063 = vmatmul.mubr.bf16.gmra.mxu0 %v4740_v3  ;;  %v4349_v3 = vld [vmem:[%s5652_s2 + $0x1f0] sm:$0xff]  }
  0xb5   : > { %4018 = vmatprep.mubr.bf16.mxu1 %v4935_v15  ;;  %4066 = vmatprep.mubr.bf16.mxu0 %v4761_v21  ;;  %v4350_v21 = vld [vmem:[%s5652_s2 + $0x230] sm:$0xff]  }
  0xbc   : > { %4019 = vmatmul.mubr.bf16.gmra.mxu1 %v4939_v18  ;;  %4067 = vmatmul.mubr.bf16.gmra.mxu0 %v4771_v32  ;;  %v4351_v32 = vld [vmem:[%s5652_s2 + $0x1e8] sm:$0xff]  }
  0xbd   : > { %4022 = vmatprep.mubr.bf16.mxu1 %v4947_v1  ;;  %4070 = vmatprep.mubr.bf16.mxu0 %v4785_v39  ;;  %v4352_v39 = vld [vmem:[%s5652_s2 + $0x228] sm:$0xff]  }
  0xc4   : > { %4023 = vmatmul.mubr.bf16.gmra.mxu1 %v5041_v42  ;;  %4071 = vmatmul.mubr.bf16.gmra.mxu0 %v4917_v9 }
  0xc5   : > { %4090 = vmatprep.mubr.bf16.mxu1 %v4803_v0  ;;  %4138 = vmatprep.mubr.bf16.mxu0 %v4805_v4  ;;  %v4353_v0 = vld [vmem:[%s5652_s2 + $0x1e0] sm:$0xff]  }
  0xc6   : > { %v4354_v4 = vld [vmem:[%s5652_s2 + $0x220] sm:$0xff]  }
  0xcc   : > { %4091 = vmatmul.mubr.bf16.vlgmr.msra.gmra.mxu1 %v4807_v53  ;;  %4139 = vmatmul.mubr.bf16.vlgmr.msra.gmra.mxu0 %v4825_v19  ;;  %v4355_v53 = vld [vmem:[%s5652_s2 + $0x1d8] sm:$0xff]  }
  0xcd   : > { %4171 = vmatpush3.bf16.msra.mxu1 %v4347_v13  ;;  %4219 = vmatpush3.bf16.msra.mxu0 %v4348_v14  ;;  %v4356_v19 = vld [vmem:[%s5652_s2 + $0x218] sm:$0xff]   ;;  %v2550_v14 = vld [vmem:[#allocation2 + $0x61] sm:$0xff] }
  0xce   : > { %4094 = vmatprep.mubr.bf16.mxu1 %v4827_v20  ;;  %4142 = vmatprep.mubr.bf16.mxu0 %v4829_v23  ;;  %v4357_v20 = vld [vmem:[%s5652_s2 + $0x1d0] sm:$0xff]  }
  0xcf   : > { %4172 = vmatprep.subr.bf16.mxu1 %v4349_v3  ;;  %4220 = vmatprep.subr.bf16.mxu0 %v4350_v21  ;;  %v4358_v23 = vld [vmem:[%s5652_s2 + $0x210] sm:$0xff]  }
  0xd0   : > { %v2855_v13 = vld [vmem:[#allocation2 + $0x52] sm:$0xff] }
  0xd1   : > { %4173 = vmatpush3.bf16.msra.mxu1 %v4349_v3  ;;  %4221 = vmatpush3.bf16.msra.mxu0 %v4350_v21  ;;  %v2856_v3 = vld [vmem:[#allocation2 + $0x62] sm:$0xff]  ;;  %v2857_v21 = vld [vmem:[#allocation2 + $0x6a] sm:$0xff] }
  0xd2   : > { %4174 = vmatprep.subr.bf16.mxu1 %v4351_v32  ;;  %4222 = vmatprep.subr.bf16.mxu0 %v4352_v39 }
  0xd4   : > { %4095 = vmatmul.mubr.bf16.gmra.mxu1 %v4831_v24  ;;  %4143 = vmatmul.mubr.bf16.gmra.mxu0 %v4849_v30  ;;  %v4359_v24 = vld [vmem:[%s5652_s2 + $0x1c8] sm:$0xff]  }
  0xd5   : > { %4098 = vmatprep.mubr.bf16.mxu1 %v4851_v33  ;;  %4146 = vmatprep.mubr.bf16.mxu0 %v4853_v36  ;;  %v4360_v30 = vld [vmem:[%s5652_s2 + $0x208] sm:$0xff]   ;;  %v4361_v33 = vld [vmem:[%s5652_s2 + $0x1c0] sm:$0xff]  }
  0xd6   : > { %4175 = vmatpush3.bf16.msra.mxu1 %v4351_v32  ;;  %4223 = vmatpush3.bf16.msra.mxu0 %v4352_v39  ;;  %v4362_v36 = vld [vmem:[%s5652_s2 + $0x200] sm:$0xff]  }
  0xd7   : > { %4176 = vmatprep.subr.bf16.mxu1 %v4353_v0  ;;  %4224 = vmatprep.subr.bf16.mxu0 %v4354_v4 }
  0xda   : > { %4177 = vmatpush3.bf16.msra.mxu1 %v4353_v0  ;;  %4225 = vmatpush3.bf16.msra.mxu0 %v4354_v4  ;;  %v2579_v0 = vpack.c.bf16 %v2549_v10, %v2548_v8  ;;  %v2885_v4 = vpack.c.bf16 %v2855_v13, %v2854_v12 }
  0xdb   : > { %4178 = vmatprep.subr.bf16.mxu1 %v4355_v53  ;;  %4226 = vmatprep.subr.bf16.mxu0 %v4356_v19 }
  0xdc   : > { %4099 = vmatmul.mubr.bf16.gmra.mxu1 %v4855_v40  ;;  %4147 = vmatmul.mubr.bf16.gmra.mxu0 %v4873_v48 }
  0xdd   : > { %4102 = vmatprep.mubr.bf16.mxu1 %v4875_v52  ;;  %4150 = vmatprep.mubr.bf16.mxu0 %v4877_v56 }
  0xde   : > { %4179 = vmatpush3.bf16.msra.mxu1 %v4355_v53  ;;  %4227 = vmatpush3.bf16.msra.mxu0 %v4356_v19  ;;  %v2886_v19 = vpack.c.bf16 %v2857_v21, %v2856_v3 }
  0xdf   : > { %4180 = vmatprep.subr.bf16.mxu1 %v4357_v20  ;;  %4228 = vmatprep.subr.bf16.mxu0 %v4358_v23 }
  0xe2   : > { %4181 = vmatpush3.bf16.msra.mxu1 %v4357_v20  ;;  %4229 = vmatpush3.bf16.msra.mxu0 %v4358_v23 }
  0xe3   : > { %4182 = vmatprep.subr.bf16.mxu1 %v4359_v24  ;;  %4230 = vmatprep.subr.bf16.mxu0 %v4360_v30 }
  0xe4   : > { %4103 = vmatmul.mubr.bf16.gmra.mxu1 %v4879_v54  ;;  %4151 = vmatmul.mubr.bf16.gmra.mxu0 %v4907_v58 }
  0xe5   : > { %4106 = vmatprep.mubr.bf16.mxu1 %v4909_v7  ;;  %4154 = vmatprep.mubr.bf16.mxu0 %v4911_v5 }
  0xe6   : > { %4183 = vmatpush3.bf16.msra.mxu1 %v4359_v24  ;;  %4231 = vmatpush3.bf16.msra.mxu0 %v4360_v30 }
  0xe7   : > { %4184 = vmatprep.subr.bf16.mxu1 %v4361_v33  ;;  %4232 = vmatprep.subr.bf16.mxu0 %v4362_v36 }
  0xea   : > { %4185 = vmatpush3.bf16.msra.mxu1 %v4361_v33  ;;  %4233 = vmatpush3.bf16.msra.mxu0 %v4362_v36  ;;  %v2552_v33 = vld [vmem:[#allocation2 + $0x79] sm:$0xff]  ;;  %v2553_v36 = vld [vmem:[#allocation2 + $0x81] sm:$0xff] }
  0xeb   : > { %v2581_v13 = vpack.c.bf16 %v2553_v36, %v2552_v33  ;;  %v2862_v36 = vld [vmem:[#allocation2 + $0xaa] sm:$0xff] }
  0xec   : > { %v5105_v40 = vpop.f32.mrf.mxu0  ;;  %v5107_v48 = vpop.f32.mrf.mxu1  ;;  %4107 = vmatmul.mubr.bf16.gmra.mxu1 %v4913_v11  ;;  %4155 = vmatmul.mubr.bf16.gmra.mxu0 %v4923_v37 }
  0xed   : > { %4110 = vmatprep.mubr.bf16.mxu1 %v4925_v55  ;;  %4158 = vmatprep.mubr.bf16.mxu0 %v4927_v59 }
  0xee   : > { %v5113_v52 = vpop.f32.mrf.mxu0  ;;  %v5115_v56 = vpop.f32.mrf.mxu1 }
  0xf0   : > { %v5117_v54 = vpop.f32.mrf.mxu0  ;;  %v5119_v58 = vpop.f32.mrf.mxu1 }
  0xf2   : > { %v5121_v7 = vpop.f32.mrf.mxu0  ;;  %v5123_v5 = vpop.f32.mrf.mxu1 }
  0xf4   : > { %v5125_v46 = vpop.f32.mrf.mxu0  ;;  %v5127_v11 = vpop.f32.mrf.mxu1  ;;  %4111 = vmatmul.mubr.bf16.gmra.mxu1 %v4929_v63  ;;  %4159 = vmatmul.mubr.bf16.gmra.mxu0 %v4935_v15  ;;  %v1963_v15 = vld [vmem:[#allocation2 + $0x182] sm:$0xff] }
  0xf5   : > { %4114 = vmatprep.mubr.bf16.mxu1 %v4937_v16  ;;  %4162 = vmatprep.mubr.bf16.mxu0 %v4939_v18  ;;  %v1964_v16 = vld [vmem:[#allocation2 + $0x18a] sm:$0xff] }
  0xf6   : > { %v5133_v37 = vpop.f32.mrf.mxu0  ;;  %v5135_v55 = vpop.f32.mrf.mxu1  ;;  %v2546_v18 = vld [vmem:[#allocation2 + $0x31] sm:$0xff] }
  0xf7   : > { %v2578_v51 = vpack.c.bf16 %v2547_v2, %v2546_v18  ;;  %v2859_v18 = vld [vmem:[#allocation2 + $0x82] sm:$0xff]  ;;  %v2554_v2 = vld [vmem:[#allocation2 + $0x91] sm:$0xff] }
  0xf8   : > { %v5137_v59 = vpop.f32.mrf.mxu0  ;;  %v5139_v29 = vpop.f32.mrf.mxu1 }
  0xfa   : > { %v5141_v60 = vpop.f32.mrf.mxu0  ;;  %v5143_v34 = vpop.f32.mrf.mxu1 }
  0xfc   : > { %v5145_v28 = vpop.f32.mrf.mxu0  ;;  %v5147_v63 = vpop.f32.mrf.mxu1  ;;  %4115 = vmatmul.mubr.bf16.gmra.mxu1 %v4941_v25  ;;  %4163 = vmatmul.mubr.bf16.gmra.mxu0 %v4947_v1  ;;  %v5161_v25 = vpack.c.bf16 %v1964_v16, %v1963_v15  ;;  %v4363_v1 = vld [vmem:[#allocation2] sm:$0xff] }
  0xfd   : > { %4118 = vmatprep.mubr.bf16.mxu1 %v4949_v22  ;;  %4166 = vmatprep.mubr.bf16.mxu0 %v5041_v42  ;;  %v2287_v22 = vpack.c.bf16 %v4363_v1, %v4363_v1  ;;  %v2551_v42 = vld [vmem:[#allocation2 + $0x69] sm:$0xff]  ;;  %v2858_v16 = vld [vmem:[#allocation2 + $0x7a] sm:$0xff] }
  0xfe   : > { %v5153_v43 = vpop.f32.mrf.mxu0  ;;  %v5155_v45 = vpop.f32.mrf.mxu1  ;;  %v2580_v53 = vpack.c.bf16 %v2551_v42, %v2550_v14  ;;  %v2555_v1 = vld [vmem:[#allocation2 + $0x99] sm:$0xff]  ;;  %v2887_v14 = vpack.c.bf16 %v2859_v18, %v2858_v16 }
  0xff   : > { %v2582_v3 = vpack.c.bf16 %v2555_v1, %v2554_v2  ;;  %v2863_v16 = vld [vmem:[#allocation2 + $0xb2] sm:$0xff] }
 0x100   : > { %v5157_v49 = vpop.f32.mrf.mxu0  ;;  %v5159_v50 = vpop.f32.mrf.mxu1 }
 0x102   : > { %v5163_v35 = vpop.f32.mrf.mxu0  ;;  %v5165_v38 = vpop.f32.mrf.mxu1 }
 0x104   : > { %v5167_v62 = vpop.f32.mrf.mxu0  ;;  %v5169_v6 = vpop.f32.mrf.mxu1  ;;  %4119 = vmatmul.mubr.bf16.gmra.mxu1 %v5161_v25  ;;  %4167 = vmatmul.mubr.bf16.gmra.mxu0 %v2287_v22  ;;  %v2860_v22 = vld [vmem:[#allocation2 + $0x92] sm:$0xff] }
 0x105   : > { %4186 = vmatprep.mubr.bf16.mxu1 %v2578_v51  ;;  %4234 = vmatprep.mubr.bf16.mxu0 %v2884_v27  ;;  %v2861_v51 = vld [vmem:[#allocation2 + $0x9a] sm:$0xff] }
 0x106   : > { %v5172_v44 = vpop.f32.mrf.mxu0  ;;  %v5174_v57 = vpop.f32.mrf.mxu1  ;;  %v2888_v21 = vpack.c.bf16 %v2861_v51, %v2860_v22 }
 0x108   : > { %v5176_v32 = vpop.f32.mrf.mxu0  ;;  %v5178_v39 = vpop.f32.mrf.mxu1 }
 0x10a   : > { %v5180_v20 = vpop.f32.mrf.mxu0  ;;  %v5182_v23 = vpop.f32.mrf.mxu1 }
 0x10c   : > { %v3900_v24 = vpop.f32.mrf.mxu1  ;;  %v3948_v30 = vpop.f32.mrf.mxu0  ;;  %4187 = vmatmul.mubr.bf16.vlgmr.msra.gmra.mxu1 %v2579_v0  ;;  %4235 = vmatmul.mubr.bf16.vlgmr.msra.gmra.mxu0 %v2885_v4 }
 0x10d   : > { %v897_v15 = vadd.f32 %v3900_v24, %v5105_v40  ;;  %4190 = vmatprep.mubr.bf16.mxu1 %v2580_v53  ;;  %4238 = vmatprep.mubr.bf16.mxu0 %v2886_v19 }
 0x10e   : > { %v888_v17 = vpop.f32.mrf.mxu1  ;;  %v1162_v47 = vpop.f32.mrf.mxu0 }
 0x10f   : > { %v5185_v27 = vadd.f32 %v3948_v30, %v897_v15  ;;  %v889_v8 = vadd.f32 %v888_v17, %v5113_v52  ;;  %v2556_v52 = vld [vmem:[#allocation2 + $0xa9] sm:$0xff] }
 0x110   : > { %v3901_v10 = vpop.f32.mrf.mxu1  ;;  %v3949_v12 = vpop.f32.mrf.mxu0  ;;  %v2864_v17 = vld [vmem:[#allocation2 + $0xc2] sm:$0xff] }
 0x111   : > { %v5188_v42 = vadd.f32 %v1162_v47, %v889_v8  ;;  %v900_v40 = vadd.f32 %v3901_v10, %v5117_v54  ;;  %v2557_v54 = vld [vmem:[#allocation2 + $0xb1] sm:$0xff]  ;;  %v2889_v10 = vpack.c.bf16 %v2863_v16, %v2862_v36 }
 0x112   : > { %v891_v0 = vpop.f32.mrf.mxu1  ;;  %v1165_v4 = vpop.f32.mrf.mxu0  ;;  %v2865_v47 = vld [vmem:[#allocation2 + $0xca] sm:$0xff]  ;;  %v2583_v8 = vpack.c.bf16 %v2557_v54, %v2556_v52  ;;  %v2869_v54 = vld [vmem:[#allocation2 + $0xfa] sm:$0xff] }
 0x113   : > { %v5191_v53 = vadd.f32 %v3949_v12, %v900_v40  ;;  %v892_v19 = vadd.f32 %v891_v0, %v5121_v7 }
 0x114   : > { %v3904_v24 = vpop.f32.mrf.mxu1  ;;  %v3952_v30 = vpop.f32.mrf.mxu0  ;;  %4191 = vmatmul.mubr.bf16.gmra.mxu1 %v2581_v13  ;;  %4239 = vmatmul.mubr.bf16.gmra.mxu0 %v2887_v14  ;;  %v2890_v13 = vpack.c.bf16 %v2865_v47, %v2864_v17 }
 0x115   : > { %v5194_v15 = vadd.f32 %v1165_v4, %v892_v19  ;;  %v913_v33 = vadd.f32 %v3904_v24, %v5125_v46  ;;  %4194 = vmatprep.mubr.bf16.mxu1 %v2582_v3  ;;  %4242 = vmatprep.mubr.bf16.mxu0 %v2888_v21  ;;  %v2866_v24 = vld [vmem:[#allocation2 + $0xda] sm:$0xff] }
 0x116   : > { %v904_v18 = vpop.f32.mrf.mxu1  ;;  %v1178_v2 = vpop.f32.mrf.mxu0 }
 0x117   : > { %v5197_v1 = vadd.f32 %v3952_v30, %v913_v33  ;;  %v905_v7 = vadd.f32 %v904_v18, %v5133_v37  ;;  %v2868_v33 = vld [vmem:[#allocation2 + $0xf2] sm:$0xff] }
 0x118   : > { %v3905_v22 = vpop.f32.mrf.mxu1  ;;  %v3953_v51 = vpop.f32.mrf.mxu0  ;;  %v2892_v47 = vpack.c.bf16 %v2869_v54, %v2868_v33 }
 0x119   : > { %v5200_v12 = vadd.f32 %v1178_v2, %v905_v7  ;;  %v916_v46 = vadd.f32 %v3905_v22, %v5137_v59  ;;  %v2867_v59 = vld [vmem:[#allocation2 + $0xe2] sm:$0xff] }
 0x11a   : > { %v907_v14 = vpop.f32.mrf.mxu1  ;;  %v1181_v40 = vpop.f32.mrf.mxu0  ;;  %v2891_v2 = vpack.c.bf16 %v2867_v59, %v2866_v24 }
 0x11b   : > { %v5203_v3 = vadd.f32 %v3953_v51, %v916_v46  ;;  %v908_v21 = vadd.f32 %v907_v14, %v5141_v60  ;;  %v2566_v14 = vld [vmem:[#allocation2 + $0x121] sm:$0xff] }
 0x11c   : > { %v3908_v0 = vpop.f32.mrf.mxu1  ;;  %v3956_v4 = vpop.f32.mrf.mxu0  ;;  %4195 = vmatmul.mubr.bf16.gmra.mxu1 %v2583_v8  ;;  %4243 = vmatmul.mubr.bf16.gmra.mxu0 %v2889_v10 }
 0x11d   : > { %v5206_v37 = vadd.f32 %v1181_v40, %v908_v21  ;;  %v929_v19 = vadd.f32 %v3908_v0, %v5145_v28  ;;  %4198 = vmatprep.mubr.bf16.mxu1 %v5005_v31  ;;  %4246 = vmatprep.mubr.bf16.mxu0 %v2890_v13  ;;  %v2871_v13 = vld [vmem:[#allocation2 + $0x112] sm:$0xff]  ;;  %v2567_v0 = vld [vmem:[#allocation2 + $0x129] sm:$0xff] }
 0x11e   : > { %v920_v30 = vpop.f32.mrf.mxu1  ;;  %v1194_v52 = vpop.f32.mrf.mxu0 }
 0x11f   : > { %v5210_v36 = vadd.f32 %v3956_v4, %v929_v19  ;;  %v921_v60 = vadd.f32 %v920_v30, %v5153_v43  ;;  %v2872_v4 = vld [vmem:[#allocation2 + $0x122] sm:$0xff] }
 0x120   : > { %v3909_v16 = vpop.f32.mrf.mxu1  ;;  %v3957_v18 = vpop.f32.mrf.mxu0 }
 0x121   : > { %v5213_v17 = vadd.f32 %v1194_v52, %v921_v60  ;;  %v932_v28 = vadd.f32 %v3909_v16, %v5157_v49  ;;  %v2870_v49 = vld [vmem:[#allocation2 + $0x10a] sm:$0xff] }
 0x122   : > { %v923_v31 = vpop.f32.mrf.mxu1  ;;  %v1197_v7 = vpop.f32.mrf.mxu0  ;;  %v2893_v30 = vpack.c.bf16 %v2871_v13, %v2870_v49  ;;  %v2571_v49 = vld [vmem:[#allocation2 + $0x159] sm:$0xff] }
 0x123   : > { %v5216_v22 = vadd.f32 %v3957_v18, %v932_v28  ;;  %v924_v51 = vadd.f32 %v923_v31, %v5163_v35  ;;  %v2873_v35 = vld [vmem:[#allocation2 + $0x12a] sm:$0xff]  ;;  %v2877_v13 = vld [vmem:[#allocation2 + $0x15a] sm:$0xff] }
 0x124   : > { %v3912_v8 = vpop.f32.mrf.mxu1  ;;  %v3960_v10 = vpop.f32.mrf.mxu0  ;;  %4199 = vmatmul.mubr.bf16.gmra.mxu1 %v5007_v61  ;;  %4247 = vmatmul.mubr.bf16.gmra.mxu0 %v2891_v2  ;;  %v2894_v33 = vpack.c.bf16 %v2873_v35, %v2872_v4 }
 0x125   : > { %v5220_v43 = vadd.f32 %v1197_v7, %v924_v51  ;;  %v945_v46 = vadd.f32 %v3912_v8, %v5167_v62  ;;  %4202 = vmatprep.mubr.bf16.mxu1 %v5025_v26  ;;  %4250 = vmatprep.mubr.bf16.mxu0 %v2892_v47  ;;  %v2588_v62 = vpack.c.bf16 %v2567_v0, %v2566_v14  ;;  %v2569_v47 = vld [vmem:[#allocation2 + $0x141] sm:$0xff]  ;;  %v2570_v8 = vld [vmem:[#allocation2 + $0x151] sm:$0xff] }
 0x126   : > { %v936_v40 = vpop.f32.mrf.mxu1  ;;  %v1210_v21 = vpop.f32.mrf.mxu0  ;;  %v2875_v51 = vld [vmem:[#allocation2 + $0x142] sm:$0xff] }
 0x127   : > { %v5224_v19 = vadd.f32 %v3960_v10, %v945_v46  ;;  %v937_v61 = vadd.f32 %v936_v40, %v5172_v44  ;;  %v2568_v44 = vld [vmem:[#allocation2 + $0x139] sm:$0xff] }
 0x128   : > { %v3913_v24 = vpop.f32.mrf.mxu1  ;;  %v3961_v59 = vpop.f32.mrf.mxu0  ;;  %v2589_v0 = vpack.c.bf16 %v2569_v47, %v2568_v44 }
 0x129   : > { %v5227_v52 = vadd.f32 %v1210_v21, %v937_v61  ;;  %v948_v26 = vadd.f32 %v3913_v24, %v5176_v32  ;;  %v2874_v32 = vld [vmem:[#allocation2 + $0x13a] sm:$0xff]  ;;  %v2590_v61 = vpack.c.bf16 %v2571_v49, %v2570_v8 }
 0x12a   : > { %v939_v54 = vpop.f32.mrf.mxu1  ;;  %v1213_v60 = vpop.f32.mrf.mxu0  ;;  %v2895_v4 = vpack.c.bf16 %v2875_v51, %v2874_v32 }
 0x12b   : > { %v5230_v16 = vadd.f32 %v3961_v59, %v948_v26  ;;  %v940_v18 = vadd.f32 %v939_v54, %v5180_v20  ;;  %v2876_v20 = vld [vmem:[#allocation2 + $0x152] sm:$0xff] }
 0x12c   : > { %v3916_v2 = vpop.f32.mrf.mxu1  ;;  %v3964_v28 = vpop.f32.mrf.mxu0  ;;  %4203 = vmatmul.mubr.bf16.gmra.mxu1 %v5027_v41  ;;  %4251 = vmatmul.mubr.bf16.gmra.mxu0 %v2893_v30  ;;  %v2896_v24 = vpack.c.bf16 %v2877_v13, %v2876_v20 }
 0x12d   : > { %v5234_v31 = vadd.f32 %v1213_v60, %v940_v18  ;;  %v961_v7 = vadd.f32 %v3916_v2, %v5107_v48  ;;  %4206 = vmatprep.mubr.bf16.mxu1 %v2588_v62  ;;  %4254 = vmatprep.mubr.bf16.mxu0 %v2894_v33  ;;  %v2878_v2 = vld [vmem:[#allocation2 + $0x16a] sm:$0xff] }
 0x12e   : > { %v952_v10 = vpop.f32.mrf.mxu1  ;;  %v1226_v46 = vpop.f32.mrf.mxu0 }
 0x12f   : > { %v5237_v14 = vadd.f32 %v3964_v28, %v961_v7  ;;  %v953_v41 = vadd.f32 %v952_v10, %v5115_v56  ;;  %v2572_v56 = vld [vmem:[#allocation2 + $0x169] sm:$0xff]  ;;  %v2879_v28 = vld [vmem:[#allocation2 + $0x172] sm:$0xff] }
 0x130   : > { %v3917_v40 = vpop.f32.mrf.mxu1  ;;  %v3965_v21 = vpop.f32.mrf.mxu0  ;;  %v2897_v10 = vpack.c.bf16 %v2879_v28, %v2878_v2 }
 0x131   : > { %v5240_v35 = vadd.f32 %v1226_v46, %v953_v41  ;;  %v964_v48 = vadd.f32 %v3917_v40, %v5119_v58  ;;  %v2573_v58 = vld [vmem:[#allocation2 + $0x171] sm:$0xff] }
 0x132   : > { %v955_v59 = vpop.f32.mrf.mxu1  ;;  %v1229_v30 = vpop.f32.mrf.mxu0  ;;  %v2591_v8 = vpack.c.bf16 %v2573_v58, %v2572_v56 }
 0x133   : > { %v5243_v26 = vadd.f32 %v3965_v21, %v964_v48  ;;  %v956_v62 = vadd.f32 %v955_v59, %v5123_v5  ;;  %v2882_v48 = vld [vmem:[#allocation2 + $0x19a] sm:$0xff] }
 0x134   : > { %v3920_v33 = vpop.f32.mrf.mxu1  ;;  %v3968_v54 = vpop.f32.mrf.mxu0  ;;  %4207 = vmatmul.mubr.bf16.gmra.mxu1 %v2589_v0  ;;  %4255 = vmatmul.mubr.bf16.gmra.mxu0 %v2895_v4  ;;  %v2576_v0 = vld [vmem:[#allocation2 + $0x199] sm:$0xff] }
 0x135   : > { %v5246_v60 = vadd.f32 %v1229_v30, %v956_v62  ;;  %v977_v18 = vadd.f32 %v3920_v33, %v5127_v11  ;;  %4210 = vmatprep.mubr.bf16.mxu1 %v2590_v61  ;;  %4258 = vmatprep.mubr.bf16.mxu0 %v2896_v24  ;;  %v2883_v61 = vld [vmem:[#allocation2 + $0x1a2] sm:$0xff] }
 0x136   : > { %v968_v44 = vpop.f32.mrf.mxu1  ;;  %v1242_v47 = vpop.f32.mrf.mxu0  ;;  %v2899_v56 = vpack.c.bf16 %v2883_v61, %v2882_v48 }
 0x137   : > { %v5249_v7 = vadd.f32 %v3968_v54, %v977_v18  ;;  %v969_v5 = vadd.f32 %v968_v44, %v5135_v55 }
 0x138   : > { %v3921_v32 = vpop.f32.mrf.mxu1  ;;  %v3969_v51 = vpop.f32.mrf.mxu0 }
 0x139   : > { %v5252_v46 = vadd.f32 %v1242_v47, %v969_v5  ;;  %v980_v49 = vadd.f32 %v3921_v32, %v5139_v29  ;;  %v2577_v29 = vld [vmem:[#allocation2 + $0x1a1] sm:$0xff] }
 0x13a   : > { %v971_v11 = vpop.f32.mrf.mxu1  ;;  %v1245_v20 = vpop.f32.mrf.mxu0  ;;  %v2593_v54 = vpack.c.bf16 %v2577_v29, %v2576_v0 }
 0x13b   : > { %v5255_v13 = vadd.f32 %v3969_v51, %v980_v49  ;;  %v972_v41 = vadd.f32 %v971_v11, %v5143_v34 }
 0x13c   : > { %v3924_v40 = vpop.f32.mrf.mxu1  ;;  %v3972_v21 = vpop.f32.mrf.mxu0  ;;  %4211 = vmatmul.mubr.bf16.gmra.mxu1 %v2591_v8  ;;  %4259 = vmatmul.mubr.bf16.gmra.mxu0 %v2897_v10 }
 0x13d   : > { %v5258_v55 = vadd.f32 %v1245_v20, %v972_v41  ;;  %v993_v4 = vadd.f32 %v3924_v40, %v5147_v63  ;;  %4214 = vmatprep.mubr.bf16.mxu1 %v4917_v9  ;;  %4262 = vmatprep.mubr.bf16.mxu0 %v5161_v25 }
 0x13e   : > { %v984_v24 = vpop.f32.mrf.mxu1  ;;  %v1258_v59 = vpop.f32.mrf.mxu0 }
 0x13f   : > { %v5263_v30 = vadd.f32 %v3972_v21, %v993_v4  ;;  %v985_v34 = vadd.f32 %v984_v24, %v5155_v45 }
 0x140   : > { %v3925_v62 = vpop.f32.mrf.mxu1  ;;  %v3973_v33 = vpop.f32.mrf.mxu0 }
 0x141   : > { %v5266_v18 = vadd.f32 %v1258_v59, %v985_v34  ;;  %v996_v63 = vadd.f32 %v3925_v62, %v5159_v50 }
 0x142   : > { %v987_v9 = vpop.f32.mrf.mxu1  ;;  %v1261_v58 = vpop.f32.mrf.mxu0 }
 0x143   : > { %v5269_v25 = vadd.f32 %v3973_v33, %v996_v63  ;;  %v988_v2 = vadd.f32 %v987_v9, %v5165_v38 }
 0x144   : > { %v3928_v28 = vpop.f32.mrf.mxu1  ;;  %v3976_v44 = vpop.f32.mrf.mxu0  ;;  %4215 = vmatmul.mubr.bf16.gmra.mxu1 %v2593_v54  ;;  %4263 = vmatmul.mubr.bf16.gmra.mxu0 %v2899_v56 }
 0x145   : > { %v5272_v47 = vadd.f32 %v1261_v58, %v988_v2  ;;  %v1009_v45 = vadd.f32 %v3928_v28, %v5169_v6 }
 0x146   : > { %v1000_v5 = vpop.f32.mrf.mxu1  ;;  %v1274_v32 = vpop.f32.mrf.mxu0 }
 0x147   : > { %v5275_v51 = vadd.f32 %v3976_v44, %v1009_v45  ;;  %v1001_v50 = vadd.f32 %v1000_v5, %v5174_v57 }
 0x148   : > { %v3929_v8 = vpop.f32.mrf.mxu1  ;;  %v3977_v10 = vpop.f32.mrf.mxu0 }
 0x149   : > { %v5278_v49 = vadd.f32 %v1274_v32, %v1001_v50  ;;  %v1012_v38 = vadd.f32 %v3929_v8, %v5178_v39 }
 0x14a   : > { %v1003_v11 = vpop.f32.mrf.mxu1  ;;  %v1277_v20 = vpop.f32.mrf.mxu0 }
 0x14b   : > { %v5281_v41 = vadd.f32 %v3977_v10, %v1012_v38  ;;  %v1004_v40 = vadd.f32 %v1003_v11, %v5182_v23 }
 0x14c   : > { %v3996_v21 = vpop.f32.mrf.mxu1  ;;  %v4044_v6 = vpop.f32.mrf.mxu0 }
 0x14d   : > { %v5284_v0 = vadd.f32 %v1277_v20, %v1004_v40  ;;  %v1597_v4 = vadd.f32 %v3996_v21, %v5185_v27 }
 0x14e   : > { %v1468_v29 = vpop.f32.mrf.mxu1  ;;  %v1774_v57 = vpop.f32.mrf.mxu0 }
 0x14f   : > { %v5287_v48 = vadd.f32 %v4044_v6, %v1597_v4  ;;  %v1595_v61 = vadd.f32 %v1468_v29, %v5188_v42 }
 0x150   : > { %v3997_v24 = vpop.f32.mrf.mxu1  ;;  %v4045_v39 = vpop.f32.mrf.mxu0 }
 0x151   : > { %v5290_v59 = vadd.f32 %v1774_v57, %v1595_v61  ;;  %v1598_v34 = vadd.f32 %v3997_v24, %v5191_v53 }
 0x152   : > { %v1471_v62 = vpop.f32.mrf.mxu1  ;;  %v1777_v23 = vpop.f32.mrf.mxu0 }
 0x153   : > { %v5293_v33 = vadd.f32 %v4045_v39, %v1598_v34  ;;  %v1596_v54 = vadd.f32 %v1471_v62, %v5194_v15 }
 0x154   : > { %v4000_v56 = vpop.f32.mrf.mxu1  ;;  %v4048_v27 = vpop.f32.mrf.mxu0 }
 0x155   : > { %v5296_v63 = vadd.f32 %v1777_v23, %v1596_v54  ;;  %v1601_v9 = vadd.f32 %v4000_v56, %v5197_v1 }
 0x156   : > { %v1484_v58 = vpop.f32.mrf.mxu1  ;;  %v1790_v42 = vpop.f32.mrf.mxu0 }
 0x157   : > { %v5299_v2 = vadd.f32 %v4048_v27, %v1601_v9  ;;  %v1599_v28 = vadd.f32 %v1484_v58, %v5200_v12 }
 0x158   : > { %v4001_v44 = vpop.f32.mrf.mxu1  ;;  %v4049_v53 = vpop.f32.mrf.mxu0 }
 0x159   : > { %v5302_v45 = vadd.f32 %v1790_v42, %v1599_v28  ;;  %v1602_v5 = vadd.f32 %v4001_v44, %v5203_v3 }
 0x15a   : > { %v1487_v32 = vpop.f32.mrf.mxu1  ;;  %v1793_v15 = vpop.f32.mrf.mxu0 }
 0x15b   : > { %v5305_v50 = vadd.f32 %v4049_v53, %v1602_v5  ;;  %v1600_v8 = vadd.f32 %v1487_v32, %v5206_v37 }
 0x15c   : > { %v4004_v10 = vpop.f32.mrf.mxu1  ;;  %v4052_v1 = vpop.f32.mrf.mxu0 }
 0x15d   : > { %v5308_v38 = vadd.f32 %v1793_v15, %v1600_v8  ;;  %v1605_v11 = vadd.f32 %v4004_v10, %v5210_v36 }
 0x15e   : > { %v1500_v20 = vpop.f32.mrf.mxu1  ;;  %v1806_v12 = vpop.f32.mrf.mxu0 }
 0x15f   : > { %v5311_v40 = vadd.f32 %v4052_v1, %v1605_v11  ;;  %v1603_v21 = vadd.f32 %v1500_v20, %v5213_v17 }
 0x160   : > { %v4005_v6 = vpop.f32.mrf.mxu1  ;;  %v4053_v3 = vpop.f32.mrf.mxu0 }
 0x161   : > { %v5314_v4 = vadd.f32 %v1806_v12, %v1603_v21  ;;  %v1606_v29 = vadd.f32 %v4005_v6, %v5216_v22 }
 0x162   : > { %v1503_v57 = vpop.f32.mrf.mxu1  ;;  %v1809_v37 = vpop.f32.mrf.mxu0 }
 0x163   : > { %v5317_v61 = vadd.f32 %v4053_v3, %v1606_v29  ;;  %v1604_v24 = vadd.f32 %v1503_v57, %v5220_v43 }
 0x164   : > { %v4008_v39 = vpop.f32.mrf.mxu1  ;;  %v4056_v36 = vpop.f32.mrf.mxu0 }
 0x165   : > { %v5320_v34 = vadd.f32 %v1809_v37, %v1604_v24  ;;  %v1609_v62 = vadd.f32 %v4008_v39, %v5224_v19 }
 0x166   : > { %v1516_v23 = vpop.f32.mrf.mxu1  ;;  %v1822_v17 = vpop.f32.mrf.mxu0 }
 0x167   : > { %v5323_v54 = vadd.f32 %v4056_v36, %v1609_v62  ;;  %v1607_v56 = vadd.f32 %v1516_v23, %v5227_v52 }
 0x168   : > { %v4009_v27 = vpop.f32.mrf.mxu1  ;;  %v4057_v22 = vpop.f32.mrf.mxu0 }
 0x169   : > { %v5326_v9 = vadd.f32 %v1822_v17, %v1607_v56  ;;  %v1610_v58 = vadd.f32 %v4009_v27, %v5230_v16 }
 0x16a   : > { %v1519_v42 = vpop.f32.mrf.mxu1  ;;  %v1825_v43 = vpop.f32.mrf.mxu0 }
 0x16b   : > { %v5329_v28 = vadd.f32 %v4057_v22, %v1610_v58  ;;  %v1608_v44 = vadd.f32 %v1519_v42, %v5234_v31 }
 0x16c   : > { %v4012_v53 = vpop.f32.mrf.mxu1  ;;  %v4060_v19 = vpop.f32.mrf.mxu0 }
 0x16d   : > { %v5332_v5 = vadd.f32 %v1825_v43, %v1608_v44  ;;  %v1613_v32 = vadd.f32 %v4012_v53, %v5237_v14 }
 0x16e   : > { %v1532_v15 = vpop.f32.mrf.mxu1  ;;  %v1838_v52 = vpop.f32.mrf.mxu0 }
 0x16f   : > { %v5335_v8 = vadd.f32 %v4060_v19, %v1613_v32  ;;  %v1611_v10 = vadd.f32 %v1532_v15, %v5240_v35 }
 0x170   : > { %v4013_v1 = vpop.f32.mrf.mxu1  ;;  %v4061_v16 = vpop.f32.mrf.mxu0 }
 0x171   : > { %v5338_v11 = vadd.f32 %v1838_v52, %v1611_v10  ;;  %v1614_v20 = vadd.f32 %v4013_v1, %v5243_v26 }
 0x172   : > { %v1535_v12 = vpop.f32.mrf.mxu1  ;;  %v1841_v31 = vpop.f32.mrf.mxu0 }
 0x173   : > { %v5341_v21 = vadd.f32 %v4061_v16, %v1614_v20  ;;  %v1612_v6 = vadd.f32 %v1535_v12, %v5246_v60 }
 0x174   : > { %v4016_v3 = vpop.f32.mrf.mxu1  ;;  %v4064_v14 = vpop.f32.mrf.mxu0 }
 0x175   : > { %5656 = vst [vmem:[#allocation3_spill] sm:$0xff] %v5341_v21  ;;  %v5344_v29 = vadd.f32 %v1841_v31, %v1612_v6  ;;  %v1617_v57 = vadd.f32 %v4016_v3, %v5249_v7 }
 0x176   : > { %v1548_v37 = vpop.f32.mrf.mxu1  ;;  %v1854_v35 = vpop.f32.mrf.mxu0 }
 0x177   : > { %5657 = vst [vmem:[#allocation4_spill] sm:$0xff] %v5344_v29  ;;  %v5347_v24 = vadd.f32 %v4064_v14, %v1617_v57  ;;  %v1615_v39 = vadd.f32 %v1548_v37, %v5252_v46 }
 0x178   : > { %v4017_v36 = vpop.f32.mrf.mxu1  ;;  %v4065_v26 = vpop.f32.mrf.mxu0 }
 0x179   : > { %5658 = vst [vmem:[#allocation5_spill] sm:$0xff] %v5347_v24  ;;  %v5350_v62 = vadd.f32 %v1854_v35, %v1615_v39  ;;  %v1618_v23 = vadd.f32 %v4017_v36, %v5255_v13 }
 0x17a   : > { %v1551_v17 = vpop.f32.mrf.mxu1  ;;  %v1857_v60 = vpop.f32.mrf.mxu0 }
 0x17b   : > { %5659 = vst [vmem:[#allocation6_spill] sm:$0xff] %v5350_v62  ;;  %v5353_v56 = vadd.f32 %v4065_v26, %v1618_v23  ;;  %v1616_v27 = vadd.f32 %v1551_v17, %v5258_v55 }
 0x17c   : > { %v4020_v22 = vpop.f32.mrf.mxu1  ;;  %v4068_v7 = vpop.f32.mrf.mxu0 }
 0x17d   : > { %5660 = vst [vmem:[#allocation7_spill] sm:$0xff] %v5353_v56  ;;  %v5356_v58 = vadd.f32 %v1857_v60, %v1616_v27  ;;  %v1621_v42 = vadd.f32 %v4020_v22, %v5263_v30 }
 0x17e   : > { %v1564_v43 = vpop.f32.mrf.mxu1  ;;  %v1870_v46 = vpop.f32.mrf.mxu0 }
 0x17f   : > { %5661 = vst [vmem:[#allocation8_spill] sm:$0xff] %v5356_v58  ;;  %v5359_v44 = vadd.f32 %v4068_v7, %v1621_v42  ;;  %v1619_v53 = vadd.f32 %v1564_v43, %v5266_v18 }
 0x180   : > { %v4021_v19 = vpop.f32.mrf.mxu1  ;;  %v4069_v13 = vpop.f32.mrf.mxu0 }
 0x181   : > { %5662 = vst [vmem:[#allocation9_spill] sm:$0xff] %v5359_v44  ;;  %v5362_v32 = vadd.f32 %v1870_v46, %v1619_v53  ;;  %v1622_v15 = vadd.f32 %v4021_v19, %v5269_v25 }
 0x182   : > { %v1567_v52 = vpop.f32.mrf.mxu1  ;;  %v1873_v55 = vpop.f32.mrf.mxu0 }
 0x183   : > { %5663 = vst [vmem:[#allocation10_spill] sm:$0xff] %v5362_v32  ;;  %v5365_v10 = vadd.f32 %v4069_v13, %v1622_v15  ;;  %v1620_v1 = vadd.f32 %v1567_v52, %v5272_v47 }
 0x184   : > { %v4024_v16 = vpop.f32.mrf.mxu1  ;;  %v4072_v30 = vpop.f32.mrf.mxu0 }
 0x185   : > { %5664 = vst [vmem:[#allocation11_spill] sm:$0xff] %v5365_v10  ;;  %v5368_v20 = vadd.f32 %v1873_v55, %v1620_v1  ;;  %v1625_v12 = vadd.f32 %v4024_v16, %v5275_v51 }
 0x186   : > { %v1580_v31 = vpop.f32.mrf.mxu1  ;;  %v1886_v18 = vpop.f32.mrf.mxu0 }
 0x187   : > { %5665 = vst [vmem:[#allocation12_spill] sm:$0xff] %v5368_v20  ;;  %v5371_v6 = vadd.f32 %v4072_v30, %v1625_v12  ;;  %v1623_v3 = vadd.f32 %v1580_v31, %v5278_v49 }
 0x188   : > { %v4025_v14 = vpop.f32.mrf.mxu1  ;;  %v4073_v25 = vpop.f32.mrf.mxu0 }
 0x189   : > { %5666 = vst [vmem:[#allocation13_spill] sm:$0xff] %v5371_v6  ;;  %v5374_v57 = vadd.f32 %v1886_v18, %v1623_v3  ;;  %v1626_v37 = vadd.f32 %v4025_v14, %v5281_v41 }
 0x18a   : > { %v1583_v35 = vpop.f32.mrf.mxu1  ;;  %v1889_v47 = vpop.f32.mrf.mxu0 }
 0x18b   : > { %5667 = vst [vmem:[#allocation14_spill] sm:$0xff] %v5374_v57  ;;  %v5377_v39 = vadd.f32 %v4073_v25, %v1626_v37  ;;  %v1624_v36 = vadd.f32 %v1583_v35, %v5284_v0 }
 0x18c   : > { %v4092_v26 = vpop.f32.mrf.mxu1  ;;  %v5380_v51 = vpop.f32.mrf.mxu0 }
 0x18d   : > { %5668 = vst [vmem:[#allocation15_spill] sm:$0xff] %v5377_v39  ;;  %v5382_v23 = vadd.f32 %v1889_v47, %v1624_v36 }
 0x18e   : > { %v2080_v17 = vpop.f32.mrf.mxu1  ;;  %v5384_v60 = vpop.f32.mrf.mxu0 }
 0x18f   : > { %5669 = vst [vmem:[#allocation16_spill] sm:$0xff] %v5382_v23 }
 0x190   : > { %v5386_v49 = vpop.f32.mrf.mxu1  ;;  %v5388_v27 = vpop.f32.mrf.mxu0 }
 0x192   : > { %v5390_v22 = vpop.f32.mrf.mxu1  ;;  %v5392_v41 = vpop.f32.mrf.mxu0 }
 0x194   : > { %v5394_v7 = vpop.f32.mrf.mxu1  ;;  %v5396_v42 = vpop.f32.mrf.mxu0 }
 0x196   : > { %v5398_v0 = vpop.f32.mrf.mxu1  ;;  %v5400_v43 = vpop.f32.mrf.mxu0 }
 0x198   : > { %v5402_v46 = vpop.f32.mrf.mxu1  ;;  %v5404_v53 = vpop.f32.mrf.mxu0 }
 0x19a   : > { %v5406_v19 = vpop.f32.mrf.mxu1  ;;  %v5408_v13 = vpop.f32.mrf.mxu0 }
 0x19c   : > { %v5410_v15 = vpop.f32.mrf.mxu1  ;;  %v5412_v52 = vpop.f32.mrf.mxu0 }
 0x19e   : > { %v5414_v55 = vpop.f32.mrf.mxu1  ;;  %v5416_v1 = vpop.f32.mrf.mxu0 }
 0x1a0   : > { %v5418_v16 = vpop.f32.mrf.mxu1  ;;  %v5420_v30 = vpop.f32.mrf.mxu0 }
 0x1a2   : > { %v5422_v12 = vpop.f32.mrf.mxu1  ;;  %v5424_v31 = vpop.f32.mrf.mxu0 }
 0x1a4   : > { %v5426_v18 = vpop.f32.mrf.mxu1  ;;  %v5428_v3 = vpop.f32.mrf.mxu0 }
 0x1a6   : > { %v5430_v14 = vpop.f32.mrf.mxu1  ;;  %v5432_v25 = vpop.f32.mrf.mxu0 }
 0x1a8   : > { %v5434_v37 = vpop.f32.mrf.mxu1  ;;  %v5436_v35 = vpop.f32.mrf.mxu0 }
 0x1aa   : > { %v5438_v47 = vpop.f32.mrf.mxu1  ;;  %v5440_v36 = vpop.f32.mrf.mxu0 }
 0x1ac   : > { %v5442_v23 = vpop.f32.mrf.mxu1  ;;  %v5444_v39 = vpop.f32.mrf.mxu0 }
 0x1ae   : > { %v5446_v57 = vpop.f32.mrf.mxu1  ;;  %v5448_v6 = vpop.f32.mrf.mxu0 }
 0x1af   : > { %5670 = vst [vmem:[#allocation17_spill] sm:$0xff] %v5448_v6 }
 0x1b0   : > { %v5450_v20 = vpop.f32.mrf.mxu1  ;;  %v5452_v10 = vpop.f32.mrf.mxu0 }
 0x1b1   : > { %5671 = vst [vmem:[#allocation18_spill] sm:$0xff] %v5450_v20  ;;  %5672 = vst [vmem:[#allocation19_spill] sm:$0xff] %v5452_v10 }
 0x1b2   : > { %v5454_v32 = vpop.f32.mrf.mxu1  ;;  %v5456_v44 = vpop.f32.mrf.mxu0 }
 0x1b3   : > { %5673 = vst [vmem:[#allocation20_spill] sm:$0xff] %v5454_v32  ;;  %5674 = vst [vmem:[#allocation21_spill] sm:$0xff] %v5456_v44 }
 0x1b4   : > { %v5458_v58 = vpop.f32.mrf.mxu1  ;;  %v5460_v56 = vpop.f32.mrf.mxu0 }
 0x1b5   : > { %5675 = vst [vmem:[#allocation22_spill] sm:$0xff] %v5458_v58  ;;  %5676 = vst [vmem:[#allocation23_spill] sm:$0xff] %v5460_v56 }
 0x1b6   : > { %v5462_v62 = vpop.f32.mrf.mxu1  ;;  %v5464_v24 = vpop.f32.mrf.mxu0 }
 0x1b7   : > { %5677 = vst [vmem:[#allocation24_spill] sm:$0xff] %v5462_v62  ;;  %5678 = vst [vmem:[#allocation25_spill] sm:$0xff] %v5464_v24 }
 0x1b8   : > { %v5466_v29 = vpop.f32.mrf.mxu1  ;;  %v5468_v21 = vpop.f32.mrf.mxu0 }
 0x1b9   : > { %5679 = vst [vmem:[#allocation26_spill] sm:$0xff] %v5466_v29  ;;  %5680 = vst [vmem:[#allocation27_spill] sm:$0xff] %v5468_v21 }
 0x1ba   : > { %v5470_v6 = vpop.f32.mrf.mxu1  ;;  %v5472_v20 = vpop.f32.mrf.mxu0 }
 0x1bb   : > { %5681 = vst [vmem:[#allocation28_spill] sm:$0xff] %v5470_v6  ;;  %5682 = vst [vmem:[#allocation29_spill] sm:$0xff] %v5472_v20 }
 0x1bc   : > { %v5474_v10 = vpop.f32.mrf.mxu1  ;;  %v5476_v32 = vpop.f32.mrf.mxu0 }
 0x1bd   : > { %5683 = vst [vmem:[#allocation30_spill] sm:$0xff] %v5474_v10  ;;  %5684 = vst [vmem:[#allocation31_spill] sm:$0xff] %v5476_v32 }
 0x1be   : > { %v5478_v44 = vpop.f32.mrf.mxu1  ;;  %v5480_v58 = vpop.f32.mrf.mxu0 }
 0x1bf   : > { %5685 = vst [vmem:[#allocation32_spill] sm:$0xff] %v5478_v44  ;;  %5686 = vst [vmem:[#allocation33_spill] sm:$0xff] %v5480_v58  ;;  %v2209_v44 = vadd.f32 %v4092_v26, %v5287_v48  ;;  %v2208_v48 = vadd.f32 %v5390_v22, %v5296_v63 }
 0x1c0   : > { %v5482_v56 = vpop.f32.mrf.mxu1  ;;  %v5484_v62 = vpop.f32.mrf.mxu0 }
 0x1c1   : > { %5687 = vst [vmem:[#allocation34_spill] sm:$0xff] %v5482_v56  ;;  %5688 = vst [vmem:[#allocation35_spill] sm:$0xff] %v5484_v62  ;;  %v2207_v62 = vadd.f32 %v2080_v17, %v5290_v59 }
 0x1c2   : > { %v5486_v24 = vpop.f32.mrf.mxu1  ;;  %v5488_v29 = vpop.f32.mrf.mxu0 }
 0x1c3   : > { %5689 = vst [vmem:[#allocation36_spill] sm:$0xff] %v5486_v24  ;;  %5690 = vst [vmem:[#allocation37_spill] sm:$0xff] %v5488_v29 }
 0x1c4   : > { %v5490_v21 = vpop.f32.mrf.mxu1  ;;  %v5492_v6 = vpop.f32.mrf.mxu0 }
 0x1c5   : > { %5691 = vst [vmem:[#allocation38_spill] sm:$0xff] %v5490_v21  ;;  %5692 = vst [vmem:[#allocation39_spill] sm:$0xff] %v5492_v6  ;;  %v2516_v21 = vadd.f32 %v5380_v51, %v2209_v44  ;;  %v2210_v6 = vadd.f32 %v5386_v49, %v5293_v33  ;;  %v2213_v51 = vadd.f32 %v5394_v7, %v5299_v2 }
 0x1c6   : > { %v5494_v20 = vpop.f32.mrf.mxu1  ;;  %v5496_v32 = vpop.f32.mrf.mxu0 }
 0x1c7   : > { %5693 = vst [vmem:[#allocation40_spill] sm:$0xff] %v5494_v20  ;;  %5694 = vst [vmem:[#allocation41_spill] sm:$0xff] %v5496_v32  ;;  %v2514_v32 = vadd.f32 %v5384_v60, %v2207_v62  ;;  %v2517_v33 = vadd.f32 %v5388_v27, %v2210_v6  ;;  %v2520_v6 = vadd.f32 %v5396_v42, %v2213_v51 }
 0x1c8   : > { %v5499_v58 = vpop.f32.mrf.mxu1  ;;  %v5501_v56 = vpop.f32.mrf.mxu0  ;;  %v2212_v27 = vadd.f32 %v5406_v19, %v5308_v38  ;;  %v2217_v42 = vadd.f32 %v5410_v15, %v5311_v40 }
 0x1c9   : > { %5695 = vst [vmem:[#allocation42_spill] sm:$0xff] %v5501_v56 }
 0x1ca   : > { %v5504_v24 = vpop.f32.mrf.mxu1  ;;  %v5506_v29 = vpop.f32.mrf.mxu0  ;;  %v2519_v19 = vadd.f32 %v5408_v13, %v2212_v27  ;;  %v2524_v15 = vadd.f32 %v5412_v52, %v2217_v42 }
 0x1cb   : > { %5696 = vst [vmem:[#allocation43_spill] sm:$0xff] %v5506_v29 }
 0x1cc   : > { %v4188_v20 = vpop.f32.mrf.mxu1  ;;  %v4236_v10 = vpop.f32.mrf.mxu0 }
 0x1cd   : > { %v2822_v26 = vadd.f32 %v4188_v20, %v2516_v21  ;;  %v2515_v21 = vadd.f32 %v5392_v41, %v2208_v48  ;;  %v2211_v20 = vadd.f32 %v5398_v0, %v5302_v45 }
 0x1ce   : > { %v2693_v59 = vpop.f32.mrf.mxu1  ;;  %v2999_v44 = vpop.f32.mrf.mxu0 }
 0x1cf   : > { %v3128_v62 = vadd.f32 %v4236_v10, %v2822_v26  ;;  %v2820_v17 = vadd.f32 %v2693_v59, %v2514_v32  ;;  %v2214_v32 = vadd.f32 %v5402_v46, %v5305_v50  ;;  %v2518_v45 = vadd.f32 %v5400_v43, %v2211_v20 }
 0x1d0   : > { %v4189_v60 = vpop.f32.mrf.mxu1  ;;  %v4237_v63 = vpop.f32.mrf.mxu0 }
 0x1d1   : > { %3160 = vst [vmem:[%s5519_s22 + $0x10] sm:$0xff] %v3128_v62  ;;  %v3126_v49 = vadd.f32 %v2999_v44, %v2820_v17  ;;  %v2823_v22 = vadd.f32 %v4189_v60, %v2517_v33  ;;  %v2521_v38 = vadd.f32 %v5404_v53, %v2214_v32  ;;  %v3230_v51 = vmul.f32 %v3128_v62, %v3128_v62 }
 0x1d2   : > { %v2696_v29 = vpop.f32.mrf.mxu1  ;;  %v3002_v56 = vpop.f32.mrf.mxu0 }
 0x1d3   : > { %3158 = vst [vmem:[%s5519_s22] sm:$0xff] %v3126_v49  ;;  %v3129_v2 = vadd.f32 %v4237_v63, %v2823_v22  ;;  %v2821_v10 = vadd.f32 %v2696_v29, %v2515_v21  ;;  %v3228_v26 = vmul.f32 %v3126_v49, %v3126_v49  ;;  %v2215_v63 = vadd.f32 %v5414_v55, %v5314_v4 }
 0x1d4   : > { %v4192_v41 = vpop.f32.mrf.mxu1  ;;  %v4240_v7 = vpop.f32.mrf.mxu0  ;;  %v2218_v21 = vadd.f32 %v5418_v16, %v5317_v61 }
 0x1d5   : > { %3161 = vst [vmem:[%s5519_s22 + $0x18] sm:$0xff] %v3129_v2  ;;  %v3127_v0 = vadd.f32 %v3002_v56, %v2821_v10  ;;  %v2826_v48 = vadd.f32 %v4192_v41, %v2520_v6  ;;  %v3231_v13 = vmul.f32 %v3129_v2, %v3129_v2  ;;  %v2216_v10 = vadd.f32 %v5422_v12, %v5320_v34 }
 0x1d6   : > { %v2709_v59 = vpop.f32.mrf.mxu1  ;;  %v3015_v29 = vpop.f32.mrf.mxu0 }
 0x1d7   : > { %3159 = vst [vmem:[%s5519_s22 + $0x8] sm:$0xff] %v3127_v0  ;;  %v3190_v44 = vadd.f32 %v3127_v0, %v3126_v49  ;;  %v3229_v50 = vmul.f32 %v3127_v0, %v3127_v0  ;;  %v3132_v46 = vadd.f32 %v4240_v7, %v2826_v48  ;;  %v2824_v33 = vadd.f32 %v2709_v59, %v2518_v45 }
 0x1d8   : > { %v4193_v43 = vpop.f32.mrf.mxu1  ;;  %v4241_v56 = vpop.f32.mrf.mxu0  ;;  %v2522_v7 = vadd.f32 %v5416_v1, %v2215_v63  ;;  %v2525_v45 = vadd.f32 %v5420_v30, %v2218_v21  ;;  %v2221_v59 = vadd.f32 %v5426_v18, %v5323_v54 }
 0x1d9   : > { %v3191_v17 = vadd.f32 %v3190_v44, %v3128_v62  ;;  %v3260_v60 = vadd.f32 %v3229_v50, %v3228_v26  ;;  %3164 = vst [vmem:[%s5519_s22 + $0x30] sm:$0xff] %v3132_v46  ;;  %v3130_v40 = vadd.f32 %v3015_v29, %v2824_v33  ;;  %v2827_v20 = vadd.f32 %v4193_v43, %v2521_v38 }
 0x1da   : > { %v2712_v53 = vpop.f32.mrf.mxu1  ;;  %v3018_v49 = vpop.f32.mrf.mxu0  ;;  %v2523_v26 = vadd.f32 %v5424_v31, %v2216_v10  ;;  %v2219_v29 = vadd.f32 %v5430_v14, %v5326_v9  ;;  %v3234_v50 = vmul.f32 %v3132_v46, %v3132_v46  ;;  %v2222_v43 = vadd.f32 %v5434_v37, %v5329_v28 }
 0x1db   : > { %v3261_v22 = vadd.f32 %v3260_v60, %v3230_v51  ;;  %3162 = vst [vmem:[%s5519_s22 + $0x20] sm:$0xff] %v3130_v40  ;;  %v3192_v6 = vadd.f32 %v3191_v17, %v3129_v2  ;;  %v2825_v62 = vadd.f32 %v2712_v53, %v2519_v19  ;;  %v3232_v52 = vmul.f32 %v3130_v40, %v3130_v40 }
 0x1dc   : > { %v3133_v32 = vadd.f32 %v4241_v56, %v2827_v20  ;;  %v4196_v27 = vpop.f32.mrf.mxu1  ;;  %v4244_v4 = vpop.f32.mrf.mxu0  ;;  %v2528_v60 = vadd.f32 %v5428_v3, %v2221_v59  ;;  %v2529_v20 = vadd.f32 %v5436_v35, %v2222_v43  ;;  %v2220_v53 = vadd.f32 %v5438_v47, %v5332_v5 }
 0x1dd   : > { %v3193_v55 = vadd.f32 %v3192_v6, %v3130_v40  ;;  %v3262_v41 = vadd.f32 %v3261_v22, %v3231_v13  ;;  %v3131_v61 = vadd.f32 %v3018_v49, %v2825_v62  ;;  %v2830_v16 = vadd.f32 %v4196_v27, %v2524_v15 }
 0x1de   : > { %3165 = vst [vmem:[%s5519_s22 + $0x38] sm:$0xff] %v3133_v32  ;;  %v2725_v0 = vpop.f32.mrf.mxu1  ;;  %v3031_v2 = vpop.f32.mrf.mxu0  ;;  %v3235_v56 = vmul.f32 %v3133_v32, %v3133_v32  ;;  %v2526_v40 = vadd.f32 %v5432_v25, %v2219_v29  ;;  %v2225_v49 = vadd.f32 %v5442_v23, %v5335_v8 }
 0x1df   : > { %v3263_v48 = vadd.f32 %v3262_v41, %v3232_v52  ;;  %3163 = vst [vmem:[%s5519_s22 + $0x28] sm:$0xff] %v3131_v61  ;;  %v3194_v42 = vadd.f32 %v3193_v55, %v3131_v61  ;;  %v3233_v34 = vmul.f32 %v3131_v61, %v3131_v61  ;;  %v3136_v12 = vadd.f32 %v4244_v4, %v2830_v16  ;;  %v5697_v61 = vld [vmem:[#allocation3_spill] sm:$0xff]  ;;  %v5698_v16 = vld [vmem:[#allocation18_spill] sm:$0xff] }
 0x1e0   : > { %v2828_v1 = vadd.f32 %v2725_v0, %v2522_v7  ;;  %v4197_v44 = vpop.f32.mrf.mxu1  ;;  %v4245_v30 = vpop.f32.mrf.mxu0  ;;  %v2223_v52 = vadd.f32 %v5446_v57, %v5338_v11  ;;  %v2527_v55 = vadd.f32 %v5440_v36, %v2220_v53  ;;  %v2532_v41 = vadd.f32 %v5444_v39, %v2225_v49  ;;  %v5708_v49 = vld [vmem:[#allocation7_spill] sm:$0xff] }
 0x1e1   : > { %v3195_v33 = vadd.f32 %v3194_v42, %v3132_v46  ;;  %v3264_v38 = vadd.f32 %v3263_v48, %v3233_v34  ;;  %3168 = vst [vmem:[%s5519_s22 + $0x50] sm:$0xff] %v3136_v12  ;;  %v2831_v19 = vadd.f32 %v4197_v44, %v2525_v45  ;;  %v2226_v7 = vadd.f32 %v5698_v16, %v5697_v61  ;;  %v5699_v42 = vld [vmem:[#allocation17_spill] sm:$0xff]  ;;  %v5712_v16 = vld [vmem:[#allocation8_spill] sm:$0xff] }
 0x1e2   : > { %v3134_v31 = vadd.f32 %v3031_v2, %v2828_v1  ;;  %v2728_v51 = vpop.f32.mrf.mxu1  ;;  %v3034_v54 = vpop.f32.mrf.mxu0  ;;  %v2530_v34 = vadd.f32 %v5699_v42, %v2223_v52  ;;  %v5710_v52 = vld [vmem:[#allocation23_spill] sm:$0xff] }
 0x1e3   : > { %v3265_v18 = vadd.f32 %v3264_v38, %v3234_v50  ;;  %v3196_v17 = vadd.f32 %v3195_v33, %v3133_v32  ;;  %v3137_v9 = vadd.f32 %v4245_v30, %v2831_v19  ;;  %v2829_v14 = vadd.f32 %v2728_v51, %v2523_v26  ;;  %v5701_v26 = vld [vmem:[#allocation20_spill] sm:$0xff]  ;;  %v5702_v33 = vld [vmem:[#allocation19_spill] sm:$0xff]  ;;  %v5704_v51 = vld [vmem:[#allocation22_spill] sm:$0xff] }
 0x1e4   : > { %3166 = vst [vmem:[%s5519_s22 + $0x40] sm:$0xff] %v3134_v31  ;;  %v4200_v46 = vpop.f32.mrf.mxu1  ;;  %v4248_v15 = vpop.f32.mrf.mxu0  ;;  %v3236_v21 = vmul.f32 %v3134_v31, %v3134_v31  ;;  %v3238_v32 = vmul.f32 %v3136_v12, %v3136_v12  ;;  %v2533_v38 = vadd.f32 %v5702_v33, %v2226_v7  ;;  %v5713_v7 = vld [vmem:[#allocation28_spill] sm:$0xff] }
 0x1e5   : > { %v3197_v63 = vadd.f32 %v3196_v17, %v3134_v31  ;;  %v3266_v28 = vadd.f32 %v3265_v18, %v3235_v56  ;;  %3169 = vst [vmem:[%s5519_s22 + $0x58] sm:$0xff] %v3137_v9  ;;  %v3135_v37 = vadd.f32 %v3034_v54, %v2829_v14  ;;  %v2834_v3 = vadd.f32 %v4200_v46, %v2528_v60  ;;  %v5703_v31 = vld [vmem:[#allocation5_spill] sm:$0xff] }
 0x1e6   : > { %v2741_v13 = vpop.f32.mrf.mxu1  ;;  %v3047_v25 = vpop.f32.mrf.mxu0  ;;  %v3239_v57 = vmul.f32 %v3137_v9, %v3137_v9  ;;  %v2229_v54 = vadd.f32 %v5704_v51, %v5703_v31 }
 0x1e7   : > { %v3267_v22 = vadd.f32 %v3266_v28, %v3236_v21  ;;  %3167 = vst [vmem:[%s5519_s22 + $0x48] sm:$0xff] %v3135_v37  ;;  %v3198_v6 = vadd.f32 %v3197_v63, %v3135_v37  ;;  %v3237_v62 = vmul.f32 %v3135_v37, %v3135_v37  ;;  %v2832_v10 = vadd.f32 %v2741_v13, %v2526_v40  ;;  %v5706_v21 = vld [vmem:[#allocation6_spill] sm:$0xff]  ;;  %v5707_v28 = vld [vmem:[#allocation24_spill] sm:$0xff] }
 0x1e8   : > { %v3140_v35 = vadd.f32 %v4248_v15, %v2834_v3  ;;  %v4201_v27 = vpop.f32.mrf.mxu1  ;;  %v4249_v5 = vpop.f32.mrf.mxu0  ;;  %v5705_v15 = vld [vmem:[#allocation21_spill] sm:$0xff]  ;;  %v2227_v37 = vadd.f32 %v5707_v28, %v5706_v21  ;;  %v5709_v3 = vld [vmem:[#allocation26_spill] sm:$0xff]  ;;  %v5722_v21 = vld [vmem:[#allocation31_spill] sm:$0xff] }
 0x1e9   : > { %v3199_v47 = vadd.f32 %v3198_v6, %v3136_v12  ;;  %v3268_v4 = vadd.f32 %v3267_v22, %v3237_v62  ;;  %v3138_v8 = vadd.f32 %v3047_v25, %v2832_v10  ;;  %v2835_v23 = vadd.f32 %v4201_v27, %v2529_v20  ;;  %v5700_v12 = vld [vmem:[#allocation4_spill] sm:$0xff] }
 0x1ea   : > { %3172 = vst [vmem:[%s5519_s22 + $0x70] sm:$0xff] %v3140_v35  ;;  %v2744_v45 = vpop.f32.mrf.mxu1  ;;  %v3050_v11 = vpop.f32.mrf.mxu0  ;;  %v2224_v59 = vadd.f32 %v5701_v26, %v5700_v12  ;;  %v2230_v13 = vadd.f32 %v5709_v3, %v5708_v49  ;;  %v3242_v25 = vmul.f32 %v3140_v35, %v3140_v35 }
 0x1eb   : > { %v3269_v0 = vadd.f32 %v3268_v4, %v3238_v32  ;;  %3170 = vst [vmem:[%s5519_s22 + $0x60] sm:$0xff] %v3138_v8  ;;  %v3200_v2 = vadd.f32 %v3199_v47, %v3137_v9  ;;  %v3141_v48 = vadd.f32 %v4249_v5, %v2835_v23  ;;  %v2833_v36 = vadd.f32 %v2744_v45, %v2527_v55 }
 0x1ec   : > { %v4204_v39 = vpop.f32.mrf.mxu1  ;;  %v4252_v29 = vpop.f32.mrf.mxu0  ;;  %v3240_v44 = vmul.f32 %v3138_v8, %v3138_v8  ;;  %v2531_v63 = vadd.f32 %v5705_v15, %v2224_v59  ;;  %v2536_v32 = vadd.f32 %v5710_v52, %v2229_v54  ;;  %v2228_v45 = vadd.f32 %v5713_v7, %v5712_v16  ;;  %v5715_v59 = vld [vmem:[#allocation9_spill] sm:$0xff] }
 0x1ed   : > { %v3201_v1 = vadd.f32 %v3200_v2, %v3138_v8  ;;  %v3270_v30 = vadd.f32 %v3269_v0, %v3239_v57  ;;  %3173 = vst [vmem:[%s5519_s22 + $0x78] sm:$0xff] %v3141_v48  ;;  %v2838_v50 = vadd.f32 %v4204_v39, %v2532_v41  ;;  %v3139_v19 = vadd.f32 %v3050_v11, %v2833_v36  ;;  %v5711_v41 = vld [vmem:[#allocation25_spill] sm:$0xff]  ;;  %v5714_v57 = vld [vmem:[#allocation27_spill] sm:$0xff] }
 0x1ee   : > { %v2757_v43 = vpop.f32.mrf.mxu1  ;;  %v3063_v56 = vpop.f32.mrf.mxu0  ;;  %v3243_v47 = vmul.f32 %v3141_v48, %v3141_v48  ;;  %v2534_v61 = vadd.f32 %v5711_v41, %v2227_v37  ;;  %v2537_v0 = vadd.f32 %v5714_v57, %v2230_v13 }
 0x1ef   : > { %v3271_v18 = vadd.f32 %v3270_v30, %v3240_v44  ;;  %v3144_v17 = vadd.f32 %v4252_v29, %v2838_v50  ;;  %v2836_v9 = vadd.f32 %v2757_v43, %v2530_v34  ;;  %3171 = vst [vmem:[%s5519_s22 + $0x68] sm:$0xff] %v3139_v19  ;;  %v3202_v14 = vadd.f32 %v3201_v1, %v3139_v19  ;;  %v5718_v43 = vld [vmem:[#allocation10_spill] sm:$0xff] }
 0x1f0   : > { %v3241_v60 = vmul.f32 %v3139_v19, %v3139_v19  ;;  %v4205_v40 = vpop.f32.mrf.mxu1  ;;  %v4253_v46 = vpop.f32.mrf.mxu0 }
 0x1f1   : > { %3176 = vst [vmem:[%s5519_s22 + $0x90] sm:$0xff] %v3144_v17  ;;  %v3142_v20 = vadd.f32 %v3063_v56, %v2836_v9  ;;  %v2839_v53 = vadd.f32 %v4205_v40, %v2533_v38  ;;  %v3203_v22 = vadd.f32 %v3202_v14, %v3140_v35  ;;  %v5717_v38 = vld [vmem:[#allocation29_spill] sm:$0xff]  ;;  %v5719_v56 = vld [vmem:[#allocation32_spill] sm:$0xff]  ;;  %v5721_v9 = vld [vmem:[#allocation34_spill] sm:$0xff] }
 0x1f2   : > { %v3272_v6 = vadd.f32 %v3271_v18, %v3241_v60  ;;  %v2760_v62 = vpop.f32.mrf.mxu1  ;;  %v3066_v10 = vpop.f32.mrf.mxu0  ;;  %v2535_v19 = vadd.f32 %v5717_v38, %v2228_v45  ;;  %v2231_v31 = vadd.f32 %v5719_v56, %v5718_v43  ;;  %v5720_v18 = vld [vmem:[#allocation11_spill] sm:$0xff]  ;;  %v3246_v60 = vmul.f32 %v3144_v17, %v3144_v17 }
 0x1f3   : > { %3174 = vst [vmem:[%s5519_s22 + $0x80] sm:$0xff] %v3142_v20  ;;  %v3145_v27 = vadd.f32 %v4253_v46, %v2839_v53  ;;  %v2837_v5 = vadd.f32 %v2760_v62, %v2531_v63  ;;  %v3204_v8 = vadd.f32 %v3203_v22, %v3141_v48  ;;  %v3244_v42 = vmul.f32 %v3142_v20, %v3142_v20  ;;  %v5716_v48 = vld [vmem:[#allocation30_spill] sm:$0xff]  ;;  %v5723_v22 = vld [vmem:[#allocation33_spill] sm:$0xff]  ;;  %v5724_v62 = vld [vmem:[#allocation12_spill] sm:$0xff] }
 0x1f4   : > { %v3273_v4 = vadd.f32 %v3272_v6, %v3242_v25  ;;  %v4208_v23 = vpop.f32.mrf.mxu1  ;;  %v4256_v55 = vpop.f32.mrf.mxu0  ;;  %v2233_v36 = vadd.f32 %v5716_v48, %v5715_v59  ;;  %v2234_v14 = vadd.f32 %v5721_v9, %v5720_v18  ;;  %v2538_v6 = vadd.f32 %v5723_v22, %v2231_v31 }
 0x1f5   : > { %3177 = vst [vmem:[%s5519_s22 + $0x98] sm:$0xff] %v3145_v27  ;;  %v3143_v35 = vadd.f32 %v3066_v10, %v2837_v5  ;;  %v2842_v11 = vadd.f32 %v4208_v23, %v2536_v32  ;;  %v3205_v2 = vadd.f32 %v3204_v8, %v3142_v20  ;;  %v3247_v53 = vmul.f32 %v3145_v27, %v3145_v27  ;;  %v5725_v10 = vld [vmem:[#allocation36_spill] sm:$0xff]  ;;  %v5726_v5 = vld [vmem:[#allocation35_spill] sm:$0xff] }
 0x1f6   : > { %v3274_v34 = vadd.f32 %v3273_v4, %v3243_v47  ;;  %v2773_v12 = vpop.f32.mrf.mxu1  ;;  %v3079_v26 = vpop.f32.mrf.mxu0  ;;  %v2540_v28 = vadd.f32 %v5722_v21, %v2233_v36  ;;  %v2232_v52 = vadd.f32 %v5725_v10, %v5724_v62  ;;  %v2541_v47 = vadd.f32 %v5726_v5, %v2234_v14  ;;  %v5737_v10 = vld [vmem:[#allocation43_spill] sm:$0xff] }
 0x1f7   : > { %3175 = vst [vmem:[%s5519_s22 + $0x88] sm:$0xff] %v3143_v35  ;;  %v3245_v39 = vmul.f32 %v3143_v35, %v3143_v35  ;;  %v3148_v29 = vadd.f32 %v4256_v55, %v2842_v11  ;;  %v2840_v1 = vadd.f32 %v2773_v12, %v2534_v61  ;;  %v3206_v30 = vadd.f32 %v3205_v2, %v3143_v35  ;;  %v5727_v61 = vld [vmem:[#allocation13_spill] sm:$0xff]  ;;  %v5730_v12 = vld [vmem:[#allocation14_spill] sm:$0xff] }
 0x1f8   : > { %v3275_v44 = vadd.f32 %v3274_v34, %v3244_v42  ;;  %v4209_v50 = vpop.f32.mrf.mxu1  ;;  %v4257_v33 = vpop.f32.mrf.mxu0  ;;  %v5729_v42 = vld [vmem:[#allocation37_spill] sm:$0xff] }
 0x1f9   : > { %3180 = vst [vmem:[%s5519_s22 + $0xb0] sm:$0xff] %v3148_v29  ;;  %v3146_v51 = vadd.f32 %v3079_v26, %v2840_v1  ;;  %v2843_v54 = vadd.f32 %v4209_v50, %v2537_v0  ;;  %v3207_v40 = vadd.f32 %v3206_v30, %v3144_v17  ;;  %v2539_v34 = vadd.f32 %v5729_v42, %v2232_v52  ;;  %v5731_v26 = vld [vmem:[#allocation40_spill] sm:$0xff] }
 0x1fa   : > { %v3276_v46 = vadd.f32 %v3275_v44, %v3245_v39  ;;  %v2776_v15 = vpop.f32.mrf.mxu1  ;;  %v3082_v63 = vpop.f32.mrf.mxu0  ;;  %v2235_v59 = vadd.f32 %v5731_v26, %v5730_v12  ;;  %v3250_v39 = vmul.f32 %v3148_v29, %v3148_v29 }
 0x1fb   : > { %3178 = vst [vmem:[%s5519_s22 + $0xa0] sm:$0xff] %v3146_v51  ;;  %v3149_v37 = vadd.f32 %v4257_v33, %v2843_v54  ;;  %v2841_v20 = vadd.f32 %v2776_v15, %v2535_v19  ;;  %v3208_v3 = vadd.f32 %v3207_v40, %v3145_v27  ;;  %v3248_v8 = vmul.f32 %v3146_v51, %v3146_v51  ;;  %v5728_v27 = vld [vmem:[#allocation38_spill] sm:$0xff]  ;;  %v5732_v33 = vld [vmem:[#allocation39_spill] sm:$0xff]  ;;  %v5735_v40 = vld [vmem:[#allocation16_spill] sm:$0xff] }
 0x1fc   : > { %v3277_v49 = vadd.f32 %v3276_v46, %v3246_v60  ;;  %v4212_v13 = vpop.f32.mrf.mxu1  ;;  %v4260_v25 = vpop.f32.mrf.mxu0  ;;  %v2237_v16 = vadd.f32 %v5728_v27, %v5727_v61  ;;  %v5733_v19 = vld [vmem:[#allocation15_spill] sm:$0xff]  ;;  %v5734_v60 = vld [vmem:[#allocation41_spill] sm:$0xff]  ;;  %v2236_v46 = vadd.f32 %v5504_v24, %v5735_v40 }
 0x1fd   : > { %3181 = vst [vmem:[%s5519_s22 + $0xb8] sm:$0xff] %v3149_v37  ;;  %v3147_v17 = vadd.f32 %v3082_v63, %v2841_v20  ;;  %v2846_v32 = vadd.f32 %v4212_v13, %v2540_v28  ;;  %v3209_v4 = vadd.f32 %v3208_v3, %v3146_v51  ;;  %v2238_v43 = vadd.f32 %v5499_v58, %v5733_v19 }
 0x1fe   : > { %v3278_v23 = vadd.f32 %v3277_v49, %v3247_v53  ;;  %v2789_v55 = vpop.f32.mrf.mxu1  ;;  %v3095_v41 = vpop.f32.mrf.mxu0  ;;  %v2544_v38 = vadd.f32 %v5732_v33, %v2237_v16  ;;  %v3251_v51 = vmul.f32 %v3149_v37, %v3149_v37  ;;  %v5736_v49 = vld [vmem:[#allocation42_spill] sm:$0xff]  ;;  %v2543_v52 = vadd.f32 %v5737_v10, %v2236_v46 }
 0x1ff   : > { %3179 = vst [vmem:[%s5519_s22 + $0xa8] sm:$0xff] %v3147_v17  ;;  %v3249_v7 = vmul.f32 %v3147_v17, %v3147_v17  ;;  %v3152_v45 = vadd.f32 %v4260_v25, %v2846_v32  ;;  %v2844_v35 = vadd.f32 %v2789_v55, %v2538_v6  ;;  %v3210_v57 = vadd.f32 %v3209_v4, %v3147_v17 }
 0x200   : > { %v3279_v11 = vadd.f32 %v3278_v23, %v3248_v8  ;;  %v4213_v0 = vpop.f32.mrf.mxu1  ;;  %v4261_v2 = vpop.f32.mrf.mxu0  ;;  %v2545_v3 = vadd.f32 %v5736_v49, %v2238_v43 }
 0x201   : > { %3184 = vst [vmem:[%s5519_s22 + $0xd0] sm:$0xff] %v3152_v45  ;;  %v3150_v48 = vadd.f32 %v3095_v41, %v2844_v35  ;;  %v2847_v36 = vadd.f32 %v4213_v0, %v2541_v47  ;;  %v3211_v1 = vadd.f32 %v3210_v57, %v3148_v29  ;;  %v2542_v29 = vadd.f32 %v5734_v60, %v2235_v59 }
 0x202   : > { %v3280_v44 = vadd.f32 %v3279_v11, %v3249_v7  ;;  %v2792_v30 = vpop.f32.mrf.mxu1  ;;  %v3098_v50 = vpop.f32.mrf.mxu0  ;;  %v3254_v5 = vmul.f32 %v3152_v45, %v3152_v45 }
 0x203   : > { %3182 = vst [vmem:[%s5519_s22 + $0xc0] sm:$0xff] %v3150_v48  ;;  %v3153_v56 = vadd.f32 %v4261_v2, %v2847_v36  ;;  %v2845_v31 = vadd.f32 %v2792_v30, %v2539_v34  ;;  %v3212_v18 = vadd.f32 %v3211_v1, %v3149_v37  ;;  %v3252_v58 = vmul.f32 %v3150_v48, %v3150_v48 }
 0x204   : > { %v3281_v54 = vadd.f32 %v3280_v44, %v3250_v39  ;;  %v4216_v9 = vpop.f32.mrf.mxu1  ;;  %v4264_v14 = vpop.f32.mrf.mxu0 }
 0x205   : > { %3185 = vst [vmem:[%s5519_s22 + $0xd8] sm:$0xff] %v3153_v56  ;;  %v3151_v15 = vadd.f32 %v3098_v50, %v2845_v31  ;;  %v2850_v63 = vadd.f32 %v4216_v9, %v2544_v38  ;;  %v3213_v21 = vadd.f32 %v3212_v18, %v3150_v48  ;;  %v3255_v41 = vmul.f32 %v3153_v56, %v3153_v56 }
 0x206   : > { %v3282_v28 = vadd.f32 %v3281_v54, %v3251_v51  ;;  %v2805_v20 = vpop.f32.mrf.mxu1  ;;  %v3111_v53 = vpop.f32.mrf.mxu0 }
 0x207   : > { %3183 = vst [vmem:[%s5519_s22 + $0xc8] sm:$0xff] %v3151_v15  ;;  %v3253_v37 = vmul.f32 %v3151_v15, %v3151_v15  ;;  %v3156_v13 = vadd.f32 %v4264_v14, %v2850_v63  ;;  %v2848_v25 = vadd.f32 %v2805_v20, %v2542_v29  ;;  %v3214_v6 = vadd.f32 %v3213_v21, %v3151_v15 }
 0x208   : > { %v3283_v22 = vadd.f32 %v3282_v28, %v3252_v58  ;;  %v4217_v62 = vpop.f32.mrf.mxu1  ;;  %v4265_v24 = vpop.f32.mrf.mxu0 }
 0x209   : > { %3188 = vst [vmem:[%s5519_s22 + $0xf0] sm:$0xff] %v3156_v13  ;;  %v3154_v17 = vadd.f32 %v3111_v53, %v2848_v25  ;;  %v2851_v32 = vadd.f32 %v4217_v62, %v2545_v3  ;;  %v3215_v47 = vadd.f32 %v3214_v6, %v3152_v45  ;;  %v3258_v34 = vmul.f32 %v3156_v13, %v3156_v13 }
 0x20a   : > { %v3284_v4 = vadd.f32 %v3283_v22, %v3253_v37  ;;  %v2808_v8 = vpop.f32.mrf.mxu1  ;;  %v3114_v16 = vpop.f32.mrf.mxu0 }
 0x20b   : > { %3186 = vst [vmem:[%s5519_s22 + $0xe0] sm:$0xff] %v3154_v17  ;;  %v3157_v23 = vadd.f32 %v4265_v24, %v2851_v32  ;;  %v2849_v55 = vadd.f32 %v2808_v8, %v2543_v52  ;;  %v3216_v27 = vadd.f32 %v3215_v47, %v3153_v56  ;;  %v3256_v11 = vmul.f32 %v3154_v17, %v3154_v17 }
 0x20c   : > { %v3285_v61 = vadd.f32 %v3284_v4, %v3254_v5 }
 0x20d   : > { %3189 = vst [vmem:[%s5519_s22 + $0xf8] sm:$0xff] %v3157_v23  ;;  %v3155_v7 = vadd.f32 %v3114_v16, %v2849_v55  ;;  %v3217_v35 = vadd.f32 %v3216_v27, %v3154_v17  ;;  %v3259_v26 = vmul.f32 %v3157_v23, %v3157_v23 }
 0x20e   : > { %v3286_v57 = vadd.f32 %v3285_v61, %v3255_v41 }
 0x20f   : > { %3187 = vst [vmem:[%s5519_s22 + $0xe8] sm:$0xff] %v3155_v7  ;;  %v3257_v0 = vmul.f32 %v3155_v7, %v3155_v7  ;;  %v3218_v42 = vadd.f32 %v3217_v35, %v3155_v7 }
 0x210   : > { %v3287_v2 = vadd.f32 %v3286_v57, %v3256_v11 }
 0x211   : > { %v3219_v45 = vadd.f32 %v3218_v42, %v3156_v13 }
 0x212   : > { %v3288_v12 = vadd.f32 %v3287_v2, %v3257_v0 }
 0x213   : > { %v3220_v59 = vadd.f32 %v3219_v45, %v3157_v23 }
 0x214   : > { %v3289_v48 = vadd.f32 %v3288_v12, %v3258_v34 }
 0x215   : > { %v3221_v36 = vrot.slane %v3220_v59, 4 }
 0x216   : > { %v3290_v39 = vadd.f32 %v3289_v48, %v3259_v26 }
 0x217   : > { %v3222_v1 = vadd.f32 %v3221_v36, %v3220_v59 }
 0x218   : > { %v3291_v44 = vrot.slane %v3290_v39, 4 }
 0x219   : > { %v3223_v30 = vrot.slane %v3222_v1, 2 }
 0x21a   : > { %v3292_v50 = vadd.f32 %v3291_v44, %v3290_v39 }
 0x21b   : > { %v3224_v33 = vadd.f32 %v3223_v30, %v3222_v1 }
 0x21c   : > { %v3293_v38 = vrot.slane %v3292_v50, 2 }
 0x21d   : > { %v3225_v19 = vrot.slane %v3224_v33, 1 }
 0x21e   : > { %v3294_v43 = vadd.f32 %v3293_v38, %v3292_v50 }
 0x21f   : > { %v3226_v56 = vadd.f32 %v3225_v19, %v3224_v33 }
 0x220   : > { %v3295_v31 = vrot.slane %v3294_v43, 1 }
 0x221   : > { %3227 = vst [vmem:[%s238_s29] sm:$0x1] %v3226_v56 }
 0x222   : > { %v3296_v51 = vadd.f32 %v3295_v31, %v3294_v43 }
 0x224   : > { %3297 = vst [vmem:[%s241_s27] sm:$0x1] %v3296_v51 }
 0x225 PF: > { %s16_s18 = sadd.s32 1, %s4370_s18  }
 0x226   : > { %p13_p4 = scmp.ge.s32.totalorder %s16_s18, 4  }
 0x228   :  { %15 = sbr.rel (!%p13_p4) target bundleno = 1 (0x1), region = 96 }

</bundles_post_ra>
